<compile_context>
chip_gen: v7x
topology: tpu7x:2x2x1
jax: 0.10.0
libtpu: 0.0.40
codegen_flags: <defaults>
</compile_context>

<pallas_src>
import jax
import jax.numpy as jnp
from jax import lax
from jax.experimental import pallas as pl
from jax.experimental.pallas import tpu as pltpu

BN_EPS = 1e-5


# ---------------------------------------------------------------------------
# Pallas kernels
# ---------------------------------------------------------------------------
def _store_tile_stats(acc, s_ref, rows):
    """Per-tile BN partials: row0 = sum, row1 = centred sum of squares."""
    tsum = jnp.sum(acc, axis=0, keepdims=True)              # (1, C)
    cen = acc - tsum * (1.0 / rows)
    m2 = jnp.sum(cen * cen, axis=0, keepdims=True)          # (1, C)
    s_ref[...] = jnp.concatenate([tsum, m2], axis=0).reshape(s_ref.shape)


def _conv_taps(xm_ref, xh_ref, w_ref):
    """3x3 conv as 3 row-shifted matmuls on a VMEM-resident window.

    xm_ref: (1, TH*W, K) main padded rows, xh_ref: (1, 2*W, K) halo rows,
    w_ref:  (3, K, Cout) weight taps per dh (dw folded into K = 3*Cin).
    """
    thw = xm_ref.shape[1]
    w_row = xh_ref.shape[1] // 2                            # = W
    win = jnp.concatenate([xm_ref[0], xh_ref[0]], axis=0)   # (TH*W + 2W, K)
    acc = jnp.dot(win[0:thw], w_ref[0], preferred_element_type=jnp.float32)
    acc = acc + jnp.dot(win[w_row:w_row + thw], w_ref[1],
                        preferred_element_type=jnp.float32)
    acc = acc + jnp.dot(win[2 * w_row:2 * w_row + thw], w_ref[2],
                        preferred_element_type=jnp.float32)
    return acc, win, thw, w_row


def _conv3x3_kernel(xm_ref, xh_ref, w_ref, y_ref, s_ref):
    acc, _, thw, _ = _conv_taps(xm_ref, xh_ref, w_ref)
    y_ref[0] = acc
    _store_tile_stats(acc, s_ref, thw)


def _conv3x3_proj_kernel(xm_ref, xh_ref, w_ref, wp_ref,
                         y_ref, yp_ref, s_ref, sp_ref):
    acc, win, thw, w_row = _conv_taps(xm_ref, xh_ref, w_ref)
    # 1x1 projection uses the already-resident centre-row window; wp is zero
    # outside the centre-tap rows, so no lane slicing / extra HBM input.
    accp = jnp.dot(win[w_row:w_row + thw], wp_ref[...],
                   preferred_element_type=jnp.float32)
    y_ref[0] = acc
    yp_ref[0] = accp
    _store_tile_stats(acc, s_ref, thw)
    _store_tile_stats(accp, sp_ref, thw)


def _apply_kernel(y2_ref, res_ref, vec_ref, o_ref):
    """out = BN2(y2) + BN_p(res)  (identity shortcut uses scale=1, shift=0)."""
    v = vec_ref[...]
    o_ref[0] = (y2_ref[0] * v[0:1, :] + v[1:2, :]
                + res_ref[0] * v[2:3, :] + v[3:4, :])


# ---------------------------------------------------------------------------
# pallas_call wrappers
# ---------------------------------------------------------------------------
def _cparams(semantics):
    return pltpu.CompilerParams(
        dimension_semantics=semantics,
        vmem_limit_bytes=48 * 1024 * 1024)    # fits v7x's 64 MiB; fine on v5e/v6e


def _pick_th(H, W, k_max, c_out, budget_bytes=16 * 1024 * 1024):
    """Largest even row tile TH dividing H whose double-buffered footprint fits."""
    for th in range(H, 1, -1):
        if H % th or th % 2:
            continue
        thw = th * W
        b = 2 * (thw * k_max * 2              # main window (bf16)
                 + 2 * W * k_max * 2          # halo (bf16)
                 + 2 * thw * c_out * 4        # up to two f32 outputs
                 + 4 * c_out * 4              # stats
                 + 4 * k_max * c_out * 2)     # weights
        if b <= budget_bytes:
            return th
    return 2


def _conv_call(xw, wm, N, H, W, TH, Cout):
    K = xw.shape[-1]
    nT = H // TH
    THW, HW = TH * W, H * W
    return pl.pallas_call(
        _conv3x3_kernel,
        out_shape=(jax.ShapeDtypeStruct((N, HW, Cout), jnp.float32),
                   jax.ShapeDtypeStruct((N, nT, 2, Cout), jnp.float32)),
        grid=(N, nT),
        in_specs=[pl.BlockSpec((1, THW, K), lambda n, i: (n, i, 0)),
                  pl.BlockSpec((1, 2 * W, K),
                               lambda n, i: (n, (i + 1) * (TH // 2), 0)),
                  pl.BlockSpec((3, K, Cout), lambda n, i: (0, 0, 0))],
        out_specs=(pl.BlockSpec((1, THW, Cout), lambda n, i: (n, i, 0)),
                   pl.BlockSpec((1, 1, 2, Cout), lambda n, i: (n, i, 0, 0))),
        compiler_params=_cparams(("parallel", "parallel")),
    )(xw, xw, wm)


def _conv_proj_call(xw, wm, wpm, N, H, W, TH, Cout):
    K = xw.shape[-1]
    nT = H // TH
    THW, HW = TH * W, H * W
    stat = jax.ShapeDtypeStruct((N, nT, 2, Cout), jnp.float32)
    return pl.pallas_call(
        _conv3x3_proj_kernel,
        out_shape=(jax.ShapeDtypeStruct((N, HW, Cout), jnp.float32),
                   jax.ShapeDtypeStruct((N, HW, Cout), jnp.float32),
                   stat, stat),
        grid=(N, nT),
        in_specs=[pl.BlockSpec((1, THW, K), lambda n, i: (n, i, 0)),
                  pl.BlockSpec((1, 2 * W, K),
                               lambda n, i: (n, (i + 1) * (TH // 2), 0)),
                  pl.BlockSpec((3, K, Cout), lambda n, i: (0, 0, 0)),
                  pl.BlockSpec((K, Cout), lambda n, i: (0, 0))],
        out_specs=(pl.BlockSpec((1, THW, Cout), lambda n, i: (n, i, 0)),
                   pl.BlockSpec((1, THW, Cout), lambda n, i: (n, i, 0)),
                   pl.BlockSpec((1, 1, 2, Cout), lambda n, i: (n, i, 0, 0)),
                   pl.BlockSpec((1, 1, 2, Cout), lambda n, i: (n, i, 0, 0))),
        compiler_params=_cparams(("parallel", "parallel")),
    )(xw, xw, wm, wpm)


def _apply_call(y2, res, vecs, N, H, W, TH, Cout):
    nT = H // TH
    THW, HW = TH * W, H * W
    return pl.pallas_call(
        _apply_kernel,
        out_shape=jax.ShapeDtypeStruct((N, HW, Cout), jnp.float32),
        grid=(N, nT),
        in_specs=[pl.BlockSpec((1, THW, Cout), lambda n, i: (n, i, 0)),
                  pl.BlockSpec((1, THW, Cout), lambda n, i: (n, i, 0)),
                  pl.BlockSpec((4, Cout), lambda n, i: (0, 0))],
        out_specs=pl.BlockSpec((1, THW, Cout), lambda n, i: (n, i, 0)),
        compiler_params=_cparams(("parallel", "parallel")),
    )(y2, res, vecs)


# ---------------------------------------------------------------------------
# JAX glue: reflect pad + width-tap gather, weight reshape, BN finalize
# ---------------------------------------------------------------------------
def _pad_wtaps(x_nhwc):
    """Reflect-pad and pre-gather the 3 width taps -> (N, (H+2)*W, 3*C)."""
    n, h, w, c = x_nhwc.shape
    xp = jnp.pad(x_nhwc, ((0, 0), (1, 1), (1, 1), (0, 0)), mode="reflect")
    xw = jnp.concatenate([xp[:, :, dw:dw + w, :] for dw in range(3)], axis=-1)
    return xw.reshape(n, (h + 2) * w, 3 * c)


def _w3x3_taps(w):
    """(Cout,Cin,3,3) -> (3, 3*Cin, Cout); rows ordered (dw, cin) per dh tap."""
    cout, cin, kh, kw = w.shape
    return jnp.transpose(w, (2, 3, 1, 0)).reshape(kh, kw * cin, cout)


def _bn_finalize(stats, rows_per_tile, total_rows, gamma, beta):
    """Chan combine of per-tile (sum, centred-M2) partials -> (scale, shift)."""
    c = stats.shape[-1]
    sums = stats[:, :, 0, :].reshape(-1, c)
    m2s = stats[:, :, 1, :].reshape(-1, c)
    mean = jnp.sum(sums, axis=0) / total_rows
    tile_means = sums / rows_per_tile
    m2 = jnp.sum(m2s, axis=0) + rows_per_tile * jnp.sum(
        (tile_means - mean[None, :]) ** 2, axis=0)
    var = m2 / total_rows                                   # biased (training BN)
    scale = gamma * lax.rsqrt(var + BN_EPS)
    shift = beta - mean * scale
    return scale, shift


def resnet_block_forward(x_nchw, params):
    rescale = "wp" in params
    N, Cin, H, W = x_nchw.shape
    Cout = params["w1"].shape[0]
    assert H % 2 == 0 and W % 8 == 0, "TODO(synk): pad/mask odd H or W%8!=0"
    R = N * H * W
    K1, K2 = 3 * Cin, 3 * Cout
    TH = _pick_th(H, W, max(K1, K2), Cout)
    THW = TH * W

    x = jnp.transpose(x_nchw, (0, 2, 3, 1)).astype(jnp.float32)     # NHWC

    w1m = _w3x3_taps(params["w1"]).astype(jnp.bfloat16)             # (3, 3Cin, Cout)
    w2m = _w3x3_taps(params["w2"]).astype(jnp.bfloat16)             # (3, 3Cout, Cout)

    # ---- stage 1: conv1 (+ fused 1x1 projection) + per-tile BN partials ----
    xw1 = _pad_wtaps(x.astype(jnp.bfloat16))                        # (N,(H+2)W,3Cin)
    if rescale:
        wproj = params["wp"].reshape(Cout, Cin).T
        wpm = jnp.zeros((K1, Cout), jnp.float32).at[Cin:2 * Cin, :].set(
            wproj).astype(jnp.bfloat16)
        y1, yp, s1, sp = _conv_proj_call(xw1, w1m, wpm, N, H, W, TH, Cout)
    else:
        y1, s1 = _conv_call(xw1, w1m, N, H, W, TH, Cout)

    scale1, shift1 = _bn_finalize(s1, THW, R, params["g1"], params["be1"])

    # ---- stage 2: BN1+ReLU+bf16 applied once in glue, conv2 + BN2 partials --
    h1 = jnp.maximum(y1 * scale1 + shift1, 0.0)
    h1w = _pad_wtaps(h1.reshape(N, H, W, Cout).astype(jnp.bfloat16))
    y2, s2 = _conv_call(h1w, w2m, N, H, W, TH, Cout)
    scale2, shift2 = _bn_finalize(s2, THW, R, params["g2"], params["be2"])

    # ---- stage 3: BN2-apply + shortcut (BN_p-apply or identity) + add ------
    if rescale:
        scale_r, shift_r = _bn_finalize(sp, THW, R, params["gp"], params["bep"])
        res = yp
    else:
        scale_r = jnp.ones((Cout,), jnp.float32)
        shift_r = jnp.zeros((Cout,), jnp.float32)
        res = x.reshape(N, H * W, Cout)
    vecs = jnp.stack([scale2, shift2, scale_r, shift_r], axis=0)    # (4, Cout)

    out = _apply_call(y2, res, vecs, N, H, W, TH, Cout)
    return jnp.transpose(out.reshape(N, H, W, Cout), (0, 3, 1, 2))


# ---------------------------------------------------------------------------
# Pure-JAX reference (same bf16-operand / f32-accumulate conv precision)
# ---------------------------------------------------------------------------
def _ref_forward(x, params):
    rescale = "wp" in params

    def conv(v, w):
        return lax.conv_general_dilated(
            v.astype(jnp.bfloat16), w.astype(jnp.bfloat16),
            window_strides=(1, 1), padding="VALID",
            dimension_numbers=("NCHW", "OIHW", "NCHW"),
            preferred_element_type=jnp.float32)

    def bn(y, g, b):
        mean = jnp.mean(y, axis=(0, 2, 3), keepdims=True)
        var = jnp.mean((y - mean) ** 2, axis=(0, 2, 3), keepdims=True)
        return ((y - mean) * lax.rsqrt(var + BN_EPS) * g.reshape(1, -1, 1, 1)
                + b.reshape(1, -1, 1, 1))

    def rpad(v):
        return jnp.pad(v, ((0, 0), (0, 0), (1, 1), (1, 1)), mode="reflect")

    h = jax.nn.relu(bn(conv(rpad(x), params["w1"]), params["g1"], params["be1"]))
    h = bn(conv(rpad(h), params["w2"]), params["g2"], params["be2"])
    res = bn(conv(x, params["wp"]), params["gp"], params["bep"]) if rescale else x
    return res + h


# ---------------------------------------------------------------------------
# Deterministic parameter init + driver
# ---------------------------------------------------------------------------
def _init_params(key, in_dim, out_dim):
    ks = jax.random.split(key, 9)
    n = lambda k, shape, s=0.1: s * jax.random.normal(k, shape, jnp.float32)
    p = {
        "w1": n(ks[0], (out_dim, in_dim, 3, 3)),
        "g1": 1.0 + n(ks[1], (out_dim,)), "be1": n(ks[2], (out_dim,)),
        "w2": n(ks[3], (out_dim, out_dim, 3, 3)),
        "g2": 1.0 + n(ks[4], (out_dim,)), "be2": n(ks[5], (out_dim,)),
    }
    if in_dim != out_dim:
        p.update({
            "wp": n(ks[6], (out_dim, in_dim, 1, 1)),
            "gp": 1.0 + n(ks[7], (out_dim,)), "bep": n(ks[8], (out_dim,)),
        })
    return p


if __name__ == "__main__":
    fwd = jax.jit(resnet_block_forward)

    key = jax.random.PRNGKey(0)
    kx1, kp1, kx2, kp2 = jax.random.split(key, 4)

    # Case 1: in_dim != out_dim -> projection shortcut (rescale=True)
    N, Cin, H, W, Cout = 2, 4, 16, 16, 32
    x1 = jax.random.normal(kx1, (N, Cin, H, W), jnp.float32)
    params1 = _init_params(kp1, Cin, Cout)
    out1 = jax.block_until_ready(fwd(x1, params1))
    ref1 = jax.block_until_ready(_ref_forward(x1, params1))
    assert out1.shape == ref1.shape == (N, Cout, H, W), (out1.shape, ref1.shape)
    err1 = float(jnp.max(jnp.abs(out1 - ref1)))
    assert jnp.allclose(out1, ref1, atol=1e-2, rtol=1e-2), err1

    # Case 2: in_dim == out_dim -> identity shortcut (rescale=False)
    x2 = jax.random.normal(kx2, (N, Cout, H, W), jnp.float32)
    params2 = _init_params(kp2, Cout, Cout)
    out2 = jax.block_until_ready(fwd(x2, params2))
    ref2 = jax.block_until_ready(_ref_forward(x2, params2))
    err2 = float(jnp.max(jnp.abs(out2 - ref2)))
    assert jnp.allclose(out2, ref2, atol=1e-2, rtol=1e-2), err2

    print("KERNEL_OK")
</pallas_src>

<mosaic_0001>
module attributes {stable_mosaic.version = 11 : i64} {
  func.func @_conv3x3_proj_kernel(%arg0: i32, %arg1: i32, %arg2: memref<1x256x12xbf16, #tpu.memory_space<vmem>>, %arg3: memref<1x32x12xbf16, #tpu.memory_space<vmem>>, %arg4: memref<3x12x32xbf16, #tpu.memory_space<vmem>>, %arg5: memref<12x32xbf16, #tpu.memory_space<vmem>>, %arg6: memref<1x256x32xf32, #tpu.memory_space<vmem>>, %arg7: memref<1x256x32xf32, #tpu.memory_space<vmem>>, %arg8: memref<1x1x2x32xf32, #tpu.memory_space<vmem>>, %arg9: memref<1x1x2x32xf32, #tpu.memory_space<vmem>>) attributes {dimension_semantics = [#tpu.dimension_semantics<parallel>, #tpu.dimension_semantics<parallel>], iteration_bounds = array<i64: 2, 1>, scalar_prefetch = 0 : i64, scratch_operands = 0 : i64, tpu.core_type = #tpu.core_type<tc>, window_params = [{transform_indices = @transform_0, window_bounds = array<i64: 1, 256, 12>}, {transform_indices = @transform_1, window_bounds = array<i64: 1, 32, 12>}, {pipeline_mode = #tpu.pipeline_mode<synchronous>, transform_indices = @transform_2, window_bounds = array<i64: 3, 12, 32>}, {pipeline_mode = #tpu.pipeline_mode<synchronous>, transform_indices = @transform_3, window_bounds = array<i64: 12, 32>}, {transform_indices = @transform_4, window_bounds = array<i64: 1, 256, 32>}, {transform_indices = @transform_5, window_bounds = array<i64: 1, 256, 32>}, {transform_indices = @transform_6, window_bounds = array<i64: 1, 1, 2, 32>}, {transform_indices = @transform_7, window_bounds = array<i64: 1, 1, 2, 32>}]} {
    %c0 = arith.constant 0 : index
    %c0_0 = arith.constant 0 : index
    %c0_1 = arith.constant 0 : index
    %0 = vector.load %arg2[%c0, %c0_0, %c0_1] : memref<1x256x12xbf16, #tpu.memory_space<vmem>>, vector<1x256x12xbf16>
    %1 = vector.shape_cast %0 : vector<1x256x12xbf16> to vector<256x12xbf16>
    %c0_2 = arith.constant 0 : index
    %c0_3 = arith.constant 0 : index
    %c0_4 = arith.constant 0 : index
    %2 = vector.load %arg3[%c0_2, %c0_3, %c0_4] : memref<1x32x12xbf16, #tpu.memory_space<vmem>>, vector<1x32x12xbf16>
    %3 = vector.shape_cast %2 : vector<1x32x12xbf16> to vector<32x12xbf16>
    %4 = tpu.concatenate %1, %3 in 0 : vector<256x12xbf16>, vector<32x12xbf16> -> vector<288x12xbf16>
    %5 = vector.extract_strided_slice %4 {offsets = [0, 0], sizes = [256, 12], strides = [1, 1]} : vector<288x12xbf16> to vector<256x12xbf16>
    %c0_5 = arith.constant 0 : index
    %c0_6 = arith.constant 0 : index
    %c0_7 = arith.constant 0 : index
    %6 = vector.load %arg4[%c0_5, %c0_6, %c0_7] : memref<3x12x32xbf16, #tpu.memory_space<vmem>>, vector<1x12x32xbf16>
    %7 = vector.shape_cast %6 : vector<1x12x32xbf16> to vector<12x32xbf16>
    %cst = arith.constant dense<0.000000e+00> : vector<256x32xf32>
    %8 = tpu.matmul %5, %7, %cst {dimension_numbers = #tpu.dot_dimension_numbers<[1], [0], [0], [1], [0, 0, 1, 1], [], []>} : vector<256x12xbf16>, vector<12x32xbf16>, vector<256x32xf32> -> vector<256x32xf32>
    %9 = vector.extract_strided_slice %4 {offsets = [16, 0], sizes = [256, 12], strides = [1, 1]} : vector<288x12xbf16> to vector<256x12xbf16>
    %c1 = arith.constant 1 : index
    %c0_8 = arith.constant 0 : index
    %c0_9 = arith.constant 0 : index
    %10 = vector.load %arg4[%c1, %c0_8, %c0_9] : memref<3x12x32xbf16, #tpu.memory_space<vmem>>, vector<1x12x32xbf16>
    %11 = vector.shape_cast %10 : vector<1x12x32xbf16> to vector<12x32xbf16>
    %cst_10 = arith.constant dense<0.000000e+00> : vector<256x32xf32>
    %12 = tpu.matmul %9, %11, %cst_10 {dimension_numbers = #tpu.dot_dimension_numbers<[1], [0], [0], [1], [0, 0, 1, 1], [], []>} : vector<256x12xbf16>, vector<12x32xbf16>, vector<256x32xf32> -> vector<256x32xf32>
    %13 = arith.addf %8, %12 : vector<256x32xf32>
    %14 = vector.extract_strided_slice %4 {offsets = [32, 0], sizes = [256, 12], strides = [1, 1]} : vector<288x12xbf16> to vector<256x12xbf16>
    %c2 = arith.constant 2 : index
    %c0_11 = arith.constant 0 : index
    %c0_12 = arith.constant 0 : index
    %15 = vector.load %arg4[%c2, %c0_11, %c0_12] : memref<3x12x32xbf16, #tpu.memory_space<vmem>>, vector<1x12x32xbf16>
    %16 = vector.shape_cast %15 : vector<1x12x32xbf16> to vector<12x32xbf16>
    %cst_13 = arith.constant dense<0.000000e+00> : vector<256x32xf32>
    %17 = tpu.matmul %14, %16, %cst_13 {dimension_numbers = #tpu.dot_dimension_numbers<[1], [0], [0], [1], [0, 0, 1, 1], [], []>} : vector<256x12xbf16>, vector<12x32xbf16>, vector<256x32xf32> -> vector<256x32xf32>
    %18 = arith.addf %13, %17 : vector<256x32xf32>
    %19 = vector.extract_strided_slice %4 {offsets = [16, 0], sizes = [256, 12], strides = [1, 1]} : vector<288x12xbf16> to vector<256x12xbf16>
    %c0_14 = arith.constant 0 : index
    %c0_15 = arith.constant 0 : index
    %20 = vector.load %arg5[%c0_14, %c0_15] : memref<12x32xbf16, #tpu.memory_space<vmem>>, vector<12x32xbf16>
    %cst_16 = arith.constant dense<0.000000e+00> : vector<256x32xf32>
    %21 = tpu.matmul %19, %20, %cst_16 {dimension_numbers = #tpu.dot_dimension_numbers<[1], [0], [0], [1], [0, 0, 1, 1], [], []>} : vector<256x12xbf16>, vector<12x32xbf16>, vector<256x32xf32> -> vector<256x32xf32>
    %c0_17 = arith.constant 0 : index
    %c0_18 = arith.constant 0 : index
    %c0_19 = arith.constant 0 : index
    %22 = vector.load %arg6[%c0_17, %c0_18, %c0_19] : memref<1x256x32xf32, #tpu.memory_space<vmem>>, vector<1x256x32xf32>
    %23 = vector.shape_cast %22 : vector<1x256x32xf32> to vector<256x32xf32>
    %24 = vector.shape_cast %18 : vector<256x32xf32> to vector<1x256x32xf32>
    tpu.vector_store %arg6[%c0_17, %c0_18, %c0_19], %24 {strides = array<i32>} : memref<1x256x32xf32, #tpu.memory_space<vmem>>, vector<1x256x32xf32>,
    %c0_20 = arith.constant 0 : index
    %c0_21 = arith.constant 0 : index
    %c0_22 = arith.constant 0 : index
    %25 = vector.load %arg7[%c0_20, %c0_21, %c0_22] : memref<1x256x32xf32, #tpu.memory_space<vmem>>, vector<1x256x32xf32>
    %26 = vector.shape_cast %25 : vector<1x256x32xf32> to vector<256x32xf32>
    %27 = vector.shape_cast %21 : vector<256x32xf32> to vector<1x256x32xf32>
    tpu.vector_store %arg7[%c0_20, %c0_21, %c0_22], %27 {strides = array<i32>} : memref<1x256x32xf32, #tpu.memory_space<vmem>>, vector<1x256x32xf32>,
    %cst_23 = arith.constant dense<0.000000e+00> : vector<32xf32>
    %28 = vector.multi_reduction <add>, %18, %cst_23 [0] : vector<256x32xf32> to vector<32xf32>
    %29 = vector.shape_cast %28 : vector<32xf32> to vector<1x32xf32>
    %cst_24 = arith.constant 3.906250e-03 : f32
    %30 = vector.broadcast %cst_24 : f32 to vector<1x32xf32>
    %31 = arith.mulf %29, %30 : vector<1x32xf32>
    %32 = vector.broadcast %31 : vector<1x32xf32> to vector<256x32xf32>
    %33 = arith.subf %18, %32 : vector<256x32xf32>
    %34 = arith.mulf %33, %33 : vector<256x32xf32>
    %cst_25 = arith.constant dense<0.000000e+00> : vector<32xf32>
    %35 = vector.multi_reduction <add>, %34, %cst_25 [0] : vector<256x32xf32> to vector<32xf32>
    %36 = vector.shape_cast %35 : vector<32xf32> to vector<1x32xf32>
    %37 = tpu.concatenate %29, %36 in 0 : vector<1x32xf32>, vector<1x32xf32> -> vector<2x32xf32>
    %38 = vector.shape_cast %37 : vector<2x32xf32> to vector<1x1x2x32xf32>
    %c0_26 = arith.constant 0 : index
    %c0_27 = arith.constant 0 : index
    %c0_28 = arith.constant 0 : index
    %c0_29 = arith.constant 0 : index
    %39 = vector.load %arg8[%c0_26, %c0_27, %c0_28, %c0_29] : memref<1x1x2x32xf32, #tpu.memory_space<vmem>>, vector<1x1x2x32xf32>
    tpu.vector_store %arg8[%c0_26, %c0_27, %c0_28, %c0_29], %38 {strides = array<i32>} : memref<1x1x2x32xf32, #tpu.memory_space<vmem>>, vector<1x1x2x32xf32>,
    %cst_30 = arith.constant dense<0.000000e+00> : vector<32xf32>
    %40 = vector.multi_reduction <add>, %21, %cst_30 [0] : vector<256x32xf32> to vector<32xf32>
    %41 = vector.shape_cast %40 : vector<32xf32> to vector<1x32xf32>
    %cst_31 = arith.constant 3.906250e-03 : f32
    %42 = vector.broadcast %cst_31 : f32 to vector<1x32xf32>
    %43 = arith.mulf %41, %42 : vector<1x32xf32>
    %44 = vector.broadcast %43 : vector<1x32xf32> to vector<256x32xf32>
    %45 = arith.subf %21, %44 : vector<256x32xf32>
    %46 = arith.mulf %45, %45 : vector<256x32xf32>
    %cst_32 = arith.constant dense<0.000000e+00> : vector<32xf32>
    %47 = vector.multi_reduction <add>, %46, %cst_32 [0] : vector<256x32xf32> to vector<32xf32>
    %48 = vector.shape_cast %47 : vector<32xf32> to vector<1x32xf32>
    %49 = tpu.concatenate %41, %48 in 0 : vector<1x32xf32>, vector<1x32xf32> -> vector<2x32xf32>
    %50 = vector.shape_cast %49 : vector<2x32xf32> to vector<1x1x2x32xf32>
    %c0_33 = arith.constant 0 : index
    %c0_34 = arith.constant 0 : index
    %c0_35 = arith.constant 0 : index
    %c0_36 = arith.constant 0 : index
    %51 = vector.load %arg9[%c0_33, %c0_34, %c0_35, %c0_36] : memref<1x1x2x32xf32, #tpu.memory_space<vmem>>, vector<1x1x2x32xf32>
    tpu.vector_store %arg9[%c0_33, %c0_34, %c0_35, %c0_36], %50 {strides = array<i32>} : memref<1x1x2x32xf32, #tpu.memory_space<vmem>>, vector<1x1x2x32xf32>,
    return
  }
  func.func @transform_0(%arg0: i32, %arg1: i32) -> (i32, i32, i32) {
    %c0_i32 = arith.constant 0 : i32
    %c0_i32_0 = arith.constant 0 : i32
    return %arg0, %arg1, %c0_i32 : i32, i32, i32
  }
  func.func @transform_1(%arg0: i32, %arg1: i32) -> (i32, i32, i32) {
    %c1_i32 = arith.constant 1 : i32
    %0 = arith.addi %arg1, %c1_i32 : i32
    %c8_i32 = arith.constant 8 : i32
    %1 = arith.muli %0, %c8_i32 : i32
    %c0_i32 = arith.constant 0 : i32
    %c0_i32_0 = arith.constant 0 : i32
    return %arg0, %1, %c0_i32 : i32, i32, i32
  }
  func.func @transform_2(%arg0: i32, %arg1: i32) -> (i32, i32, i32) {
    %c0_i32 = arith.constant 0 : i32
    %c0_i32_0 = arith.constant 0 : i32
    %c0_i32_1 = arith.constant 0 : i32
    %c0_i32_2 = arith.constant 0 : i32
    return %c0_i32, %c0_i32_0, %c0_i32_1 : i32, i32, i32
  }
  func.func @transform_3(%arg0: i32, %arg1: i32) -> (i32, i32) {
    %c0_i32 = arith.constant 0 : i32
    %c0_i32_0 = arith.constant 0 : i32
    %c0_i32_1 = arith.constant 0 : i32
    return %c0_i32, %c0_i32_0 : i32, i32
  }
  func.func @transform_4(%arg0: i32, %arg1: i32) -> (i32, i32, i32) {
    %c0_i32 = arith.constant 0 : i32
    %c0_i32_0 = arith.constant 0 : i32
    return %arg0, %arg1, %c0_i32 : i32, i32, i32
  }
  func.func @transform_5(%arg0: i32, %arg1: i32) -> (i32, i32, i32) {
    %c0_i32 = arith.constant 0 : i32
    %c0_i32_0 = arith.constant 0 : i32
    return %arg0, %arg1, %c0_i32 : i32, i32, i32
  }
  func.func @transform_6(%arg0: i32, %arg1: i32) -> (i32, i32, i32, i32) {
    %c0_i32 = arith.constant 0 : i32
    %c0_i32_0 = arith.constant 0 : i32
    %c0_i32_1 = arith.constant 0 : i32
    return %arg0, %arg1, %c0_i32, %c0_i32_0 : i32, i32, i32, i32
  }
  func.func @transform_7(%arg0: i32, %arg1: i32) -> (i32, i32, i32, i32) {
    %c0_i32 = arith.constant 0 : i32
    %c0_i32_0 = arith.constant 0 : i32
    %c0_i32_1 = arith.constant 0 : i32
    return %arg0, %arg1, %c0_i32, %c0_i32_0 : i32, i32, i32, i32
  }
}

module attributes {stable_mosaic.version = 11 : i64} {
  func.func @_conv3x3_kernel(%arg0: i32, %arg1: i32, %arg2: memref<1x256x96xbf16, #tpu.memory_space<vmem>>, %arg3: memref<1x32x96xbf16, #tpu.memory_space<vmem>>, %arg4: memref<3x96x32xbf16, #tpu.memory_space<vmem>>, %arg5: memref<1x256x32xf32, #tpu.memory_space<vmem>>, %arg6: memref<1x1x2x32xf32, #tpu.memory_space<vmem>>) attributes {dimension_semantics = [#tpu.dimension_semantics<parallel>, #tpu.dimension_semantics<parallel>], iteration_bounds = array<i64: 2, 1>, scalar_prefetch = 0 : i64, scratch_operands = 0 : i64, tpu.core_type = #tpu.core_type<tc>, window_params = [{transform_indices = @transform_0, window_bounds = array<i64: 1, 256, 96>}, {transform_indices = @transform_1, window_bounds = array<i64: 1, 32, 96>}, {pipeline_mode = #tpu.pipeline_mode<synchronous>, transform_indices = @transform_2, window_bounds = array<i64: 3, 96, 32>}, {transform_indices = @transform_3, window_bounds = array<i64: 1, 256, 32>}, {transform_indices = @transform_4, window_bounds = array<i64: 1, 1, 2, 32>}]} {
    %c0 = arith.constant 0 : index
    %c0_0 = arith.constant 0 : index
    %c0_1 = arith.constant 0 : index
    %0 = vector.load %arg2[%c0, %c0_0, %c0_1] : memref<1x256x96xbf16, #tpu.memory_space<vmem>>, vector<1x256x96xbf16>
    %1 = vector.shape_cast %0 : vector<1x256x96xbf16> to vector<256x96xbf16>
    %c0_2 = arith.constant 0 : index
    %c0_3 = arith.constant 0 : index
    %c0_4 = arith.constant 0 : index
    %2 = vector.load %arg3[%c0_2, %c0_3, %c0_4] : memref<1x32x96xbf16, #tpu.memory_space<vmem>>, vector<1x32x96xbf16>
    %3 = vector.shape_cast %2 : vector<1x32x96xbf16> to vector<32x96xbf16>
    %4 = tpu.concatenate %1, %3 in 0 : vector<256x96xbf16>, vector<32x96xbf16> -> vector<288x96xbf16>
    %5 = vector.extract_strided_slice %4 {offsets = [0, 0], sizes = [256, 96], strides = [1, 1]} : vector<288x96xbf16> to vector<256x96xbf16>
    %c0_5 = arith.constant 0 : index
    %c0_6 = arith.constant 0 : index
    %c0_7 = arith.constant 0 : index
    %6 = vector.load %arg4[%c0_5, %c0_6, %c0_7] : memref<3x96x32xbf16, #tpu.memory_space<vmem>>, vector<1x96x32xbf16>
    %7 = vector.shape_cast %6 : vector<1x96x32xbf16> to vector<96x32xbf16>
    %cst = arith.constant dense<0.000000e+00> : vector<256x32xf32>
    %8 = tpu.matmul %5, %7, %cst {dimension_numbers = #tpu.dot_dimension_numbers<[1], [0], [0], [1], [0, 0, 1, 1], [], []>} : vector<256x96xbf16>, vector<96x32xbf16>, vector<256x32xf32> -> vector<256x32xf32>
    %9 = vector.extract_strided_slice %4 {offsets = [16, 0], sizes = [256, 96], strides = [1, 1]} : vector<288x96xbf16> to vector<256x96xbf16>
    %c1 = arith.constant 1 : index
    %c0_8 = arith.constant 0 : index
    %c0_9 = arith.constant 0 : index
    %10 = vector.load %arg4[%c1, %c0_8, %c0_9] : memref<3x96x32xbf16, #tpu.memory_space<vmem>>, vector<1x96x32xbf16>
    %11 = vector.shape_cast %10 : vector<1x96x32xbf16> to vector<96x32xbf16>
    %cst_10 = arith.constant dense<0.000000e+00> : vector<256x32xf32>
    %12 = tpu.matmul %9, %11, %cst_10 {dimension_numbers = #tpu.dot_dimension_numbers<[1], [0], [0], [1], [0, 0, 1, 1], [], []>} : vector<256x96xbf16>, vector<96x32xbf16>, vector<256x32xf32> -> vector<256x32xf32>
    %13 = arith.addf %8, %12 : vector<256x32xf32>
    %14 = vector.extract_strided_slice %4 {offsets = [32, 0], sizes = [256, 96], strides = [1, 1]} : vector<288x96xbf16> to vector<256x96xbf16>
    %c2 = arith.constant 2 : index
    %c0_11 = arith.constant 0 : index
    %c0_12 = arith.constant 0 : index
    %15 = vector.load %arg4[%c2, %c0_11, %c0_12] : memref<3x96x32xbf16, #tpu.memory_space<vmem>>, vector<1x96x32xbf16>
    %16 = vector.shape_cast %15 : vector<1x96x32xbf16> to vector<96x32xbf16>
    %cst_13 = arith.constant dense<0.000000e+00> : vector<256x32xf32>
    %17 = tpu.matmul %14, %16, %cst_13 {dimension_numbers = #tpu.dot_dimension_numbers<[1], [0], [0], [1], [0, 0, 1, 1], [], []>} : vector<256x96xbf16>, vector<96x32xbf16>, vector<256x32xf32> -> vector<256x32xf32>
    %18 = arith.addf %13, %17 : vector<256x32xf32>
    %c0_14 = arith.constant 0 : index
    %c0_15 = arith.constant 0 : index
    %c0_16 = arith.constant 0 : index
    %19 = vector.load %arg5[%c0_14, %c0_15, %c0_16] : memref<1x256x32xf32, #tpu.memory_space<vmem>>, vector<1x256x32xf32>
    %20 = vector.shape_cast %19 : vector<1x256x32xf32> to vector<256x32xf32>
    %21 = vector.shape_cast %18 : vector<256x32xf32> to vector<1x256x32xf32>
    tpu.vector_store %arg5[%c0_14, %c0_15, %c0_16], %21 {strides = array<i32>} : memref<1x256x32xf32, #tpu.memory_space<vmem>>, vector<1x256x32xf32>,
    %cst_17 = arith.constant dense<0.000000e+00> : vector<32xf32>
    %22 = vector.multi_reduction <add>, %18, %cst_17 [0] : vector<256x32xf32> to vector<32xf32>
    %23 = vector.shape_cast %22 : vector<32xf32> to vector<1x32xf32>
    %cst_18 = arith.constant 3.906250e-03 : f32
    %24 = vector.broadcast %cst_18 : f32 to vector<1x32xf32>
    %25 = arith.mulf %23, %24 : vector<1x32xf32>
    %26 = vector.broadcast %25 : vector<1x32xf32> to vector<256x32xf32>
    %27 = arith.subf %18, %26 : vector<256x32xf32>
    %28 = arith.mulf %27, %27 : vector<256x32xf32>
    %cst_19 = arith.constant dense<0.000000e+00> : vector<32xf32>
    %29 = vector.multi_reduction <add>, %28, %cst_19 [0] : vector<256x32xf32> to vector<32xf32>
    %30 = vector.shape_cast %29 : vector<32xf32> to vector<1x32xf32>
    %31 = tpu.concatenate %23, %30 in 0 : vector<1x32xf32>, vector<1x32xf32> -> vector<2x32xf32>
    %32 = vector.shape_cast %31 : vector<2x32xf32> to vector<1x1x2x32xf32>
    %c0_20 = arith.constant 0 : index
    %c0_21 = arith.constant 0 : index
    %c0_22 = arith.constant 0 : index
    %c0_23 = arith.constant 0 : index
    %33 = vector.load %arg6[%c0_20, %c0_21, %c0_22, %c0_23] : memref<1x1x2x32xf32, #tpu.memory_space<vmem>>, vector<1x1x2x32xf32>
    tpu.vector_store %arg6[%c0_20, %c0_21, %c0_22, %c0_23], %32 {strides = array<i32>} : memref<1x1x2x32xf32, #tpu.memory_space<vmem>>, vector<1x1x2x32xf32>,
    return
  }
  func.func @transform_0(%arg0: i32, %arg1: i32) -> (i32, i32, i32) {
    %c0_i32 = arith.constant 0 : i32
    %c0_i32_0 = arith.constant 0 : i32
    return %arg0, %arg1, %c0_i32 : i32, i32, i32
  }
  func.func @transform_1(%arg0: i32, %arg1: i32) -> (i32, i32, i32) {
    %c1_i32 = arith.constant 1 : i32
    %0 = arith.addi %arg1, %c1_i32 : i32
    %c8_i32 = arith.constant 8 : i32
    %1 = arith.muli %0, %c8_i32 : i32
    %c0_i32 = arith.constant 0 : i32
    %c0_i32_0 = arith.constant 0 : i32
    return %arg0, %1, %c0_i32 : i32, i32, i32
  }
  func.func @transform_2(%arg0: i32, %arg1: i32) -> (i32, i32, i32) {
    %c0_i32 = arith.constant 0 : i32
    %c0_i32_0 = arith.constant 0 : i32
    %c0_i32_1 = arith.constant 0 : i32
    %c0_i32_2 = arith.constant 0 : i32
    return %c0_i32, %c0_i32_0, %c0_i32_1 : i32, i32, i32
  }
  func.func @transform_3(%arg0: i32, %arg1: i32) -> (i32, i32, i32) {
    %c0_i32 = arith.constant 0 : i32
    %c0_i32_0 = arith.constant 0 : i32
    return %arg0, %arg1, %c0_i32 : i32, i32, i32
  }
  func.func @transform_4(%arg0: i32, %arg1: i32) -> (i32, i32, i32, i32) {
    %c0_i32 = arith.constant 0 : i32
    %c0_i32_0 = arith.constant 0 : i32
    %c0_i32_1 = arith.constant 0 : i32
    return %arg0, %arg1, %c0_i32, %c0_i32_0 : i32, i32, i32, i32
  }
}

module attributes {stable_mosaic.version = 11 : i64} {
  func.func @_apply_kernel(%arg0: i32, %arg1: i32, %arg2: memref<1x256x32xf32, #tpu.memory_space<vmem>>, %arg3: memref<1x256x32xf32, #tpu.memory_space<vmem>>, %arg4: memref<4x32xf32, #tpu.memory_space<vmem>>, %arg5: memref<1x256x32xf32, #tpu.memory_space<vmem>>) attributes {dimension_semantics = [#tpu.dimension_semantics<parallel>, #tpu.dimension_semantics<parallel>], iteration_bounds = array<i64: 2, 1>, scalar_prefetch = 0 : i64, scratch_operands = 0 : i64, tpu.core_type = #tpu.core_type<tc>, window_params = [{transform_indices = @transform_0, window_bounds = array<i64: 1, 256, 32>}, {transform_indices = @transform_1, window_bounds = array<i64: 1, 256, 32>}, {pipeline_mode = #tpu.pipeline_mode<synchronous>, transform_indices = @transform_2, window_bounds = array<i64: 4, 32>}, {transform_indices = @transform_3, window_bounds = array<i64: 1, 256, 32>}]} {
    %c0 = arith.constant 0 : index
    %c0_0 = arith.constant 0 : index
    %0 = vector.load %arg4[%c0, %c0_0] : memref<4x32xf32, #tpu.memory_space<vmem>>, vector<4x32xf32>
    %c0_1 = arith.constant 0 : index
    %c0_2 = arith.constant 0 : index
    %c0_3 = arith.constant 0 : index
    %1 = vector.load %arg2[%c0_1, %c0_2, %c0_3] : memref<1x256x32xf32, #tpu.memory_space<vmem>>, vector<1x256x32xf32>
    %2 = vector.shape_cast %1 : vector<1x256x32xf32> to vector<256x32xf32>
    %3 = vector.extract_strided_slice %0 {offsets = [0, 0], sizes = [1, 32], strides = [1, 1]} : vector<4x32xf32> to vector<1x32xf32>
    %4 = vector.broadcast %3 : vector<1x32xf32> to vector<256x32xf32>
    %5 = arith.mulf %2, %4 : vector<256x32xf32>
    %6 = vector.extract_strided_slice %0 {offsets = [1, 0], sizes = [1, 32], strides = [1, 1]} : vector<4x32xf32> to vector<1x32xf32>
    %7 = vector.broadcast %6 : vector<1x32xf32> to vector<256x32xf32>
    %8 = arith.addf %5, %7 : vector<256x32xf32>
    %c0_4 = arith.constant 0 : index
    %c0_5 = arith.constant 0 : index
    %c0_6 = arith.constant 0 : index
    %9 = vector.load %arg3[%c0_4, %c0_5, %c0_6] : memref<1x256x32xf32, #tpu.memory_space<vmem>>, vector<1x256x32xf32>
    %10 = vector.shape_cast %9 : vector<1x256x32xf32> to vector<256x32xf32>
    %11 = vector.extract_strided_slice %0 {offsets = [2, 0], sizes = [1, 32], strides = [1, 1]} : vector<4x32xf32> to vector<1x32xf32>
    %12 = vector.broadcast %11 : vector<1x32xf32> to vector<256x32xf32>
    %13 = arith.mulf %10, %12 : vector<256x32xf32>
    %14 = arith.addf %8, %13 : vector<256x32xf32>
    %15 = vector.extract_strided_slice %0 {offsets = [3, 0], sizes = [1, 32], strides = [1, 1]} : vector<4x32xf32> to vector<1x32xf32>
    %16 = vector.broadcast %15 : vector<1x32xf32> to vector<256x32xf32>
    %17 = arith.addf %14, %16 : vector<256x32xf32>
    %c0_7 = arith.constant 0 : index
    %c0_8 = arith.constant 0 : index
    %c0_9 = arith.constant 0 : index
    %18 = vector.load %arg5[%c0_7, %c0_8, %c0_9] : memref<1x256x32xf32, #tpu.memory_space<vmem>>, vector<1x256x32xf32>
    %19 = vector.shape_cast %18 : vector<1x256x32xf32> to vector<256x32xf32>
    %20 = vector.shape_cast %17 : vector<256x32xf32> to vector<1x256x32xf32>
    tpu.vector_store %arg5[%c0_7, %c0_8, %c0_9], %20 {strides = array<i32>} : memref<1x256x32xf32, #tpu.memory_space<vmem>>, vector<1x256x32xf32>,
    return
  }
  func.func @transform_0(%arg0: i32, %arg1: i32) -> (i32, i32, i32) {
    %c0_i32 = arith.constant 0 : i32
    %c0_i32_0 = arith.constant 0 : i32
    return %arg0, %arg1, %c0_i32 : i32, i32, i32
  }
  func.func @transform_1(%arg0: i32, %arg1: i32) -> (i32, i32, i32) {
    %c0_i32 = arith.constant 0 : i32
    %c0_i32_0 = arith.constant 0 : i32
    return %arg0, %arg1, %c0_i32 : i32, i32, i32
  }
  func.func @transform_2(%arg0: i32, %arg1: i32) -> (i32, i32) {
    %c0_i32 = arith.constant 0 : i32
    %c0_i32_0 = arith.constant 0 : i32
    %c0_i32_1 = arith.constant 0 : i32
    return %c0_i32, %c0_i32_0 : i32, i32
  }
  func.func @transform_3(%arg0: i32, %arg1: i32) -> (i32, i32, i32) {
    %c0_i32 = arith.constant 0 : i32
    %c0_i32_0 = arith.constant 0 : i32
    return %arg0, %arg1, %c0_i32 : i32, i32, i32
  }
}

</mosaic_0001>

<bundles_post_ra>
// kernel: resnet_block_forward.3
= control target key start
LH: loop header
LB: loop body
LE: loop exit
PB: predicated region body
PF: predicated region fallthrough
CT: control target
= control target key end

     0   :  { %s2557_s24 = smov 0   ;;  %s2559_s25 = smov 0   ;;  %s3461_s0 = inlined_call_operand.vmem [shape: bf16[2,288,12], index: 0, kind: input, shape index: {}, may-alias: {0,1}]   ;;  %s3462_s1 = inlined_call_operand.vmem [shape: bf16[2,288,12], index: 1, kind: input, shape index: {}, may-alias: {0,1}]   ;;  %s3463_s2 = inlined_call_operand.vmem [shape: bf16[3,12,32], index: 2, kind: input, shape index: {}]   ;;  %s3464_s3 = inlined_call_operand.vmem [shape: bf16[12,32], index: 3, kind: input, shape index: {}]   ;;  %s3465_s4 = inlined_call_operand.vmem [shape: f32[2,256,32], index: 4, kind: output, shape index: {0}]   ;;  %s3466_s5 = inlined_call_operand.vmem [shape: f32[2,256,32], index: 5, kind: output, shape index: {1}]   ;;  %s3467_s6 = inlined_call_operand.vmem [shape: f32[2,1,2,32], index: 6, kind: output, shape index: {2}]   ;;  %s3468_s7 = inlined_call_operand.vmem [shape: f32[2,1,2,32], index: 7, kind: output, shape index: {3}]  }
   0x1   :  { %s2561_s26 = smov 0  }
   0x2 LB: > { %s30_s27 = sadd.s32 1, %s2511_s25  ;;  %p2067_p0 = scmp.ge.s32.totalorder %s2515_s26, 1  ;;  %s2515_s26 = sphi %s2561_s26, %s18_s26   ;;  %s2511_s25 = sphi %s2559_s25, %s3524_s25   ;;  %s2507_s24 = sphi %s2557_s24, %s3523_s24  }
   0x3   : > { %p32_p1 = scmp.ge.s32.totalorder %s30_s27, 2  ;;  %p304_p2 = scmp.lt.s32.totalorder %s2515_s26, 3 }
   0x5   : > { %s3526_s27 = smov (%p32_p1, %s30_s27), 0  ;;  %p305_p3 = pnand %p2067_p0, %p304_p2 }
   0x7   : > { %308 = sbr.rel (%p305_p3) target bundleno = 482 (0x1e2), region = 36 }
   0xe   : > { %vm634_vm0 = vcmask 1045504   ;;  %p387_p4 = scmp.lt.s32.totalorder %s2507_s24, 1  ;;  %v2471_v0 = vld [vmem:[%s3463_s2] sm:$0x3f]   ;;  %v2472_v1 = vld [vmem:[%s3463_s2 + $0x8] sm:$0x3f]  }
   0xf   : > { %2441 = vmatprep.subr.msk.bf16.mxu0 %vm634_vm0, %v2471_v0  ;;  %v808_v2 = vsel %vm634_vm0, %v2471_v0, 0  ;;  %v2475_v3 = vld [vmem:[%s3463_s2 + $0x10] sm:$0x3f]   ;;  %2440 = vmatprep.subr.msk.bf16.mxu1 %vm634_vm0, %v2472_v1  ;;  %v636_v4 = vsel %vm634_vm0, %v2472_v1, 0  ;;  %v2477_v5 = vld [vmem:[%s3464_s3] sm:$0x3f]  }
  0x10   : > { %s3528_s24 = smov (!%p387_p4, %s2507_s24), 1  ;;  %2275 = vmatpush3.bf16.msra.mxu0 %v808_v2  ;;  %2241 = vmatpush3.bf16.msra.mxu1 %v636_v4  ;;  %vm585_vm1 = vcmask 97280   ;;  %v983_v8 = vsel %vm634_vm0, %v2475_v3, 0  ;;  %v1186_v10 = vsel %vm634_vm0, %v2477_v5, 0  ;;  %vm1349_vm2 = vcmask 261120  }
  0x11   : > { %s2444_s11 = smul.u32 144, %s3528_s24  ;;  %2442 = vmatprep.subr.msk.bf16.mxu0 %vm634_vm0, %v2475_v3  ;;  %2443 = vmatprep.subr.msk.bf16.mxu1 %vm634_vm0, %v2477_v5  ;;  %s2170_s21 = sshll.u32 %s3528_s24, 8  ;;  %vm1617_vm3 = vcmask 1040384   ;;  %vm1619_vm4 = vcmask 254976  }
  0x12   : > { %s2750_s28 = scalar_lea.vmem %s3466_s5, %s2170_s21  ;;  %s2755_s8 = scalar_lea.vmem %s3465_s4, %s2170_s21 }
  0x13   : > { %s2598_s16 = scalar_lea.vmem %s3461_s0, %s2444_s11  ;;  %s2169_s17 = sadd.s32 128, %s2444_s11 }
  0x14   : > { %v2473_v6 = vld [vmem:[%s2598_s16 + $0x8] sm:$0xff]   ;;  %v2474_v7 = vld [vmem:[%s2598_s16] sm:$0xff]   ;;  %v2476_v9 = vld [vmem:[%s2598_s16 + $0x10] sm:$0xff]   ;;  %s2622_s20 = scalar_lea.vmem %s3462_s1, %s2169_s17  ;;  %s2074_s9 = sshll.u32 %s3528_s24, 1 }
  0x15   : > { %2242 = vmatprep.mubr.msk.bf16.mxu1 %vm585_vm1, %v2473_v6  ;;  %2276 = vmatprep.mubr.msk.bf16.mxu0 %vm585_vm1, %v2474_v7  ;;  %v2478_v11 = vld [vmem:[%s2598_s16 + $0x18] sm:$0xff]   ;;  %v2479_v12 = vld [vmem:[%s2598_s16 + $0x20] sm:$0xff]   ;;  %v2480_v13 = vld [vmem:[%s2598_s16 + $0x28] sm:$0xff]   ;;  %s440_s12 = scalar_lea.vmem %s3467_s6, %s2074_s9  ;;  %s447_s15 = scalar_lea.vmem %s3468_s7, %s2074_s9 }
  0x16   : > { %2243 = vmatmul.mubr.msk.bf16.vlgmr.msra.gmra.mrb[0].mxu1 %vm585_vm1, %v2476_v9  ;;  %2277 = vmatmul.mubr.msk.bf16.vlgmr.msra.gmra.mrb[0].mxu0 %vm585_vm1, %v2473_v6  ;;  %v2481_v14 = vld [vmem:[%s2598_s16 + $0x30] sm:$0xff]   ;;  %v2482_v15 = vld [vmem:[%s2598_s16 + $0x38] sm:$0xff]   ;;  %v2483_v16 = vld [vmem:[%s2598_s16 + $0x40] sm:$0xff]  }
  0x17   : > { %2309 = vmatpush3.bf16.msra.mxu0 %v983_v8  ;;  %2343 = vmatpush3.bf16.msra.mxu1 %v1186_v10  ;;  %v2484_v17 = vld [vmem:[%s2598_s16 + $0x48] sm:$0xff]   ;;  %v2485_v18 = vld [vmem:[%s2598_s16 + $0x50] sm:$0xff]   ;;  %v2486_v19 = vld [vmem:[%s2598_s16 + $0x58] sm:$0xff]  }
  0x18   : > { %2246 = vmatprep.mubr.msk.bf16.mxu1 %vm585_vm1, %v2478_v11  ;;  %2280 = vmatprep.mubr.msk.bf16.mxu0 %vm585_vm1, %v2476_v9  ;;  %v2487_v20 = vld [vmem:[%s2598_s16 + $0x60] sm:$0xff]   ;;  %v2488_v21 = vld [vmem:[%s2598_s16 + $0x68] sm:$0xff]   ;;  %v2489_v22 = vld [vmem:[%s2598_s16 + $0x70] sm:$0xff]  }
  0x19   : > { %v2490_v23 = vld [vmem:[%s2598_s16 + $0x78] sm:$0xff]   ;;  %v2491_v24 = vld [vmem:[%s2622_s20] sm:$0xff]   ;;  %v2492_v25 = vld [vmem:[%s2622_s20 + $0x8] sm:$0xff]  }
  0x1e   : > { %2247 = vmatmul.mubr.msk.bf16.gmra.mrb[4].mxu1 %vm585_vm1, %v2479_v12  ;;  %2281 = vmatmul.mubr.msk.bf16.gmra.mrb[4].mxu0 %vm585_vm1, %v2478_v11 }
  0x1f   : > { %2250 = vmatprep.mubr.msk.bf16.mxu1 %vm585_vm1, %v2480_v13  ;;  %2284 = vmatprep.mubr.msk.bf16.mxu0 %vm585_vm1, %v2479_v12 }
  0x26   : > { %2251 = vmatmul.mubr.msk.bf16.gmra.mrb[8].mxu1 %vm585_vm1, %v2481_v14  ;;  %2285 = vmatmul.mubr.msk.bf16.gmra.mrb[8].mxu0 %vm585_vm1, %v2480_v13 }
  0x27   : > { %2254 = vmatprep.mubr.msk.bf16.mxu1 %vm585_vm1, %v2482_v15  ;;  %2288 = vmatprep.mubr.msk.bf16.mxu0 %vm585_vm1, %v2481_v14 }
  0x2e   : > { %2255 = vmatmul.mubr.msk.bf16.gmra.mrb[12].mxu1 %vm585_vm1, %v2483_v16  ;;  %2289 = vmatmul.mubr.msk.bf16.gmra.mrb[12].mxu0 %vm585_vm1, %v2482_v15 }
  0x2f   : > { %2258 = vmatprep.mubr.msk.bf16.mxu1 %vm585_vm1, %v2484_v17  ;;  %2292 = vmatprep.mubr.msk.bf16.mxu0 %vm585_vm1, %v2483_v16 }
  0x36   : > { %2259 = vmatmul.mubr.msk.bf16.gmra.mrb[16].mxu1 %vm585_vm1, %v2485_v18  ;;  %2293 = vmatmul.mubr.msk.bf16.gmra.mrb[16].mxu0 %vm585_vm1, %v2484_v17 }
  0x37   : > { %2262 = vmatprep.mubr.msk.bf16.mxu1 %vm585_vm1, %v2486_v19  ;;  %2296 = vmatprep.mubr.msk.bf16.mxu0 %vm585_vm1, %v2485_v18 }
  0x3e   : > { %2263 = vmatmul.mubr.msk.bf16.gmra.mrb[20].mxu1 %vm585_vm1, %v2487_v20  ;;  %2297 = vmatmul.mubr.msk.bf16.gmra.mrb[20].mxu0 %vm585_vm1, %v2486_v19 }
  0x3f   : > { %2266 = vmatprep.mubr.msk.bf16.mxu1 %vm585_vm1, %v2488_v21  ;;  %2300 = vmatprep.mubr.msk.bf16.mxu0 %vm585_vm1, %v2487_v20 }
  0x46   : > { %2267 = vmatmul.mubr.msk.bf16.gmra.mrb[24].mxu1 %vm585_vm1, %v2489_v22  ;;  %2301 = vmatmul.mubr.msk.bf16.gmra.mrb[24].mxu0 %vm585_vm1, %v2488_v21 }
  0x47   : > { %2270 = vmatprep.mubr.msk.bf16.mxu1 %vm585_vm1, %v2490_v23  ;;  %2304 = vmatprep.mubr.msk.bf16.mxu0 %vm585_vm1, %v2489_v22 }
  0x4e   : > { %2271 = vmatmul.mubr.msk.bf16.gmra.mrb[28].mxu1 %vm585_vm1, %v2491_v24  ;;  %2305 = vmatmul.mubr.msk.bf16.gmra.mrb[28].mxu0 %vm585_vm1, %v2490_v23 }
  0x4f   : > { %2310 = vmatprep.mubr.msk.bf16.mxu0 %vm585_vm1, %v2476_v9  ;;  %2344 = vmatprep.mubr.msk.bf16.mxu1 %vm585_vm1, %v2473_v6 }
  0x56   : > { %2311 = vmatmul.mubr.msk.bf16.vlgmr.msra.gmra.mrb[0].mxu0 %vm585_vm1, %v2478_v11  ;;  %2345 = vmatmul.mubr.msk.bf16.vlgmr.msra.gmra.mrb[32].mxu1 %vm585_vm1, %v2476_v9 }
  0x57   : > { %2314 = vmatprep.mubr.msk.bf16.mxu0 %vm585_vm1, %v2479_v12  ;;  %2348 = vmatprep.mubr.msk.bf16.mxu1 %vm585_vm1, %v2478_v11 }
  0x5e   : > { %2315 = vmatmul.mubr.msk.bf16.gmra.mrb[4].mxu0 %vm585_vm1, %v2480_v13  ;;  %2349 = vmatmul.mubr.msk.bf16.gmra.mrb[36].mxu1 %vm585_vm1, %v2479_v12 }
  0x5f   : > { %2318 = vmatprep.mubr.msk.bf16.mxu0 %vm585_vm1, %v2481_v14  ;;  %2352 = vmatprep.mubr.msk.bf16.mxu1 %vm585_vm1, %v2480_v13 }
  0x66   : > { %2319 = vmatmul.mubr.msk.bf16.gmra.mrb[8].mxu0 %vm585_vm1, %v2482_v15  ;;  %2353 = vmatmul.mubr.msk.bf16.gmra.mrb[40].mxu1 %vm585_vm1, %v2481_v14 }
  0x67   : > { %2322 = vmatprep.mubr.msk.bf16.mxu0 %vm585_vm1, %v2483_v16  ;;  %2356 = vmatprep.mubr.msk.bf16.mxu1 %vm585_vm1, %v2482_v15 }
  0x6e   : > { %2323 = vmatmul.mubr.msk.bf16.gmra.mrb[12].mxu0 %vm585_vm1, %v2484_v17  ;;  %2357 = vmatmul.mubr.msk.bf16.gmra.mrb[44].mxu1 %vm585_vm1, %v2483_v16 }
  0x6f   : > { %2326 = vmatprep.mubr.msk.bf16.mxu0 %vm585_vm1, %v2485_v18  ;;  %2360 = vmatprep.mubr.msk.bf16.mxu1 %vm585_vm1, %v2484_v17 }
  0x76   : > { %2327 = vmatmul.mubr.msk.bf16.gmra.mrb[16].mxu0 %vm585_vm1, %v2486_v19  ;;  %2361 = vmatmul.mubr.msk.bf16.gmra.mrb[48].mxu1 %vm585_vm1, %v2485_v18 }
  0x77   : > { %2330 = vmatprep.mubr.msk.bf16.mxu0 %vm585_vm1, %v2487_v20  ;;  %2364 = vmatprep.mubr.msk.bf16.mxu1 %vm585_vm1, %v2486_v19 }
  0x7e   : > { %2331 = vmatmul.mubr.msk.bf16.gmra.mrb[20].mxu0 %vm585_vm1, %v2488_v21  ;;  %2365 = vmatmul.mubr.msk.bf16.gmra.mrb[52].mxu1 %vm585_vm1, %v2487_v20 }
  0x7f   : > { %2334 = vmatprep.mubr.msk.bf16.mxu0 %vm585_vm1, %v2489_v22  ;;  %2368 = vmatprep.mubr.msk.bf16.mxu1 %vm585_vm1, %v2488_v21 }
  0x86   : > { %2335 = vmatmul.mubr.msk.bf16.gmra.mrb[24].mxu0 %vm585_vm1, %v2490_v23  ;;  %2369 = vmatmul.mubr.msk.bf16.gmra.mrb[56].mxu1 %vm585_vm1, %v2489_v22 }
  0x87   : > { %2338 = vmatprep.mubr.msk.bf16.mxu0 %vm585_vm1, %v2491_v24  ;;  %2372 = vmatprep.mubr.msk.bf16.mxu1 %vm585_vm1, %v2490_v23 }
  0x8e   : > { %2339 = vmatmul.mubr.msk.bf16.gmra.mrb[28].mxu0 %vm585_vm1, %v2492_v25  ;;  %2373 = vmatmul.mubr.msk.bf16.gmra.mrb[60].mxu1 %vm585_vm1, %v2491_v24 }
  0xe9   : > { %v2244_v26 = vpop.f32.mrb[0].mxu1 }
  0xea   : > { %v672_v27 = vpop.f32.mrb[1].mxu1 }
  0xeb   : > { %v2245_v28 = vpop.f32.mrb[2].mxu1 }
  0xec   : > { %v675_v29 = vpop.f32.mrb[3].mxu1 }
  0xf1   : > { %v2690_v30 = vpop.f32.mrb[4].mxu1 }
  0xf2   : > { %v2692_v31 = vpop.f32.mrb[5].mxu1 }
  0xf3   : > { %v2694_v32 = vpop.f32.mrb[6].mxu1 }
  0xf4   : > { %v2696_v33 = vpop.f32.mrb[7].mxu1 }
  0xf9   : > { %v2698_v34 = vpop.f32.mrb[8].mxu1 }
  0xfa   : > { %v2700_v35 = vpop.f32.mrb[9].mxu1 }
  0xfb   : > { %v2702_v36 = vpop.f32.mrb[10].mxu1 }
  0xfc   : > { %v2704_v37 = vpop.f32.mrb[11].mxu1 }
 0x101   : > { %v2706_v38 = vpop.f32.mrb[12].mxu1 }
 0x102   : > { %v2708_v39 = vpop.f32.mrb[13].mxu1 }
 0x103   : > { %v2710_v40 = vpop.f32.mrb[14].mxu1 }
 0x104   : > { %v2712_v41 = vpop.f32.mrb[15].mxu1 }
 0x109   : > { %v2714_v42 = vpop.f32.mrb[16].mxu1 }
 0x10a   : > { %v2716_v43 = vpop.f32.mrb[17].mxu1 }
 0x10b   : > { %v2718_v44 = vpop.f32.mrb[18].mxu1 }
 0x10c   : > { %v2720_v45 = vpop.f32.mrb[19].mxu1 }
 0x111   : > { %v2722_v46 = vpop.f32.mrb[20].mxu1 }
 0x112   : > { %v2724_v47 = vpop.f32.mrb[21].mxu1 }
 0x113   : > { %v2726_v48 = vpop.f32.mrb[22].mxu1 }
 0x114   : > { %v2728_v49 = vpop.f32.mrb[23].mxu1 }
 0x119   : > { %v2730_v50 = vpop.f32.mrb[24].mxu1 }
 0x11a   : > { %v2732_v51 = vpop.f32.mrb[25].mxu1 }
 0x11b   : > { %v2734_v52 = vpop.f32.mrb[26].mxu1 }
 0x11c   : > { %v2736_v53 = vpop.f32.mrb[27].mxu1 }
 0x121   : > { %v2738_v54 = vpop.f32.mrb[28].mxu1 }
 0x122   : > { %v2740_v55 = vpop.f32.mrb[29].mxu1 }
 0x123   : > { %v2742_v56 = vpop.f32.mrb[30].mxu1 }
 0x124   : > { %v2744_v57 = vpop.f32.mrb[31].mxu1 }
 0x129   : > { %v2312_v58 = vpop.f32.mrb[0].mxu0  ;;  %v2757_v59 = vpop.f32.mrb[32].mxu1 }
 0x12a   : > { %v2759_v60 = vadd.f32 %v2312_v58, %v2244_v26  ;;  %1384 = vst.msk [vmem:[%s2750_s28 + $0x10] sm:$0xff] %vm1349_vm2, %v2757_v59  ;;  %v1019_v61 = vpop.f32.mrb[1].mxu0  ;;  %v2764_v62 = vpop.f32.mrb[33].mxu1  ;;  %v1624_v9 = vsel %vm1349_vm2, %v2757_v59, 0.0 }
 0x12b   : > { %v2766_v63 = vadd.f32 %v1019_v61, %v672_v27  ;;  %1382 = vst.msk [vmem:[%s2750_s28] sm:$0xff] %vm1349_vm2, %v2764_v62  ;;  %v1621_v0 = vsel %vm1349_vm2, %v2764_v62, 0.0  ;;  %v2313_v1 = vpop.f32.mrb[2].mxu0  ;;  %v2773_v2 = vpop.f32.mrb[34].mxu1 }
 0x12c   : > { %1352 = vst.msk [vmem:[%s2755_s8 + $0x10] sm:$0xff] %vm1349_vm2, %v2759_v60  ;;  %v2778_v3 = vadd.f32 %v2313_v1, %v2245_v28  ;;  %1385 = vst.msk [vmem:[%s2750_s28 + $0x18] sm:$0xff] %vm1349_vm2, %v2773_v2  ;;  %v1022_v4 = vpop.f32.mrb[3].mxu0  ;;  %v2783_v5 = vpop.f32.mrb[35].mxu1  ;;  %v1417_v14 = vsel %vm1349_vm2, %v2759_v60, 0.0  ;;  %v1626_v15 = vsel %vm1349_vm2, %v2773_v2, 0.0 }
 0x12d   : > { %1350 = vst.msk [vmem:[%s2755_s8] sm:$0xff] %vm1349_vm2, %v2766_v63  ;;  %v2788_v6 = vadd.f32 %v1022_v4, %v675_v29  ;;  %1383 = vst.msk [vmem:[%s2750_s28 + $0x8] sm:$0xff] %vm1349_vm2, %v2783_v5  ;;  %v1622_v7 = vsel %vm1349_vm2, %v2783_v5, 0.0  ;;  %v1414_v10 = vsel %vm1349_vm2, %v2766_v63, 0.0 }
 0x12e   : > { %1353 = vst.msk [vmem:[%s2755_s8 + $0x18] sm:$0xff] %vm1349_vm2, %v2778_v3  ;;  %v1623_v8 = vadd.f32 %v1622_v7, %v1621_v0  ;;  %v1419_v23 = vsel %vm1349_vm2, %v2778_v3, 0.0 }
 0x12f   : > { %1351 = vst.msk [vmem:[%s2755_s8 + $0x8] sm:$0xff] %vm1349_vm2, %v2788_v6  ;;  %v1415_v11 = vsel %vm1349_vm2, %v2788_v6, 0.0 }
 0x130   : > { %v1416_v12 = vadd.f32 %v1415_v11, %v1414_v10  ;;  %v1625_v13 = vadd.f32 %v1624_v9, %v1623_v8 }
 0x131   : > { %v2316_v16 = vpop.f32.mrb[4].mxu0  ;;  %v2811_v17 = vpop.f32.mrb[36].mxu1 }
 0x132   : > { %v1418_v18 = vadd.f32 %v1417_v14, %v1416_v12  ;;  %v2814_v19 = vadd.f32 %v2316_v16, %v2690_v30  ;;  %1388 = vst.msk [vmem:[%s2750_s28 + $0x30] sm:$0xff] %vm1349_vm2, %v2811_v17  ;;  %v1035_v20 = vpop.f32.mrb[5].mxu0  ;;  %v2819_v21 = vpop.f32.mrb[37].mxu1  ;;  %v1627_v22 = vadd.f32 %v1626_v15, %v1625_v13  ;;  %v1632_v7 = vsel %vm1349_vm2, %v2811_v17, 0.0 }
 0x133   : > { %v2824_v24 = vadd.f32 %v1035_v20, %v2692_v31  ;;  %1386 = vst.msk [vmem:[%s2750_s28 + $0x20] sm:$0xff] %vm1349_vm2, %v2819_v21  ;;  %v1628_v25 = vsel %vm1349_vm2, %v2819_v21, 0.0  ;;  %v2317_v26 = vpop.f32.mrb[6].mxu0  ;;  %v2831_v27 = vpop.f32.mrb[38].mxu1 }
 0x134   : > { %1356 = vst.msk [vmem:[%s2755_s8 + $0x30] sm:$0xff] %vm1349_vm2, %v2814_v19  ;;  %v1420_v28 = vadd.f32 %v1419_v23, %v1418_v18  ;;  %v1629_v29 = vadd.f32 %v1628_v25, %v1627_v22  ;;  %v2837_v30 = vadd.f32 %v2317_v26, %v2694_v32  ;;  %1389 = vst.msk [vmem:[%s2750_s28 + $0x38] sm:$0xff] %vm1349_vm2, %v2831_v27  ;;  %v1038_v31 = vpop.f32.mrb[7].mxu0  ;;  %v2842_v58 = vpop.f32.mrb[39].mxu1  ;;  %v1425_v10 = vsel %vm1349_vm2, %v2814_v19, 0.0 }
 0x135   : > { %1354 = vst.msk [vmem:[%s2755_s8 + $0x20] sm:$0xff] %vm1349_vm2, %v2824_v24  ;;  %v1421_v61 = vsel %vm1349_vm2, %v2824_v24, 0.0  ;;  %v2850_v0 = vadd.f32 %v1038_v31, %v2696_v33  ;;  %1387 = vst.msk [vmem:[%s2750_s28 + $0x28] sm:$0xff] %vm1349_vm2, %v2842_v58  ;;  %v1630_v32 = vsel %vm1349_vm2, %v2842_v58, 0.0  ;;  %v1634_v11 = vsel %vm1349_vm2, %v2831_v27, 0.0 }
 0x136   : > { %v1422_v1 = vadd.f32 %v1421_v61, %v1420_v28  ;;  %1357 = vst.msk [vmem:[%s2755_s8 + $0x38] sm:$0xff] %vm1349_vm2, %v2837_v30  ;;  %v1631_v4 = vadd.f32 %v1630_v32, %v1629_v29  ;;  %v1427_v22 = vsel %vm1349_vm2, %v2837_v30, 0.0 }
 0x137   : > { %1355 = vst.msk [vmem:[%s2755_s8 + $0x28] sm:$0xff] %vm1349_vm2, %v2850_v0  ;;  %v1423_v33 = vsel %vm1349_vm2, %v2850_v0, 0.0 }
 0x138   : > { %v1424_v8 = vadd.f32 %v1423_v33, %v1422_v1  ;;  %v1633_v9 = vadd.f32 %v1632_v7, %v1631_v4 }
 0x139   : > { %v2320_v12 = vpop.f32.mrb[8].mxu0  ;;  %v2871_v13 = vpop.f32.mrb[40].mxu1 }
 0x13a   : > { %v1426_v14 = vadd.f32 %v1425_v10, %v1424_v8  ;;  %v2874_v15 = vadd.f32 %v2320_v12, %v2698_v34  ;;  %1392 = vst.msk [vmem:[%s2750_s28 + $0x50] sm:$0xff] %vm1349_vm2, %v2871_v13  ;;  %v1051_v16 = vpop.f32.mrb[9].mxu0  ;;  %v2879_v18 = vpop.f32.mrb[41].mxu1  ;;  %v1635_v20 = vadd.f32 %v1634_v11, %v1633_v9  ;;  %v1640_v33 = vsel %vm1349_vm2, %v2871_v13, 0.0 }
 0x13b   : > { %v2884_v23 = vadd.f32 %v1051_v16, %v2700_v35  ;;  %1390 = vst.msk [vmem:[%s2750_s28 + $0x40] sm:$0xff] %vm1349_vm2, %v2879_v18  ;;  %v1636_v34 = vsel %vm1349_vm2, %v2879_v18, 0.0  ;;  %v2321_v25 = vpop.f32.mrb[10].mxu0  ;;  %v2891_v26 = vpop.f32.mrb[42].mxu1 }
 0x13c   : > { %1360 = vst.msk [vmem:[%s2755_s8 + $0x50] sm:$0xff] %vm1349_vm2, %v2874_v15  ;;  %v1428_v28 = vadd.f32 %v1427_v22, %v1426_v14  ;;  %v1637_v29 = vadd.f32 %v1636_v34, %v1635_v20  ;;  %v2897_v31 = vadd.f32 %v2321_v25, %v2702_v36  ;;  %1393 = vst.msk [vmem:[%s2750_s28 + $0x58] sm:$0xff] %vm1349_vm2, %v2891_v26  ;;  %v1054_v35 = vpop.f32.mrb[11].mxu0  ;;  %v2902_v61 = vpop.f32.mrb[43].mxu1  ;;  %v1433_v10 = vsel %vm1349_vm2, %v2874_v15, 0.0 }
 0x13d   : > { %1358 = vst.msk [vmem:[%s2755_s8 + $0x40] sm:$0xff] %vm1349_vm2, %v2884_v23  ;;  %v1429_v32 = vsel %vm1349_vm2, %v2884_v23, 0.0  ;;  %v2910_v1 = vadd.f32 %v1054_v35, %v2704_v37  ;;  %1391 = vst.msk [vmem:[%s2750_s28 + $0x48] sm:$0xff] %vm1349_vm2, %v2902_v61  ;;  %v1638_v36 = vsel %vm1349_vm2, %v2902_v61, 0.0  ;;  %v1642_v11 = vsel %vm1349_vm2, %v2891_v26, 0.0 }
 0x13e   : > { %v1430_v4 = vadd.f32 %v1429_v32, %v1428_v28  ;;  %1361 = vst.msk [vmem:[%s2755_s8 + $0x58] sm:$0xff] %vm1349_vm2, %v2897_v31  ;;  %v1639_v7 = vadd.f32 %v1638_v36, %v1637_v29  ;;  %v1435_v28 = vsel %vm1349_vm2, %v2897_v31, 0.0 }
 0x13f   : > { %1359 = vst.msk [vmem:[%s2755_s8 + $0x48] sm:$0xff] %vm1349_vm2, %v2910_v1  ;;  %v1431_v37 = vsel %vm1349_vm2, %v2910_v1, 0.0 }
 0x140   : > { %v1432_v8 = vadd.f32 %v1431_v37, %v1430_v4  ;;  %v1641_v9 = vadd.f32 %v1640_v33, %v1639_v7 }
 0x141   : > { %v2324_v12 = vpop.f32.mrb[12].mxu0  ;;  %v2931_v14 = vpop.f32.mrb[44].mxu1 }
 0x142   : > { %v1434_v16 = vadd.f32 %v1433_v10, %v1432_v8  ;;  %v2934_v20 = vadd.f32 %v2324_v12, %v2706_v38  ;;  %1396 = vst.msk [vmem:[%s2750_s28 + $0x70] sm:$0xff] %vm1349_vm2, %v2931_v14  ;;  %v1067_v22 = vpop.f32.mrb[13].mxu0  ;;  %v2939_v34 = vpop.f32.mrb[45].mxu1  ;;  %v1643_v25 = vadd.f32 %v1642_v11, %v1641_v9  ;;  %v1648_v11 = vsel %vm1349_vm2, %v2931_v14, 0.0 }
 0x143   : > { %v2944_v29 = vadd.f32 %v1067_v22, %v2708_v39  ;;  %1394 = vst.msk [vmem:[%s2750_s28 + $0x60] sm:$0xff] %vm1349_vm2, %v2939_v34  ;;  %v1644_v38 = vsel %vm1349_vm2, %v2939_v34, 0.0  ;;  %v2325_v35 = vpop.f32.mrb[14].mxu0  ;;  %v2951_v32 = vpop.f32.mrb[46].mxu1 }
 0x144   : > { %3487 = vst [vmem:[#allocation2_spill] sm:$0xff] %v2951_v32  ;;  %1364 = vst.msk [vmem:[%s2755_s8 + $0x70] sm:$0xff] %vm1349_vm2, %v2934_v20  ;;  %v1436_v36 = vadd.f32 %v1435_v28, %v1434_v16  ;;  %v1645_v4 = vadd.f32 %v1644_v38, %v1643_v25  ;;  %v2957_v7 = vadd.f32 %v2325_v35, %v2710_v40  ;;  %v1070_v39 = vpop.f32.mrb[15].mxu0  ;;  %v2962_v33 = vpop.f32.mrb[47].mxu1  ;;  %v1441_v22 = vsel %vm1349_vm2, %v2934_v20, 0.0 }
 0x145   : > { %1397 = vst.msk [vmem:[%s2750_s28 + $0x78] sm:$0xff] %vm1349_vm2, %v2951_v32  ;;  %1362 = vst.msk [vmem:[%s2755_s8 + $0x60] sm:$0xff] %vm1349_vm2, %v2944_v29  ;;  %v1437_v37 = vsel %vm1349_vm2, %v2944_v29, 0.0  ;;  %v2970_v8 = vadd.f32 %v1070_v39, %v2712_v41  ;;  %v1646_v40 = vsel %vm1349_vm2, %v2962_v33, 0.0  ;;  %v1650_v25 = vsel %vm1349_vm2, %v2951_v32, 0.0 }
 0x146   : > { %1395 = vst.msk [vmem:[%s2750_s28 + $0x68] sm:$0xff] %vm1349_vm2, %v2962_v33  ;;  %v1438_v9 = vadd.f32 %v1437_v37, %v1436_v36  ;;  %1365 = vst.msk [vmem:[%s2755_s8 + $0x78] sm:$0xff] %vm1349_vm2, %v2957_v7  ;;  %v1647_v10 = vadd.f32 %v1646_v40, %v1645_v4  ;;  %v1443_v40 = vsel %vm1349_vm2, %v2957_v7, 0.0 }
 0x147   : > { %1363 = vst.msk [vmem:[%s2755_s8 + $0x68] sm:$0xff] %vm1349_vm2, %v2970_v8  ;;  %v1439_v41 = vsel %vm1349_vm2, %v2970_v8, 0.0 }
 0x148   : > { %v1440_v12 = vadd.f32 %v1439_v41, %v1438_v9  ;;  %v1649_v16 = vadd.f32 %v1648_v11, %v1647_v10 }
 0x149   : > { %v2328_v28 = vpop.f32.mrb[16].mxu0  ;;  %v2991_v38 = vpop.f32.mrb[48].mxu1 }
 0x14a   : > { %3488 = vst [vmem:[#allocation3_spill] sm:$0xff] %v2991_v38  ;;  %v1442_v35 = vadd.f32 %v1441_v22, %v1440_v12  ;;  %v2994_v36 = vadd.f32 %v2328_v28, %v2714_v42  ;;  %1400 = vst.msk [vmem:[%s2750_s28 + $0x90] sm:$0xff] %vm1349_vm2, %v2991_v38  ;;  %v1083_v4 = vpop.f32.mrb[17].mxu0  ;;  %v2999_v39 = vpop.f32.mrb[49].mxu1  ;;  %v1651_v37 = vadd.f32 %v1650_v25, %v1649_v16 }
 0x14b   : > { %3489 = vst [vmem:[#allocation4_spill] sm:$0xff] %v2999_v39  ;;  %v3004_v9 = vadd.f32 %v1083_v4, %v2716_v43  ;;  %1398 = vst.msk [vmem:[%s2750_s28 + $0x80] sm:$0xff] %vm1349_vm2, %v2999_v39  ;;  %v1652_v42 = vsel %vm1349_vm2, %v2999_v39, 0.0  ;;  %v2329_v10 = vpop.f32.mrb[18].mxu0  ;;  %v3011_v11 = vpop.f32.mrb[50].mxu1 }
 0x14c   : > { %3490 = vst [vmem:[#allocation5_spill] sm:$0xff] %v3011_v11  ;;  %1368 = vst.msk [vmem:[%s2755_s8 + $0x90] sm:$0xff] %vm1349_vm2, %v2994_v36  ;;  %v1444_v41 = vadd.f32 %v1443_v40, %v1442_v35  ;;  %v1653_v12 = vadd.f32 %v1652_v42, %v1651_v37  ;;  %v3017_v16 = vadd.f32 %v2329_v10, %v2718_v44  ;;  %v1086_v43 = vpop.f32.mrb[19].mxu0  ;;  %v3022_v22 = vpop.f32.mrb[51].mxu1  ;;  %v1656_v37 = vsel %vm1349_vm2, %v2991_v38, 0.0 }
 0x14d   : > { %1401 = vst.msk [vmem:[%s2750_s28 + $0x98] sm:$0xff] %vm1349_vm2, %v3011_v11  ;;  %3491 = vst [vmem:[#allocation6_spill] sm:$0xff] %v3022_v22  ;;  %v1445_v25 = vsel %vm1349_vm2, %v3004_v9, 0.0  ;;  %v3030_v28 = vadd.f32 %v1086_v43, %v2720_v45  ;;  %v1654_v44 = vsel %vm1349_vm2, %v3022_v22, 0.0  ;;  %v1449_v10 = vsel %vm1349_vm2, %v2994_v36, 0.0 }
 0x14e   : > { %1366 = vst.msk [vmem:[%s2755_s8 + $0x80] sm:$0xff] %vm1349_vm2, %v3004_v9  ;;  %1399 = vst.msk [vmem:[%s2750_s28 + $0x88] sm:$0xff] %vm1349_vm2, %v3022_v22  ;;  %v1446_v35 = vadd.f32 %v1445_v25, %v1444_v41  ;;  %v1655_v4 = vadd.f32 %v1654_v44, %v1653_v12  ;;  %v1658_v41 = vsel %vm1349_vm2, %v3011_v11, 0.0 }
 0x14f   : > { %1369 = vst.msk [vmem:[%s2755_s8 + $0x98] sm:$0xff] %vm1349_vm2, %v3017_v16  ;;  %1367 = vst.msk [vmem:[%s2755_s8 + $0x88] sm:$0xff] %vm1349_vm2, %v3030_v28  ;;  %v1447_v45 = vsel %vm1349_vm2, %v3030_v28, 0.0 }
 0x150   : > { %v1448_v40 = vadd.f32 %v1447_v45, %v1446_v35  ;;  %v1657_v42 = vadd.f32 %v1656_v37, %v1655_v4  ;;  %v1451_v45 = vsel %vm1349_vm2, %v3017_v16, 0.0 }
 0x151   : > { %v2332_v12 = vpop.f32.mrb[20].mxu0  ;;  %v3051_v43 = vpop.f32.mrb[52].mxu1 }
 0x152   : > { %3492 = vst [vmem:[#allocation7_spill] sm:$0xff] %v3051_v43  ;;  %v1450_v25 = vadd.f32 %v1449_v10, %v1448_v40  ;;  %v3054_v44 = vadd.f32 %v2332_v12, %v2722_v46  ;;  %1404 = vst.msk [vmem:[%s2750_s28 + $0xb0] sm:$0xff] %vm1349_vm2, %v3051_v43  ;;  %v1099_v35 = vpop.f32.mrb[21].mxu0  ;;  %v3059_v4 = vpop.f32.mrb[53].mxu1  ;;  %v1659_v37 = vadd.f32 %v1658_v41, %v1657_v42 }
 0x153   : > { %3493 = vst [vmem:[#allocation8_spill] sm:$0xff] %v3059_v4  ;;  %v3064_v11 = vadd.f32 %v1099_v35, %v2724_v47  ;;  %1402 = vst.msk [vmem:[%s2750_s28 + $0xa0] sm:$0xff] %vm1349_vm2, %v3059_v4  ;;  %v1660_v46 = vsel %vm1349_vm2, %v3059_v4, 0.0  ;;  %v2333_v40 = vpop.f32.mrb[22].mxu0  ;;  %v3071_v10 = vpop.f32.mrb[54].mxu1 }
 0x154   : > { %3494 = vst [vmem:[#allocation9_spill] sm:$0xff] %v3071_v10  ;;  %1372 = vst.msk [vmem:[%s2755_s8 + $0xb0] sm:$0xff] %vm1349_vm2, %v3054_v44  ;;  %v1452_v42 = vadd.f32 %v1451_v45, %v1450_v25  ;;  %v1661_v41 = vadd.f32 %v1660_v46, %v1659_v37  ;;  %v3077_v12 = vadd.f32 %v2333_v40, %v2726_v48  ;;  %v1102_v47 = vpop.f32.mrb[23].mxu0  ;;  %v3082_v35 = vpop.f32.mrb[55].mxu1  ;;  %v1664_v45 = vsel %vm1349_vm2, %v3051_v43, 0.0 }
 0x155   : > { %1405 = vst.msk [vmem:[%s2750_s28 + $0xb8] sm:$0xff] %vm1349_vm2, %v3071_v10  ;;  %3495 = vst [vmem:[#allocation10_spill] sm:$0xff] %v3082_v35  ;;  %v1453_v4 = vsel %vm1349_vm2, %v3064_v11, 0.0  ;;  %v3090_v38 = vadd.f32 %v1102_v47, %v2728_v49  ;;  %v1662_v48 = vsel %vm1349_vm2, %v3082_v35, 0.0  ;;  %v1457_v47 = vsel %vm1349_vm2, %v3054_v44, 0.0 }
 0x156   : > { %1370 = vst.msk [vmem:[%s2755_s8 + $0xa0] sm:$0xff] %vm1349_vm2, %v3064_v11  ;;  %1403 = vst.msk [vmem:[%s2750_s28 + $0xa8] sm:$0xff] %vm1349_vm2, %v3082_v35  ;;  %v1454_v25 = vadd.f32 %v1453_v4, %v1452_v42  ;;  %v1663_v37 = vadd.f32 %v1662_v48, %v1661_v41  ;;  %v1666_v4 = vsel %vm1349_vm2, %v3071_v10, 0.0 }
 0x157   : > { %1373 = vst.msk [vmem:[%s2755_s8 + $0xb8] sm:$0xff] %vm1349_vm2, %v3077_v12  ;;  %1371 = vst.msk [vmem:[%s2755_s8 + $0xa8] sm:$0xff] %vm1349_vm2, %v3090_v38  ;;  %v1455_v49 = vsel %vm1349_vm2, %v3090_v38, 0.0 }
 0x158   : > { %v1456_v46 = vadd.f32 %v1455_v49, %v1454_v25  ;;  %v1665_v40 = vadd.f32 %v1664_v45, %v1663_v37  ;;  %v1459_v49 = vsel %vm1349_vm2, %v3077_v12, 0.0 }
 0x159   : > { %v2336_v42 = vpop.f32.mrb[24].mxu0  ;;  %v3111_v41 = vpop.f32.mrb[56].mxu1 }
 0x15a   : > { %3496 = vst [vmem:[#allocation11_spill] sm:$0xff] %v3111_v41  ;;  %v1458_v48 = vadd.f32 %v1457_v47, %v1456_v46  ;;  %v3114_v43 = vadd.f32 %v2336_v42, %v2730_v50  ;;  %1408 = vst.msk [vmem:[%s2750_s28 + $0xd0] sm:$0xff] %vm1349_vm2, %v3111_v41  ;;  %v1115_v25 = vpop.f32.mrb[25].mxu0  ;;  %v3119_v37 = vpop.f32.mrb[57].mxu1  ;;  %v1667_v45 = vadd.f32 %v1666_v4, %v1665_v40 }
 0x15b   : > { %3497 = vst [vmem:[#allocation12_spill] sm:$0xff] %v3119_v37  ;;  %v3124_v10 = vadd.f32 %v1115_v25, %v2732_v51  ;;  %1406 = vst.msk [vmem:[%s2750_s28 + $0xc0] sm:$0xff] %vm1349_vm2, %v3119_v37  ;;  %v1668_v50 = vsel %vm1349_vm2, %v3119_v37, 0.0  ;;  %v2337_v46 = vpop.f32.mrb[26].mxu0  ;;  %v3131_v47 = vpop.f32.mrb[58].mxu1 }
 0x15c   : > { %3498 = vst [vmem:[#allocation13_spill] sm:$0xff] %v3131_v47  ;;  %1376 = vst.msk [vmem:[%s2755_s8 + $0xd0] sm:$0xff] %vm1349_vm2, %v3114_v43  ;;  %v1460_v40 = vadd.f32 %v1459_v49, %v1458_v48  ;;  %v1669_v4 = vadd.f32 %v1668_v50, %v1667_v45  ;;  %v3137_v42 = vadd.f32 %v2337_v46, %v2734_v52  ;;  %v1118_v51 = vpop.f32.mrb[27].mxu0  ;;  %v3142_v25 = vpop.f32.mrb[59].mxu1  ;;  %v1672_v49 = vsel %vm1349_vm2, %v3111_v41, 0.0 }
 0x15d   : > { %1409 = vst.msk [vmem:[%s2750_s28 + $0xd8] sm:$0xff] %vm1349_vm2, %v3131_v47  ;;  %3499 = vst [vmem:[#allocation14_spill] sm:$0xff] %v3142_v25  ;;  %v1461_v37 = vsel %vm1349_vm2, %v3124_v10, 0.0  ;;  %v3150_v35 = vadd.f32 %v1118_v51, %v2736_v53  ;;  %v1670_v52 = vsel %vm1349_vm2, %v3142_v25, 0.0  ;;  %v1465_v51 = vsel %vm1349_vm2, %v3114_v43, 0.0 }
 0x15e   : > { %1374 = vst.msk [vmem:[%s2755_s8 + $0xc0] sm:$0xff] %vm1349_vm2, %v3124_v10  ;;  %1407 = vst.msk [vmem:[%s2750_s28 + $0xc8] sm:$0xff] %vm1349_vm2, %v3142_v25  ;;  %v1462_v48 = vadd.f32 %v1461_v37, %v1460_v40  ;;  %v1671_v45 = vadd.f32 %v1670_v52, %v1669_v4  ;;  %v1674_v37 = vsel %vm1349_vm2, %v3131_v47, 0.0 }
 0x15f   : > { %1377 = vst.msk [vmem:[%s2755_s8 + $0xd8] sm:$0xff] %vm1349_vm2, %v3137_v42  ;;  %1375 = vst.msk [vmem:[%s2755_s8 + $0xc8] sm:$0xff] %vm1349_vm2, %v3150_v35  ;;  %v1463_v53 = vsel %vm1349_vm2, %v3150_v35, 0.0 }
 0x160   : > { %v1464_v50 = vadd.f32 %v1463_v53, %v1462_v48  ;;  %v1673_v46 = vadd.f32 %v1672_v49, %v1671_v45  ;;  %v1467_v53 = vsel %vm1349_vm2, %v3137_v42, 0.0 }
 0x161   : > { %v2340_v40 = vpop.f32.mrb[28].mxu0  ;;  %v3171_v4 = vpop.f32.mrb[60].mxu1 }
 0x162   : > { %3500 = vst [vmem:[#allocation15_spill] sm:$0xff] %v3171_v4  ;;  %v1466_v52 = vadd.f32 %v1465_v51, %v1464_v50  ;;  %v3174_v41 = vadd.f32 %v2340_v40, %v2738_v54  ;;  %1412 = vst.msk [vmem:[%s2750_s28 + $0xf0] sm:$0xff] %vm1349_vm2, %v3171_v4  ;;  %v1131_v48 = vpop.f32.mrb[29].mxu0  ;;  %v3179_v45 = vpop.f32.mrb[61].mxu1  ;;  %v1675_v49 = vadd.f32 %v1674_v37, %v1673_v46 }
 0x163   : > { %3501 = vst [vmem:[#allocation16_spill] sm:$0xff] %v3179_v45  ;;  %v3184_v47 = vadd.f32 %v1131_v48, %v2740_v55  ;;  %1410 = vst.msk [vmem:[%s2750_s28 + $0xe0] sm:$0xff] %vm1349_vm2, %v3179_v45  ;;  %v1676_v54 = vsel %vm1349_vm2, %v3179_v45, 0.0  ;;  %v2341_v50 = vpop.f32.mrb[30].mxu0  ;;  %v3191_v51 = vpop.f32.mrb[62].mxu1 }
 0x164   : > { %1380 = vst.msk [vmem:[%s2755_s8 + $0xf0] sm:$0xff] %vm1349_vm2, %v3174_v41  ;;  %v1468_v46 = vadd.f32 %v1467_v53, %v1466_v52  ;;  %v1677_v37 = vadd.f32 %v1676_v54, %v1675_v49  ;;  %v3197_v40 = vadd.f32 %v2341_v50, %v2742_v56  ;;  %1413 = vst.msk [vmem:[%s2750_s28 + $0xf8] sm:$0xff] %vm1349_vm2, %v3191_v51  ;;  %v1134_v55 = vpop.f32.mrb[31].mxu0  ;;  %v3202_v48 = vpop.f32.mrb[63].mxu1  ;;  %v1680_v53 = vsel %vm1349_vm2, %v3171_v4, 0.0 }
 0x165   : > { %3502 = vst [vmem:[#allocation17_spill] sm:$0xff] %v3184_v47  ;;  %3503 = vst [vmem:[#allocation18_spill] sm:$0xff] %v3202_v48  ;;  %v1469_v45 = vsel %vm1349_vm2, %v3184_v47, 0.0  ;;  %v3210_v25 = vadd.f32 %v1134_v55, %v2744_v57  ;;  %v1678_v56 = vsel %vm1349_vm2, %v3202_v48, 0.0  ;;  %v1473_v55 = vsel %vm1349_vm2, %v3174_v41, 0.0 }
 0x166   : > { %1378 = vst.msk [vmem:[%s2755_s8 + $0xe0] sm:$0xff] %vm1349_vm2, %v3184_v47  ;;  %1411 = vst.msk [vmem:[%s2750_s28 + $0xe8] sm:$0xff] %vm1349_vm2, %v3202_v48  ;;  %v1470_v52 = vadd.f32 %v1469_v45, %v1468_v46  ;;  %v1679_v49 = vadd.f32 %v1678_v56, %v1677_v37  ;;  %v1682_v45 = vsel %vm1349_vm2, %v3191_v51, 0.0  ;;  %v1475_v37 = vsel %vm1349_vm2, %v3197_v40, 0.0 }
 0x167   : > { %3504 = vst [vmem:[#allocation19_spill] sm:$0xff] %v3210_v25  ;;  %1381 = vst.msk [vmem:[%s2755_s8 + $0xf8] sm:$0xff] %vm1349_vm2, %v3197_v40  ;;  %v1471_v57 = vsel %vm1349_vm2, %v3210_v25, 0.0 }
 0x168   : > { %1379 = vst.msk [vmem:[%s2755_s8 + $0xe8] sm:$0xff] %vm1349_vm2, %v3210_v25  ;;  %v1472_v54 = vadd.f32 %v1471_v57, %v1470_v52  ;;  %v1681_v50 = vadd.f32 %v1680_v53, %v1679_v49 }
 0x16a   : > { %v1474_v46 = vadd.f32 %v1473_v55, %v1472_v54  ;;  %v1683_v48 = vadd.f32 %v1682_v45, %v1681_v50 }
 0x16c   : > { %v1476_v56 = vadd.f32 %v1475_v37, %v1474_v46  ;;  %v1684_v49 = vrot.slane %v1683_v48, 4 }
 0x16e   : > { %v1477_v4 = vrot.slane %v1476_v56, 4  ;;  %v1685_v54 = vadd.f32 %v1684_v49, %v1683_v48 }
 0x170   : > { %v1478_v22 = vadd.f32 %v1477_v4, %v1476_v56 }
 0x172   : > { %v1479_v39 = vrot.slane %v1478_v22, 2 }
 0x174   : > { %v1480_v47 = vadd.f32 %v1479_v39, %v1478_v22 }
 0x176   : > { %v1481_v32 = vrot.slane %v1480_v47, 1 }
 0x178   : > { %v3233_v25 = vadd.f32 %v1481_v32, %v1480_v47  ;;  %v1686_v47 = vrot.slane %v1685_v54, 2 }
 0x17a   : > { %v3236_v52 = vmul.f32 0.00390625, %v3233_v25 }
 0x17c   : > { %v1484_v53 = vsub.f32 %v2766_v63, %v3236_v52  ;;  %v1485_v57 = vsub.f32 %v2788_v6, %v3236_v52  ;;  %v1486_v50 = vsub.f32 %v2759_v60, %v3236_v52  ;;  %v1487_v39 = vsub.f32 %v2778_v3, %v3236_v52 }
 0x17d   : > { %v1488_v4 = vsub.f32 %v2824_v24, %v3236_v52  ;;  %v1489_v63 = vsub.f32 %v2850_v0, %v3236_v52  ;;  %v1687_v60 = vadd.f32 %v1686_v47, %v1685_v54  ;;  %v1490_v3 = vsub.f32 %v2814_v19, %v3236_v52 }
 0x17e   : > { %v1516_v22 = vmul.f32 %v1484_v53, %v1484_v53  ;;  %v1517_v32 = vmul.f32 %v1485_v57, %v1485_v57  ;;  %v1518_v55 = vmul.f32 %v1486_v50, %v1486_v50  ;;  %v1519_v45 = vmul.f32 %v1487_v39, %v1487_v39 }
 0x17f   : > { %v1520_v37 = vmul.f32 %v1488_v4, %v1488_v4  ;;  %v1491_v24 = vsub.f32 %v2837_v30, %v3236_v52  ;;  %v1521_v53 = vmul.f32 %v1489_v63, %v1489_v63  ;;  %v1688_v50 = vrot.slane %v1687_v60, 1 }
 0x180   : > { %v1548_v6 = vsel %vm1349_vm2, %v1516_v22, 0.0  ;;  %v1549_v48 = vsel %vm1349_vm2, %v1517_v32, 0.0  ;;  %v1551_v56 = vsel %vm1349_vm2, %v1518_v55, 0.0  ;;  %v1553_v0 = vsel %vm1349_vm2, %v1519_v45, 0.0 }
 0x181   : > { %v1550_v46 = vadd.f32 %v1549_v48, %v1548_v6  ;;  %v1492_v39 = vsub.f32 %v2884_v23, %v3236_v52  ;;  %v1522_v22 = vmul.f32 %v1490_v3, %v1490_v3  ;;  %v1555_v54 = vsel %vm1349_vm2, %v1520_v37, 0.0 }
 0x182   : > { %v1493_v19 = vsub.f32 %v2910_v1, %v3236_v52  ;;  %v1523_v47 = vmul.f32 %v1491_v24, %v1491_v24  ;;  %v1557_v4 = vsel %vm1349_vm2, %v1521_v53, 0.0  ;;  %v3264_v30 = vadd.f32 %v1688_v50, %v1687_v60 }
 0x183   : > { %v1552_v49 = vadd.f32 %v1551_v56, %v1550_v46  ;;  %v1494_v63 = vsub.f32 %v2874_v15, %v3236_v52  ;;  %v1524_v45 = vmul.f32 %v1492_v39, %v1492_v39  ;;  %v1559_v6 = vsel %vm1349_vm2, %v1522_v22, 0.0 }
 0x184   : > { %v1495_v48 = vsub.f32 %v2897_v31, %v3236_v52  ;;  %v1525_v46 = vmul.f32 %v1493_v19, %v1493_v19  ;;  %v1561_v3 = vsel %vm1349_vm2, %v1523_v47, 0.0  ;;  %v3273_v37 = vmul.f32 0.00390625, %v3264_v30 }
 0x185   : > { %v1554_v57 = vadd.f32 %v1553_v0, %v1552_v49  ;;  %v1496_v60 = vsub.f32 %v2944_v29, %v3236_v52  ;;  %v1526_v56 = vmul.f32 %v1494_v63, %v1494_v63  ;;  %v1563_v15 = vsel %vm1349_vm2, %v1524_v45, 0.0 }
 0x186   : > { %v1497_v24 = vsub.f32 %v2970_v8, %v3236_v52  ;;  %v1527_v53 = vmul.f32 %v1495_v48, %v1495_v48  ;;  %v1565_v31 = vsel %vm1349_vm2, %v1525_v46, 0.0  ;;  %v1692_v50 = vsub.f32 %v2783_v5, %v3273_v37 }
 0x187   : > { %v1556_v32 = vadd.f32 %v1555_v54, %v1554_v57  ;;  %v1691_v57 = vsub.f32 %v2764_v62, %v3273_v37  ;;  %v1498_v29 = vsub.f32 %v2934_v20, %v3236_v52  ;;  %v1528_v39 = vmul.f32 %v1496_v60, %v1496_v60 }
 0x188   : > { %v1567_v22 = vsel %vm1349_vm2, %v1526_v56, 0.0  ;;  %v1693_v8 = vsub.f32 %v2757_v59, %v3273_v37  ;;  %v1529_v19 = vmul.f32 %v1497_v24, %v1497_v24  ;;  %v1569_v47 = vsel %vm1349_vm2, %v1527_v53, 0.0 }
 0x189   : > { %v1558_v55 = vadd.f32 %v1557_v4, %v1556_v32  ;;  %v1499_v32 = vsub.f32 %v2957_v7, %v3236_v52  ;;  %v1694_v5 = vsub.f32 %v2773_v2, %v3273_v37  ;;  %v1723_v4 = vmul.f32 %v1691_v57, %v1691_v57 }
 0x18a   : > { %v1500_v20 = vsub.f32 %v3004_v9, %v3236_v52  ;;  %v1530_v63 = vmul.f32 %v1498_v29, %v1498_v29  ;;  %v1571_v45 = vsel %vm1349_vm2, %v1528_v39, 0.0  ;;  %v1695_v59 = vsub.f32 %v2819_v21, %v3273_v37 }
 0x18b   : > { %v1560_v23 = vadd.f32 %v1559_v6, %v1558_v55  ;;  %v1724_v55 = vmul.f32 %v1692_v50, %v1692_v50  ;;  %v1725_v7 = vmul.f32 %v1693_v8, %v1693_v8  ;;  %v1531_v48 = vmul.f32 %v1499_v32, %v1499_v32 }
 0x18c   : > { %v1573_v46 = vsel %vm1349_vm2, %v1529_v19, 0.0  ;;  %v1696_v2 = vsub.f32 %v2842_v58, %v3273_v37  ;;  %v1755_v9 = vsel %vm1349_vm2, %v1723_v4, 0.0  ;;  %v1502_v56 = vsub.f32 %v2994_v36, %v3236_v52 }
 0x18d   : > { %v1562_v1 = vadd.f32 %v1561_v3, %v1560_v23  ;;  %v1501_v23 = vsub.f32 %v3030_v28, %v3236_v52  ;;  %v1756_v60 = vsel %vm1349_vm2, %v1724_v55, 0.0  ;;  %v1532_v21 = vmul.f32 %v1500_v20, %v1500_v20 }
 0x18e   : > { %v1697_v24 = vsub.f32 %v2811_v17, %v3273_v37  ;;  %v1727_v53 = vmul.f32 %v1695_v59, %v1695_v59  ;;  %v1758_v58 = vsel %vm1349_vm2, %v1725_v7, 0.0  ;;  %v1577_v57 = vsel %vm1349_vm2, %v1531_v48, 0.0 }
 0x18f   : > { %v1564_v49 = vadd.f32 %v1563_v15, %v1562_v1  ;;  %v1726_v1 = vmul.f32 %v1694_v5, %v1694_v5  ;;  %v1575_v15 = vsel %vm1349_vm2, %v1530_v63, 0.0  ;;  %v1698_v36 = vsub.f32 %v2831_v27, %v3273_v37 }
 0x190   : > { %v1728_v39 = vmul.f32 %v1696_v2, %v1696_v2  ;;  %v1504_v17 = vsub.f32 %v3064_v11, %v3236_v52  ;;  %v1579_v8 = vsel %vm1349_vm2, %v1532_v21, 0.0  ;;  %v1505_v27 = vsub.f32 %v3090_v38, %v3236_v52 }
 0x191   : > { %v1566_v0 = vadd.f32 %v1565_v31, %v1564_v49  ;;  %v1757_v49 = vadd.f32 %v1756_v60, %v1755_v9  ;;  %v1503_v31 = vsub.f32 %v3017_v16, %v3236_v52  ;;  %v1699_v16 = vsub.f32 %v2879_v18, %v3273_v37 }
 0x192   : > { %v1700_v11 = vsub.f32 %v2902_v61, %v3273_v37  ;;  %v1730_v63 = vmul.f32 %v1698_v36, %v1698_v36  ;;  %v1506_v18 = vsub.f32 %v3054_v44, %v3236_v52  ;;  %v1701_v38 = vsub.f32 %v2871_v13, %v3273_v37 }
 0x193   : > { %v1568_v54 = vadd.f32 %v1567_v22, %v1566_v0  ;;  %v1533_v0 = vmul.f32 %v1501_v23, %v1501_v23  ;;  %v1759_v50 = vadd.f32 %v1758_v58, %v1757_v49  ;;  %v1760_v22 = vsel %vm1349_vm2, %v1726_v1, 0.0 }
 0x194   : > { %v1535_v5 = vmul.f32 %v1503_v31, %v1503_v31  ;;  %v1731_v48 = vmul.f32 %v1699_v16, %v1699_v16  ;;  %v1507_v61 = vsub.f32 %v3077_v12, %v3236_v52  ;;  %v1537_v2 = vmul.f32 %v1505_v27, %v1505_v27 }
 0x195   : > { %v1570_v62 = vadd.f32 %v1569_v47, %v1568_v54  ;;  %v1534_v54 = vmul.f32 %v1502_v56, %v1502_v56  ;;  %v1761_v32 = vadd.f32 %v1760_v22, %v1759_v50  ;;  %v1729_v47 = vmul.f32 %v1697_v24, %v1697_v24 }
 0x196   : > { %v1581_v4 = vsel %vm1349_vm2, %v1533_v0, 0.0  ;;  %v1702_v44 = vsub.f32 %v2891_v26, %v3273_v37  ;;  %v1732_v60 = vmul.f32 %v1700_v11, %v1700_v11  ;;  %v1768_v56 = vsel %vm1349_vm2, %v1730_v63, 0.0 }
 0x197   : > { %v1572_v6 = vadd.f32 %v1571_v45, %v1570_v62  ;;  %v1762_v62 = vsel %vm1349_vm2, %v1727_v53, 0.0  ;;  %v1764_v45 = vsel %vm1349_vm2, %v1728_v39, 0.0  ;;  %v1583_v59 = vsel %vm1349_vm2, %v1534_v54, 0.0 }
 0x198   : > { %v1763_v55 = vadd.f32 %v1762_v62, %v1761_v32  ;;  %v1508_v13 = vsub.f32 %v3124_v10, %v3236_v52  ;;  %v1538_v21 = vmul.f32 %v1506_v18, %v1506_v18  ;;  %v1703_v12 = vsub.f32 %v2939_v34, %v3273_v37 }
 0x199   : > { %v1574_v3 = vadd.f32 %v1573_v46, %v1572_v6  ;;  %v1536_v6 = vmul.f32 %v1504_v17, %v1504_v17  ;;  %v1766_v46 = vsel %vm1349_vm2, %v1729_v47, 0.0  ;;  %v1733_v24 = vmul.f32 %v1701_v38, %v1701_v38 }
 0x19a   : > { %v1765_v7 = vadd.f32 %v1764_v45, %v1763_v55  ;;  %v1770_v53 = vsel %vm1349_vm2, %v1731_v48, 0.0  ;;  %v1509_v26 = vsub.f32 %v3150_v35, %v3236_v52  ;;  %v1539_v58 = vmul.f32 %v1507_v61, %v1507_v61  ;;  %v3509_v61 = vld [vmem:[#allocation6_spill] sm:$0xff] }
 0x19b   : > { %v1576_v28 = vadd.f32 %v1575_v15, %v1574_v3  ;;  %v1585_v3 = vsel %vm1349_vm2, %v1535_v5, 0.0  ;;  %v1587_v15 = vsel %vm1349_vm2, %v1536_v6, 0.0  ;;  %v1589_v31 = vsel %vm1349_vm2, %v1537_v2, 0.0 }
 0x19c   : > { %v1767_v1 = vadd.f32 %v1766_v46, %v1765_v7  ;;  %v1704_v10 = vsub.f32 %v2962_v33, %v3273_v37  ;;  %v1734_v50 = vmul.f32 %v1702_v44, %v1702_v44  ;;  %v1510_v34 = vsub.f32 %v3114_v43, %v3236_v52  ;;  %v3505_v43 = vld [vmem:[#allocation2_spill] sm:$0xff] }
 0x19d   : > { %v1578_v29 = vadd.f32 %v1577_v57, %v1576_v28  ;;  %v1540_v36 = vmul.f32 %v1508_v13, %v1508_v13  ;;  %v1591_v39 = vsel %vm1349_vm2, %v1538_v21, 0.0  ;;  %v1705_v35 = vsub.f32 %v2931_v14, %v3273_v37  ;;  %v3510_v21 = vld [vmem:[#allocation3_spill] sm:$0xff] }
 0x19e   : > { %v1769_v49 = vadd.f32 %v1768_v56, %v1767_v1  ;;  %v1735_v54 = vmul.f32 %v1703_v12, %v1703_v12  ;;  %v1511_v33 = vsub.f32 %v3137_v42, %v3236_v52  ;;  %v1541_v32 = vmul.f32 %v1509_v26, %v1509_v26  ;;  %v3507_v42 = vld [vmem:[#allocation4_spill] sm:$0xff] }
 0x19f   : > { %v1580_v19 = vadd.f32 %v1579_v8, %v1578_v29  ;;  %v1772_v29 = vsel %vm1349_vm2, %v1732_v60, 0.0  ;;  %v1774_v8 = vsel %vm1349_vm2, %v1733_v24, 0.0  ;;  %v1706_v62 = vsub.f32 %v3505_v43, %v3273_v37 }
 0x1a0   : > { %v1771_v0 = vadd.f32 %v1770_v53, %v1769_v49  ;;  %v1736_v27 = vmul.f32 %v1704_v10, %v1704_v10  ;;  %v1776_v5 = vsel %vm1349_vm2, %v1734_v50, 0.0  ;;  %v1542_v55 = vmul.f32 %v1510_v34, %v1510_v34 }
 0x1a1   : > { %v1582_v20 = vadd.f32 %v1581_v4, %v1580_v19  ;;  %v1593_v19 = vsel %vm1349_vm2, %v1539_v58, 0.0  ;;  %v3506_v4 = vld [vmem:[#allocation17_spill] sm:$0xff]  ;;  %v1707_v45 = vsub.f32 %v3507_v42, %v3273_v37  ;;  %v1737_v18 = vmul.f32 %v1705_v35, %v1705_v35 }
 0x1a2   : > { %v1773_v22 = vadd.f32 %v1772_v29, %v1771_v0  ;;  %v1512_v14 = vsub.f32 %v3506_v4, %v3236_v52  ;;  %v1778_v6 = vsel %vm1349_vm2, %v1735_v54, 0.0  ;;  %v1597_v38 = vsel %vm1349_vm2, %v1541_v32, 0.0 }
 0x1a3   : > { %v1584_v23 = vadd.f32 %v1583_v59, %v1582_v20  ;;  %v1595_v20 = vsel %vm1349_vm2, %v1540_v36, 0.0  ;;  %v3508_v59 = vld [vmem:[#allocation19_spill] sm:$0xff]  ;;  %v1708_v2 = vsub.f32 %v3509_v61, %v3273_v37  ;;  %v1780_v1 = vsel %vm1349_vm2, %v1736_v27, 0.0  ;;  %v3512_v36 = vld [vmem:[#allocation8_spill] sm:$0xff]  ;;  %v3517_v61 = vld [vmem:[#allocation14_spill] sm:$0xff] }
 0x1a4   : > { %v1775_v16 = vadd.f32 %v1774_v8, %v1773_v22  ;;  %v1513_v7 = vsub.f32 %v3508_v59, %v3236_v52  ;;  %v1544_v44 = vmul.f32 %v1512_v14, %v1512_v14  ;;  %v1599_v60 = vsel %vm1349_vm2, %v1542_v55, 0.0  ;;  %v3513_v8 = vld [vmem:[#allocation10_spill] sm:$0xff]  ;;  %v3516_v59 = vld [vmem:[#allocation12_spill] sm:$0xff] }
 0x1a5   : > { %v1586_v9 = vadd.f32 %v1585_v3, %v1584_v23  ;;  %v1543_v23 = vmul.f32 %v1511_v33, %v1511_v33  ;;  %v1738_v3 = vmul.f32 %v1706_v62, %v1706_v62  ;;  %v1739_v49 = vmul.f32 %v1707_v45, %v1707_v45  ;;  %v3514_v62 = vld [vmem:[#allocation7_spill] sm:$0xff] }
 0x1a6   : > { %v1777_v11 = vadd.f32 %v1776_v5, %v1775_v16  ;;  %v1515_v12 = vsub.f32 %v3197_v40, %v3236_v52  ;;  %v1545_v24 = vmul.f32 %v1513_v7, %v1513_v7  ;;  %v1740_v0 = vmul.f32 %v1708_v2, %v1708_v2 }
 0x1a7   : > { %v1588_v28 = vadd.f32 %v1587_v15, %v1586_v9  ;;  %v1514_v9 = vsub.f32 %v3174_v41, %v3236_v52  ;;  %v1709_v15 = vsub.f32 %v3510_v21, %v3273_v37  ;;  %v1601_v53 = vsel %vm1349_vm2, %v1543_v23, 0.0  ;;  %v3511_v41 = vld [vmem:[#allocation5_spill] sm:$0xff] }
 0x1a8   : > { %v1779_v48 = vadd.f32 %v1778_v6, %v1777_v11  ;;  %v1603_v50 = vsel %vm1349_vm2, %v1544_v44, 0.0  ;;  %v1786_v52 = vsel %vm1349_vm2, %v1739_v49, 0.0  ;;  %v1547_v22 = vmul.f32 %v1515_v12, %v1515_v12  ;;  %v3515_v11 = vld [vmem:[#allocation9_spill] sm:$0xff] }
 0x1a9   : > { %v1590_v57 = vadd.f32 %v1589_v31, %v1588_v28  ;;  %v1782_v28 = vsel %vm1349_vm2, %v1737_v18, 0.0  ;;  %v1710_v31 = vsub.f32 %v3511_v41, %v3273_v37  ;;  %v1546_v10 = vmul.f32 %v1514_v9, %v1514_v9  ;;  %v3520_v41 = vld [vmem:[#allocation16_spill] sm:$0xff] }
 0x1aa   : > { %v1781_v56 = vadd.f32 %v1780_v1, %v1779_v48  ;;  %v1741_v40 = vmul.f32 %v1709_v15, %v1709_v15  ;;  %v1712_v33 = vsub.f32 %v3513_v8, %v3273_v37  ;;  %v1713_v27 = vsub.f32 %v3514_v62, %v3273_v37 }
 0x1ab   : > { %v1592_v17 = vadd.f32 %v1591_v39, %v1590_v57  ;;  %v1784_v57 = vsel %vm1349_vm2, %v1738_v3, 0.0  ;;  %v1711_v39 = vsub.f32 %v3512_v36, %v3273_v37  ;;  %v1742_v32 = vmul.f32 %v1710_v31, %v1710_v31 }
 0x1ac   : > { %v1783_v26 = vadd.f32 %v1782_v28, %v1781_v56  ;;  %v1607_v16 = vsel %vm1349_vm2, %v1546_v10, 0.0  ;;  %v1790_v4 = vsel %vm1349_vm2, %v1741_v40, 0.0  ;;  %v1609_v14 = vsel %vm1349_vm2, %v1547_v22, 0.0  ;;  %v3519_v28 = vld [vmem:[#allocation13_spill] sm:$0xff]  ;;  %v3522_v22 = vld [vmem:[#allocation15_spill] sm:$0xff] }
 0x1ad   : > { %v1594_v47 = vadd.f32 %v1593_v19, %v1592_v17  ;;  %v1605_v17 = vsel %vm1349_vm2, %v1545_v24, 0.0  ;;  %v1788_v19 = vsel %vm1349_vm2, %v1740_v0, 0.0  ;;  %v1743_v5 = vmul.f32 %v1711_v39, %v1711_v39 }
 0x1ae   : > { %v1785_v29 = vadd.f32 %v1784_v57, %v1783_v26  ;;  %v1744_v42 = vmul.f32 %v1712_v33, %v1712_v33  ;;  %v1792_v45 = vsel %vm1349_vm2, %v1742_v32, 0.0  ;;  %v1715_v7 = vsub.f32 %v3516_v59, %v3273_v37 }
 0x1af   : > { %v1596_v63 = vadd.f32 %v1595_v20, %v1594_v47  ;;  %v1745_v23 = vmul.f32 %v1713_v27, %v1713_v27  ;;  %v1716_v2 = vsub.f32 %v3517_v61, %v3273_v37  ;;  %v1718_v12 = vsub.f32 %v3519_v28, %v3273_v37 }
 0x1b0   : > { %v1787_v35 = vadd.f32 %v1786_v52, %v1785_v29  ;;  %v1796_v1 = vsel %vm1349_vm2, %v1744_v42, 0.0  ;;  %v1719_v31 = vsub.f32 %v3520_v41, %v3273_v37  ;;  %v3521_v29 = vld [vmem:[#allocation18_spill] sm:$0xff]  ;;  %v1722_v33 = vsub.f32 %v3191_v51, %v3273_v37 }
 0x1b1   : > { %v1598_v46 = vadd.f32 %v1597_v38, %v1596_v63  ;;  %v1714_v63 = vsub.f32 %v3515_v11, %v3273_v37  ;;  %v1794_v38 = vsel %vm1349_vm2, %v1743_v5, 0.0  ;;  %v1798_v21 = vsel %vm1349_vm2, %v1745_v23, 0.0 }
 0x1b2   : > { %v1789_v47 = vadd.f32 %v1788_v19, %v1787_v35  ;;  %v1748_v24 = vmul.f32 %v1716_v2, %v1716_v2  ;;  %v1750_v36 = vmul.f32 %v1718_v12, %v1718_v12  ;;  %v1751_v35 = vmul.f32 %v1719_v31, %v1719_v31 }
 0x1b3   : > { %v1600_v13 = vadd.f32 %v1599_v60, %v1598_v46  ;;  %v1746_v3 = vmul.f32 %v1714_v63, %v1714_v63  ;;  %v3518_v60 = vld [vmem:[#allocation11_spill] sm:$0xff]  ;;  %v1754_v62 = vmul.f32 %v1722_v33, %v1722_v33 }
 0x1b4   : > { %v1791_v55 = vadd.f32 %v1790_v4, %v1789_v47  ;;  %v1717_v56 = vsub.f32 %v3518_v60, %v3273_v37  ;;  %v1804_v39 = vsel %vm1349_vm2, %v1748_v24, 0.0  ;;  %v1808_v19 = vsel %vm1349_vm2, %v1750_v36, 0.0 }
 0x1b5   : > { %v1602_v58 = vadd.f32 %v1601_v53, %v1600_v13  ;;  %v1747_v13 = vmul.f32 %v1715_v7, %v1715_v7  ;;  %v1800_v53 = vsel %vm1349_vm2, %v1746_v3, 0.0 }
 0x1b6   : > { %v1793_v18 = vadd.f32 %v1792_v45, %v1791_v55  ;;  %v1749_v0 = vmul.f32 %v1717_v56, %v1717_v56  ;;  %v1816_v55 = vsel %vm1349_vm2, %v1754_v62, 0.0 }
 0x1b7   : > { %v1604_v34 = vadd.f32 %v1603_v50, %v1602_v58  ;;  %v1802_v57 = vsel %vm1349_vm2, %v1747_v13, 0.0 }
 0x1b8   : > { %v1795_v48 = vadd.f32 %v1794_v38, %v1793_v18 }
 0x1b9   : > { %v1606_v54 = vadd.f32 %v1605_v17, %v1604_v34  ;;  %v1720_v34 = vsub.f32 %v3521_v29, %v3273_v37  ;;  %v1721_v17 = vsub.f32 %v3522_v22, %v3273_v37 }
 0x1ba   : > { %v1797_v9 = vadd.f32 %v1796_v1, %v1795_v48 }
 0x1bb   : > { %v1608_v43 = vadd.f32 %v1607_v16, %v1606_v54  ;;  %v1806_v54 = vsel %vm1349_vm2, %v1749_v0, 0.0  ;;  %v1752_v32 = vmul.f32 %v1720_v34, %v1720_v34  ;;  %v1753_v47 = vmul.f32 %v1721_v17, %v1721_v17 }
 0x1bc   : > { %v1799_v15 = vadd.f32 %v1798_v21, %v1797_v9 }
 0x1bd   : > { %v1610_v20 = vadd.f32 %v1609_v14, %v1608_v43  ;;  %v1812_v27 = vsel %vm1349_vm2, %v1752_v32, 0.0  ;;  %v1814_v4 = vsel %vm1349_vm2, %v1753_v47, 0.0 }
 0x1be   : > { %v1801_v26 = vadd.f32 %v1800_v53, %v1799_v15 }
 0x1bf   : > { %v1611_v6 = vrot.slane %v1610_v20, 4 }
 0x1c0   : > { %v1803_v10 = vadd.f32 %v1802_v57, %v1801_v26 }
 0x1c1   : > { %v1612_v46 = vadd.f32 %v1611_v6, %v1610_v20 }
 0x1c2   : > { %v1805_v40 = vadd.f32 %v1804_v39, %v1803_v10 }
 0x1c3   : > { %v1613_v44 = vrot.slane %v1612_v46, 2 }
 0x1c4   : > { %v1807_v8 = vadd.f32 %v1806_v54, %v1805_v40 }
 0x1c5   : > { %v1614_v49 = vadd.f32 %v1613_v44, %v1612_v46 }
 0x1c6   : > { %v1809_v16 = vadd.f32 %v1808_v19, %v1807_v8 }
 0x1c7   : > { %v1615_v58 = vrot.slane %v1614_v49, 1 }
 0x1c9   : > { %v1616_v50 = vadd.f32 %v1615_v58, %v1614_v49 }
 0x1cb   : > { %v1618_v52 = vsel %vm1617_vm3, %v3233_v25, %v1616_v50  ;;  %v1810_v25 = vsel %vm1349_vm2, %v1751_v35, 0.0 }
 0x1cc   : > { %1620 = vst.msk [vmem:[%s440_s12] sm:$0x3] %vm1619_vm4, %v1618_v52  ;;  %v1811_v43 = vadd.f32 %v1810_v25, %v1809_v16 }
 0x1ce   : > { %v1813_v5 = vadd.f32 %v1812_v27, %v1811_v43 }
 0x1d0   : > { %v1815_v14 = vadd.f32 %v1814_v4, %v1813_v5 }
 0x1d2   : > { %v1817_v20 = vadd.f32 %v1816_v55, %v1815_v14 }
 0x1d4   : > { %v1818_v51 = vrot.slane %v1817_v20, 4 }
 0x1d6   : > { %v1819_v37 = vadd.f32 %v1818_v51, %v1817_v20 }
 0x1d8   : > { %v1820_v11 = vrot.slane %v1819_v37, 2 }
 0x1da   : > { %v1821_v63 = vadd.f32 %v1820_v11, %v1819_v37 }
 0x1dc   : > { %v1822_v42 = vrot.slane %v1821_v63, 1 }
 0x1de   : > { %v1823_v45 = vadd.f32 %v1822_v42, %v1821_v63 }
 0x1e0   : > { %v1824_v18 = vsel %vm1617_vm3, %v3264_v30, %v1823_v45 }
 0x1e1   : > { %1825 = vst.msk [vmem:[%s447_s15] sm:$0x3] %vm1619_vm4, %v1824_v18 }
 0x1e2 PF: > { %s18_s26 = sadd.s32 1, %s2515_s26   ;;  %s3523_s24 = smov %s2511_s25 }
 0x1e3   : > { %p15_p5 = scmp.ge.s32.totalorder %s18_s26, 4   ;;  %s3524_s25 = smov %s3526_s27 }
 0x1e5   :  { %17 = sbr.rel (!%p15_p5) target bundleno = 2 (0x2), region = 107 }

// kernel: resnet_block_forward.4
= control target key start
LH: loop header
LB: loop body
LE: loop exit
PB: predicated region body
PF: predicated region fallthrough
CT: control target
= control target key end

     0   :  { %s2064_s15 = smov 0   ;;  %s2066_s16 = smov 0   ;;  %s2582_s0 = inlined_call_operand.vmem [shape: bf16[2,288,96], index: 0, kind: input, shape index: {}, may-alias: {0,1}]   ;;  %s2583_s1 = inlined_call_operand.vmem [shape: bf16[2,288,96], index: 1, kind: input, shape index: {}, may-alias: {0,1}]   ;;  %s2584_s2 = inlined_call_operand.vmem [shape: bf16[3,96,32], index: 2, kind: input, shape index: {}]   ;;  %s2585_s3 = inlined_call_operand.vmem [shape: f32[2,256,32], index: 3, kind: output, shape index: {0}]   ;;  %s2586_s4 = inlined_call_operand.vmem [shape: f32[2,1,2,32], index: 4, kind: output, shape index: {1}]  }
   0x1   :  { %s2068_s17 = smov 0  }
   0x2 LB: > { %s27_s18 = sadd.s32 1, %s2033_s16  ;;  %p1559_p0 = scmp.ge.s32.totalorder %s2037_s17, 1  ;;  %s2037_s17 = sphi %s2068_s17, %s15_s17   ;;  %s2033_s16 = sphi %s2066_s16, %s2588_s16   ;;  %s2029_s15 = sphi %s2064_s15, %s2587_s15  }
   0x3   : > { %p29_p1 = scmp.ge.s32.totalorder %s27_s18, 2  ;;  %p221_p2 = scmp.lt.s32.totalorder %s2037_s17, 3 }
   0x5   : > { %s2590_s18 = smov (%p29_p1, %s27_s18), 0  ;;  %p222_p3 = pnand %p1559_p0, %p221_p2 }
   0x6   : > { %v1979_v0 = vld [vmem:[%s2584_s2 + $0x30] sm:$0xff] (!%p222_p3)   ;;  %p282_p4 = scmp.lt.s32.totalorder (!%p222_p3), %s2029_s15, 1  ;;  %v1980_v1 = vld [vmem:[%s2584_s2] sm:$0xff] (!%p222_p3)   ;;  %v1981_v2 = vld [vmem:[%s2584_s2 + $0x38] sm:$0xff] (!%p222_p3)   ;;  %vm514_vm0 = vcmask (!%p222_p3), 785408   ;;  %vm1169_vm1 = vcmask (!%p222_p3), 261120  }
   0x7   : > { %225 = sbr.rel (%p222_p3) target bundleno = 439 (0x1b7), region = 32  ;;  %1744 = vmatprep.subr.bf16.mxu1 (!%p222_p3), %v1979_v0  ;;  %1788 = vmatprep.subr.bf16.mxu0 (!%p222_p3), %v1980_v1  ;;  %v1982_v3 = vld [vmem:[%s2584_s2 + $0x8] sm:$0xff] (!%p222_p3)   ;;  %v1983_v4 = vld [vmem:[%s2584_s2 + $0x40] sm:$0xff] (!%p222_p3)   ;;  %v1984_v5 = vld [vmem:[%s2584_s2 + $0x10] sm:$0xff] (!%p222_p3)   ;;  %vm1405_vm2 = vcmask (!%p222_p3), 1040384   ;;  %vm1407_vm3 = vcmask (!%p222_p3), 254976  }
   0x8   : > { %1745 = vmatpush3.bf16.msra.mxu1 (!%p222_p3), %v1979_v0  ;;  %1789 = vmatpush3.bf16.msra.mxu0 (!%p222_p3), %v1980_v1  ;;  %v1985_v6 = vld [vmem:[%s2584_s2 + $0x48] sm:$0xff] (!%p222_p3)   ;;  %v1986_v7 = vld [vmem:[%s2584_s2 + $0x18] sm:$0xff] (!%p222_p3)   ;;  %v1987_v8 = vld [vmem:[%s2584_s2 + $0x50] sm:$0xff] (!%p222_p3)  }
   0x9   : > { %1746 = vmatprep.subr.bf16.mxu1 (!%p222_p3), %v1981_v2  ;;  %1790 = vmatprep.subr.bf16.mxu0 (!%p222_p3), %v1982_v3  ;;  %v2122_v9 = vld [vmem:[%s2584_s2 + $0x20] sm:$0xff] (!%p222_p3)   ;;  %v1989_v12 = vld [vmem:[%s2584_s2 + $0x58] sm:$0xff] (!%p222_p3)   ;;  %v1990_v13 = vld [vmem:[%s2584_s2 + $0x28] sm:$0xff] (!%p222_p3)  }
   0xa   : > { %v1994_v14 = vld [vmem:[%s2584_s2 + $0x60] sm:$0xff] (!%p222_p3)   ;;  %v1995_v17 = vld [vmem:[%s2584_s2 + $0x68] sm:$0xff] (!%p222_p3)   ;;  %v1998_v18 = vld [vmem:[%s2584_s2 + $0x70] sm:$0xff] (!%p222_p3)  }
   0xb   : > { %v2001_v21 = vld [vmem:[%s2584_s2 + $0x78] sm:$0xff] (!%p222_p3)   ;;  %v2002_v22 = vld [vmem:[%s2584_s2 + $0x80] sm:$0xff] (!%p222_p3)   ;;  %v2005_v25 = vld [vmem:[%s2584_s2 + $0x88] sm:$0xff] (!%p222_p3)  }
   0xc   : > { %1747 = vmatpush3.bf16.msra.mxu1 (!%p222_p3), %v1981_v2  ;;  %1791 = vmatpush3.bf16.msra.mxu0 (!%p222_p3), %v1982_v3 }
   0xd   : > { %1748 = vmatprep.subr.bf16.mxu1 (!%p222_p3), %v1983_v4  ;;  %1792 = vmatprep.subr.bf16.mxu0 (!%p222_p3), %v1984_v5 }
   0xe   : > { %s2592_s15 = smov (!%p282_p4, %s2029_s15), 1 }
   0xf   : > { %s1952_s29 = smul.u32 144, %s2592_s15  ;;  %s1564_s23 = sshll.u32 %s2592_s15, 1 }
  0x10   : > { %1749 = vmatpush3.bf16.msra.mxu1 %v1983_v4  ;;  %1793 = vmatpush3.bf16.msra.mxu0 %v1984_v5  ;;  %s325_s26 = scalar_lea.vmem %s2586_s4, %s1564_s23 }
  0x11   : > { %s2114_s12 = scalar_lea.vmem %s2582_s0, %s1952_s29  ;;  %1750 = vmatprep.subr.bf16.mxu1 %v1985_v6  ;;  %1794 = vmatprep.subr.bf16.mxu0 %v1986_v7  ;;  %s1676_s6 = sadd.s32 128, %s1952_s29 }
  0x12   : > { %v1991_v10 = vld [vmem:[%s2114_s12 + $0x8] sm:$0xff]   ;;  %v1992_v11 = vld [vmem:[%s2114_s12] sm:$0xff]   ;;  %v1993_v15 = vld [vmem:[%s2114_s12 + $0x10] sm:$0xff]   ;;  %s2161_s11 = scalar_lea.vmem %s2583_s1, %s1676_s6 }
  0x13   : > { %1756 = vmatprep.mubr.msk.bf16.mxu1 %vm514_vm0, %v1991_v10  ;;  %1800 = vmatprep.mubr.msk.bf16.mxu0 %vm514_vm0, %v1992_v11  ;;  %v1996_v16 = vld [vmem:[%s2114_s12 + $0x18] sm:$0xff]   ;;  %v1997_v19 = vld [vmem:[%s2114_s12 + $0x20] sm:$0xff]   ;;  %v1999_v20 = vld [vmem:[%s2114_s12 + $0x28] sm:$0xff]  }
  0x14   : > { %1751 = vmatpush3.bf16.msra.mxu1 %v1985_v6  ;;  %1795 = vmatpush3.bf16.msra.mxu0 %v1986_v7  ;;  %v2000_v23 = vld [vmem:[%s2114_s12 + $0x30] sm:$0xff]   ;;  %v2003_v24 = vld [vmem:[%s2114_s12 + $0x38] sm:$0xff]   ;;  %v2004_v26 = vld [vmem:[%s2114_s12 + $0x40] sm:$0xff]  }
  0x15   : > { %1752 = vmatprep.subr.bf16.mxu1 %v1987_v8  ;;  %1796 = vmatprep.subr.bf16.mxu0 %v2122_v9  ;;  %v2006_v27 = vld [vmem:[%s2114_s12 + $0x48] sm:$0xff]   ;;  %v2007_v28 = vld [vmem:[%s2114_s12 + $0x50] sm:$0xff]   ;;  %v2008_v29 = vld [vmem:[%s2114_s12 + $0x58] sm:$0xff]  }
  0x16   : > { %v2009_v30 = vld [vmem:[%s2114_s12 + $0x60] sm:$0xff]   ;;  %v2010_v31 = vld [vmem:[%s2114_s12 + $0x68] sm:$0xff]   ;;  %v2011_v32 = vld [vmem:[%s2114_s12 + $0x70] sm:$0xff]  }
  0x17   : > { %v2012_v33 = vld [vmem:[%s2114_s12 + $0x78] sm:$0xff]   ;;  %v2013_v34 = vld [vmem:[%s2161_s11] sm:$0xff]   ;;  %v2014_v35 = vld [vmem:[%s2161_s11 + $0x8] sm:$0xff]   ;;  %s1677_s12 = sshll.u32 %s2592_s15, 8 }
  0x18   : > { %1753 = vmatpush3.bf16.msra.mxu1 %v1987_v8  ;;  %1797 = vmatpush3.bf16.msra.mxu0 %v2122_v9  ;;  %s2237_s22 = scalar_lea.vmem %s2585_s3, %s1677_s12 }
  0x19   : > { %1754 = vmatprep.subr.bf16.mxu1 %v1989_v12  ;;  %1798 = vmatprep.subr.bf16.mxu0 %v1990_v13 }
  0x1c   : > { %1755 = vmatpush3.bf16.msra.mxu1 %v1989_v12  ;;  %1799 = vmatpush3.bf16.msra.mxu0 %v1990_v13 }
  0x1d   : > { %1876 = vmatprep.subr.bf16.mxu1 %v1980_v1  ;;  %1832 = vmatprep.subr.bf16.mxu0 %v1994_v14 }
  0x1f   : > { %1757 = vmatmul.mubr.msk.bf16.vlgmr.msra.gmra.mrb[0].mxu1 %vm514_vm0, %v1993_v15  ;;  %1801 = vmatmul.mubr.msk.bf16.vlgmr.msra.gmra.mrb[0].mxu0 %vm514_vm0, %v1991_v10 }
  0x20   : > { %1882 = vmatpush3.bf16.msra.mxu1 %v1980_v1  ;;  %1833 = vmatpush3.bf16.msra.mxu0 %v1994_v14 }
  0x21   : > { %1760 = vmatprep.mubr.msk.bf16.mxu1 %vm514_vm0, %v1996_v16  ;;  %1834 = vmatprep.subr.bf16.mxu0 %v1995_v17 }
  0x22   : > { %1804 = vmatprep.mubr.msk.bf16.mxu0 %vm514_vm0, %v1993_v15  ;;  %1877 = vmatprep.subr.bf16.mxu1 %v1982_v3 }
  0x24   : > { %1883 = vmatpush3.bf16.msra.mxu1 %v1982_v3  ;;  %1835 = vmatpush3.bf16.msra.mxu0 %v1995_v17 }
  0x25   : > { %1878 = vmatprep.subr.bf16.mxu1 %v1984_v5  ;;  %1836 = vmatprep.subr.bf16.mxu0 %v1998_v18 }
  0x27   : > { %1761 = vmatmul.mubr.msk.bf16.gmra.mrb[4].mxu1 %vm514_vm0, %v1997_v19  ;;  %1805 = vmatmul.mubr.msk.bf16.gmra.mrb[4].mxu0 %vm514_vm0, %v1996_v16 }
  0x28   : > { %1764 = vmatprep.mubr.msk.bf16.mxu1 %vm514_vm0, %v1999_v20  ;;  %1837 = vmatpush3.bf16.msra.mxu0 %v1998_v18 }
  0x29   : > { %1808 = vmatprep.mubr.msk.bf16.mxu0 %vm514_vm0, %v1997_v19  ;;  %1838 = vmatprep.subr.bf16.mxu0 %v2001_v21 }
  0x2a   : > { %1884 = vmatpush3.bf16.msra.mxu1 %v1984_v5 }
  0x2b   : > { %1879 = vmatprep.subr.bf16.mxu1 %v1986_v7 }
  0x2c   : > { %1839 = vmatpush3.bf16.msra.mxu0 %v2001_v21 }
  0x2d   : > { %1840 = vmatprep.subr.bf16.mxu0 %v2002_v22 }
  0x2e   : > { %1885 = vmatpush3.bf16.msra.mxu1 %v1986_v7 }
  0x2f   : > { %1765 = vmatmul.mubr.msk.bf16.gmra.mrb[8].mxu1 %vm514_vm0, %v2000_v23  ;;  %1880 = vmatprep.subr.bf16.mxu1 %v2122_v9 }
  0x30   : > { %1809 = vmatmul.mubr.msk.bf16.gmra.mrb[8].mxu0 %vm514_vm0, %v1999_v20  ;;  %1768 = vmatprep.mubr.msk.bf16.mxu1 %vm514_vm0, %v2003_v24 }
  0x31   : > { %1812 = vmatprep.mubr.msk.bf16.mxu0 %vm514_vm0, %v2000_v23  ;;  %1841 = vmatpush3.bf16.msra.mxu0 %v2002_v22 }
  0x32   : > { %1842 = vmatprep.subr.bf16.mxu0 %v2005_v25  ;;  %1886 = vmatpush3.bf16.msra.mxu1 %v2122_v9 }
  0x33   : > { %1881 = vmatprep.subr.bf16.mxu1 %v1990_v13 }
  0x35   : > { %1843 = vmatpush3.bf16.msra.mxu0 %v2005_v25 }
  0x36   : > { %1887 = vmatpush3.bf16.msra.mxu1 %v1990_v13 }
  0x37   : > { %1769 = vmatmul.mubr.msk.bf16.gmra.mrb[12].mxu1 %vm514_vm0, %v2004_v26 }
  0x38   : > { %1813 = vmatmul.mubr.msk.bf16.gmra.mrb[12].mxu0 %vm514_vm0, %v2003_v24  ;;  %1772 = vmatprep.mubr.msk.bf16.mxu1 %vm514_vm0, %v2006_v27 }
  0x39   : > { %1844 = vmatprep.mubr.msk.bf16.mxu0 %vm514_vm0, %v1993_v15 }
  0x3f   : > { %1773 = vmatmul.mubr.msk.bf16.gmra.mrb[16].mxu1 %vm514_vm0, %v2007_v28 }
  0x40   : > { %1845 = vmatmul.mubr.msk.bf16.vlgmr.msra.gmra.mrb[0].mxu0 %vm514_vm0, %v1996_v16  ;;  %1776 = vmatprep.mubr.msk.bf16.mxu1 %vm514_vm0, %v2008_v29 }
  0x41   : > { %1848 = vmatprep.mubr.msk.bf16.mxu0 %vm514_vm0, %v1997_v19 }
  0x47   : > { %1777 = vmatmul.mubr.msk.bf16.gmra.mrb[20].mxu1 %vm514_vm0, %v2009_v30 }
  0x48   : > { %1849 = vmatmul.mubr.msk.bf16.gmra.mrb[4].mxu0 %vm514_vm0, %v1999_v20  ;;  %1780 = vmatprep.mubr.msk.bf16.mxu1 %vm514_vm0, %v2010_v31 }
  0x49   : > { %1852 = vmatprep.mubr.msk.bf16.mxu0 %vm514_vm0, %v2000_v23 }
  0x4f   : > { %1781 = vmatmul.mubr.msk.bf16.gmra.mrb[24].mxu1 %vm514_vm0, %v2011_v32 }
  0x50   : > { %1853 = vmatmul.mubr.msk.bf16.gmra.mrb[8].mxu0 %vm514_vm0, %v2003_v24  ;;  %1784 = vmatprep.mubr.msk.bf16.mxu1 %vm514_vm0, %v2012_v33 }
  0x51   : > { %1856 = vmatprep.mubr.msk.bf16.mxu0 %vm514_vm0, %v2004_v26 }
  0x57   : > { %1785 = vmatmul.mubr.msk.bf16.gmra.mrb[28].mxu1 %vm514_vm0, %v2013_v34 }
  0x58   : > { %1857 = vmatmul.mubr.msk.bf16.gmra.mrb[12].mxu0 %vm514_vm0, %v2006_v27  ;;  %1816 = vmatprep.mubr.msk.bf16.mxu1 %vm514_vm0, %v2004_v26 }
  0x59   : > { %1860 = vmatprep.mubr.msk.bf16.mxu0 %vm514_vm0, %v2007_v28 }
  0x5f   : > { %1817 = vmatmul.mubr.msk.bf16.vlgmr.msra.gmra.mrb[16].mxu1 %vm514_vm0, %v2006_v27 }
  0x60   : > { %1861 = vmatmul.mubr.msk.bf16.gmra.mrb[16].mxu0 %vm514_vm0, %v2008_v29  ;;  %1820 = vmatprep.mubr.msk.bf16.mxu1 %vm514_vm0, %v2007_v28 }
  0x61   : > { %1864 = vmatprep.mubr.msk.bf16.mxu0 %vm514_vm0, %v2009_v30 }
  0x67   : > { %1821 = vmatmul.mubr.msk.bf16.gmra.mrb[20].mxu1 %vm514_vm0, %v2008_v29 }
  0x68   : > { %1865 = vmatmul.mubr.msk.bf16.gmra.mrb[20].mxu0 %vm514_vm0, %v2010_v31  ;;  %1824 = vmatprep.mubr.msk.bf16.mxu1 %vm514_vm0, %v2009_v30 }
  0x69   : > { %1868 = vmatprep.mubr.msk.bf16.mxu0 %vm514_vm0, %v2011_v32 }
  0x6f   : > { %1825 = vmatmul.mubr.msk.bf16.gmra.mrb[24].mxu1 %vm514_vm0, %v2010_v31 }
  0x70   : > { %1869 = vmatmul.mubr.msk.bf16.gmra.mrb[24].mxu0 %vm514_vm0, %v2012_v33  ;;  %1828 = vmatprep.mubr.msk.bf16.mxu1 %vm514_vm0, %v2011_v32 }
  0x71   : > { %1872 = vmatprep.mubr.msk.bf16.mxu0 %vm514_vm0, %v2013_v34 }
  0x77   : > { %1829 = vmatmul.mubr.msk.bf16.gmra.mrb[28].mxu1 %vm514_vm0, %v2012_v33 }
  0x78   : > { %1873 = vmatmul.mubr.msk.bf16.gmra.mrb[28].mxu0 %vm514_vm0, %v2014_v35 }
  0xf2   : > { %v1758_v36 = vpop.f32.mrb[0].mxu1 }
  0xf3   : > { %v597_v37 = vpop.f32.mrb[1].mxu1 }
  0xf4   : > { %v1759_v38 = vpop.f32.mrb[2].mxu1 }
  0xf5   : > { %v600_v39 = vpop.f32.mrb[3].mxu1 }
  0xfa   : > { %v1762_v40 = vpop.f32.mrb[4].mxu1 }
  0xfb   : > { %v613_v41 = vpop.f32.mrb[5].mxu1 }
  0xfc   : > { %v1763_v42 = vpop.f32.mrb[6].mxu1 }
  0xfd   : > { %v616_v43 = vpop.f32.mrb[7].mxu1 }
 0x102   : > { %v1766_v44 = vpop.f32.mrb[8].mxu1 }
 0x103   : > { %v629_v45 = vpop.f32.mrb[9].mxu1 }
 0x104   : > { %v1767_v46 = vpop.f32.mrb[10].mxu1 }
 0x105   : > { %v632_v47 = vpop.f32.mrb[11].mxu1 }
 0x10a   : > { %v2225_v48 = vpop.f32.mrb[12].mxu1 }
 0x10b   : > { %v2227_v49 = vpop.f32.mrb[13].mxu1 }
 0x10c   : > { %v2229_v50 = vpop.f32.mrb[14].mxu1 }
 0x10d   : > { %v2231_v51 = vpop.f32.mrb[15].mxu1 }
 0x113   : > { %v1846_v52 = vpop.f32.mrb[0].mxu0 }
 0x114   : > { %v2239_v53 = vadd.f32 %v1846_v52, %v1758_v36  ;;  %v1010_v54 = vpop.f32.mrb[1].mxu0 }
 0x115   : > { %v2241_v55 = vadd.f32 %v1010_v54, %v597_v37  ;;  %v1847_v56 = vpop.f32.mrb[2].mxu0 }
 0x116   : > { %1172 = vst.msk [vmem:[%s2237_s22 + $0x10] sm:$0xff] %vm1169_vm1, %v2239_v53  ;;  %v2246_v57 = vadd.f32 %v1847_v56, %v1759_v38  ;;  %v1013_v58 = vpop.f32.mrb[3].mxu0  ;;  %v1205_v63 = vsel %vm1169_vm1, %v2239_v53, 0.0 }
 0x117   : > { %1170 = vst.msk [vmem:[%s2237_s22] sm:$0xff] %vm1169_vm1, %v2241_v55  ;;  %v2251_v59 = vadd.f32 %v1013_v58, %v600_v39  ;;  %v1202_v60 = vsel %vm1169_vm1, %v2241_v55, 0.0 }
 0x118   : > { %1173 = vst.msk [vmem:[%s2237_s22 + $0x18] sm:$0xff] %vm1169_vm1, %v2246_v57  ;;  %v1207_v4 = vsel %vm1169_vm1, %v2246_v57, 0.0 }
 0x119   : > { %1171 = vst.msk [vmem:[%s2237_s22 + $0x8] sm:$0xff] %vm1169_vm1, %v2251_v59  ;;  %v1203_v61 = vsel %vm1169_vm1, %v2251_v59, 0.0 }
 0x11a   : > { %v1204_v62 = vadd.f32 %v1203_v61, %v1202_v60 }
 0x11b   : > { %v1850_v0 = vpop.f32.mrb[4].mxu0 }
 0x11c   : > { %v1206_v1 = vadd.f32 %v1205_v63, %v1204_v62  ;;  %v2265_v2 = vadd.f32 %v1850_v0, %v1762_v40  ;;  %v1026_v3 = vpop.f32.mrb[5].mxu0 }
 0x11d   : > { %v2269_v5 = vadd.f32 %v1026_v3, %v613_v41  ;;  %v1851_v6 = vpop.f32.mrb[6].mxu0 }
 0x11e   : > { %1176 = vst.msk [vmem:[%s2237_s22 + $0x30] sm:$0xff] %vm1169_vm1, %v2265_v2  ;;  %v1208_v7 = vadd.f32 %v1207_v4, %v1206_v1  ;;  %v2274_v8 = vadd.f32 %v1851_v6, %v1763_v42  ;;  %v1029_v9 = vpop.f32.mrb[7].mxu0  ;;  %v1213_v15 = vsel %vm1169_vm1, %v2265_v2, 0.0 }
 0x11f   : > { %1174 = vst.msk [vmem:[%s2237_s22 + $0x20] sm:$0xff] %vm1169_vm1, %v2269_v5  ;;  %v1209_v10 = vsel %vm1169_vm1, %v2269_v5, 0.0  ;;  %v2281_v11 = vadd.f32 %v1029_v9, %v616_v43 }
 0x120   : > { %v1210_v12 = vadd.f32 %v1209_v10, %v1208_v7  ;;  %1177 = vst.msk [vmem:[%s2237_s22 + $0x38] sm:$0xff] %vm1169_vm1, %v2274_v8  ;;  %v1215_v20 = vsel %vm1169_vm1, %v2274_v8, 0.0 }
 0x121   : > { %1175 = vst.msk [vmem:[%s2237_s22 + $0x28] sm:$0xff] %vm1169_vm1, %v2281_v11  ;;  %v1211_v13 = vsel %vm1169_vm1, %v2281_v11, 0.0 }
 0x122   : > { %v1212_v14 = vadd.f32 %v1211_v13, %v1210_v12 }
 0x123   : > { %v1854_v16 = vpop.f32.mrb[8].mxu0 }
 0x124   : > { %v1214_v17 = vadd.f32 %v1213_v15, %v1212_v14  ;;  %v2293_v18 = vadd.f32 %v1854_v16, %v1766_v44  ;;  %v1042_v19 = vpop.f32.mrb[9].mxu0 }
 0x125   : > { %v2297_v21 = vadd.f32 %v1042_v19, %v629_v45  ;;  %v1855_v22 = vpop.f32.mrb[10].mxu0 }
 0x126   : > { %1180 = vst.msk [vmem:[%s2237_s22 + $0x50] sm:$0xff] %vm1169_vm1, %v2293_v18  ;;  %v1216_v23 = vadd.f32 %v1215_v20, %v1214_v17  ;;  %v2302_v24 = vadd.f32 %v1855_v22, %v1767_v46  ;;  %v1045_v25 = vpop.f32.mrb[11].mxu0  ;;  %v1221_v31 = vsel %vm1169_vm1, %v2293_v18, 0.0 }
 0x127   : > { %1178 = vst.msk [vmem:[%s2237_s22 + $0x40] sm:$0xff] %vm1169_vm1, %v2297_v21  ;;  %v1217_v26 = vsel %vm1169_vm1, %v2297_v21, 0.0  ;;  %v2309_v27 = vadd.f32 %v1045_v25, %v632_v47 }
 0x128   : > { %v1218_v28 = vadd.f32 %v1217_v26, %v1216_v23  ;;  %1181 = vst.msk [vmem:[%s2237_s22 + $0x58] sm:$0xff] %vm1169_vm1, %v2302_v24  ;;  %v1223_v36 = vsel %vm1169_vm1, %v2302_v24, 0.0 }
 0x129   : > { %1179 = vst.msk [vmem:[%s2237_s22 + $0x48] sm:$0xff] %vm1169_vm1, %v2309_v27  ;;  %v1219_v29 = vsel %vm1169_vm1, %v2309_v27, 0.0 }
 0x12a   : > { %v1220_v30 = vadd.f32 %v1219_v29, %v1218_v28 }
 0x12b   : > { %v1858_v32 = vpop.f32.mrb[12].mxu0 }
 0x12c   : > { %v1222_v33 = vadd.f32 %v1221_v31, %v1220_v30  ;;  %v2322_v34 = vadd.f32 %v1858_v32, %v2225_v48  ;;  %v1058_v35 = vpop.f32.mrb[13].mxu0 }
 0x12d   : > { %v2327_v37 = vadd.f32 %v1058_v35, %v2227_v49  ;;  %v1859_v38 = vpop.f32.mrb[14].mxu0 }
 0x12e   : > { %1184 = vst.msk [vmem:[%s2237_s22 + $0x70] sm:$0xff] %vm1169_vm1, %v2322_v34  ;;  %v1224_v39 = vadd.f32 %v1223_v36, %v1222_v33  ;;  %v2333_v40 = vadd.f32 %v1859_v38, %v2229_v50  ;;  %v1061_v41 = vpop.f32.mrb[15].mxu0  ;;  %v1229_v48 = vsel %vm1169_vm1, %v2322_v34, 0.0 }
 0x12f   : > { %1182 = vst.msk [vmem:[%s2237_s22 + $0x60] sm:$0xff] %vm1169_vm1, %v2327_v37  ;;  %v1225_v42 = vsel %vm1169_vm1, %v2327_v37, 0.0  ;;  %v2341_v43 = vadd.f32 %v1061_v41, %v2231_v51 }
 0x130   : > { %v1226_v44 = vadd.f32 %v1225_v42, %v1224_v39  ;;  %1185 = vst.msk [vmem:[%s2237_s22 + $0x78] sm:$0xff] %vm1169_vm1, %v2333_v40  ;;  %v1231_v58 = vsel %vm1169_vm1, %v2333_v40, 0.0 }
 0x131   : > { %1183 = vst.msk [vmem:[%s2237_s22 + $0x68] sm:$0xff] %vm1169_vm1, %v2341_v43  ;;  %v1227_v45 = vsel %vm1169_vm1, %v2341_v43, 0.0 }
 0x132   : > { %v1228_v46 = vadd.f32 %v1227_v45, %v1226_v44  ;;  %v1818_v47 = vpop.f32.mrb[16].mxu1 }
 0x133   : > { %v1862_v49 = vpop.f32.mrb[16].mxu0  ;;  %v861_v50 = vpop.f32.mrb[17].mxu1 }
 0x134   : > { %v1230_v51 = vadd.f32 %v1229_v48, %v1228_v46  ;;  %v2353_v52 = vadd.f32 %v1862_v49, %v1818_v47  ;;  %v1074_v54 = vpop.f32.mrb[17].mxu0  ;;  %v1819_v56 = vpop.f32.mrb[18].mxu1 }
 0x135   : > { %v2357_v60 = vadd.f32 %v1074_v54, %v861_v50  ;;  %v1863_v61 = vpop.f32.mrb[18].mxu0  ;;  %v864_v62 = vpop.f32.mrb[19].mxu1 }
 0x136   : > { %1188 = vst.msk [vmem:[%s2237_s22 + $0x90] sm:$0xff] %vm1169_vm1, %v2353_v52  ;;  %v1232_v63 = vadd.f32 %v1231_v58, %v1230_v51  ;;  %v2362_v0 = vadd.f32 %v1863_v61, %v1819_v56  ;;  %v1077_v1 = vpop.f32.mrb[19].mxu0  ;;  %v1237_v12 = vsel %vm1169_vm1, %v2353_v52, 0.0 }
 0x137   : > { %1186 = vst.msk [vmem:[%s2237_s22 + $0x80] sm:$0xff] %vm1169_vm1, %v2357_v60  ;;  %v1233_v3 = vsel %vm1169_vm1, %v2357_v60, 0.0  ;;  %v2369_v4 = vadd.f32 %v1077_v1, %v864_v62 }
 0x138   : > { %v1234_v6 = vadd.f32 %v1233_v3, %v1232_v63  ;;  %1189 = vst.msk [vmem:[%s2237_s22 + $0x98] sm:$0xff] %vm1169_vm1, %v2362_v0  ;;  %v1239_v20 = vsel %vm1169_vm1, %v2362_v0, 0.0 }
 0x139   : > { %1187 = vst.msk [vmem:[%s2237_s22 + $0x88] sm:$0xff] %vm1169_vm1, %v2369_v4  ;;  %v1235_v7 = vsel %vm1169_vm1, %v2369_v4, 0.0 }
 0x13a   : > { %v1236_v9 = vadd.f32 %v1235_v7, %v1234_v6  ;;  %v1822_v10 = vpop.f32.mrb[20].mxu1 }
 0x13b   : > { %v1866_v13 = vpop.f32.mrb[20].mxu0  ;;  %v877_v14 = vpop.f32.mrb[21].mxu1 }
 0x13c   : > { %v1238_v15 = vadd.f32 %v1237_v12, %v1236_v9  ;;  %v2381_v16 = vadd.f32 %v1866_v13, %v1822_v10  ;;  %v1090_v17 = vpop.f32.mrb[21].mxu0  ;;  %v1823_v19 = vpop.f32.mrb[22].mxu1 }
 0x13d   : > { %v2385_v22 = vadd.f32 %v1090_v17, %v877_v14  ;;  %v1867_v23 = vpop.f32.mrb[22].mxu0  ;;  %v880_v25 = vpop.f32.mrb[23].mxu1 }
 0x13e   : > { %1192 = vst.msk [vmem:[%s2237_s22 + $0xb0] sm:$0xff] %vm1169_vm1, %v2381_v16  ;;  %v1240_v26 = vadd.f32 %v1239_v20, %v1238_v15  ;;  %v2390_v28 = vadd.f32 %v1867_v23, %v1823_v19  ;;  %v1093_v29 = vpop.f32.mrb[23].mxu0  ;;  %v1245_v38 = vsel %vm1169_vm1, %v2381_v16, 0.0 }
 0x13f   : > { %1190 = vst.msk [vmem:[%s2237_s22 + $0xa0] sm:$0xff] %vm1169_vm1, %v2385_v22  ;;  %v1241_v30 = vsel %vm1169_vm1, %v2385_v22, 0.0  ;;  %v2397_v31 = vadd.f32 %v1093_v29, %v880_v25 }
 0x140   : > { %v1242_v32 = vadd.f32 %v1241_v30, %v1240_v26  ;;  %1193 = vst.msk [vmem:[%s2237_s22 + $0xb8] sm:$0xff] %vm1169_vm1, %v2390_v28  ;;  %v1247_v47 = vsel %vm1169_vm1, %v2390_v28, 0.0 }
 0x141   : > { %1191 = vst.msk [vmem:[%s2237_s22 + $0xa8] sm:$0xff] %vm1169_vm1, %v2397_v31  ;;  %v1243_v33 = vsel %vm1169_vm1, %v2397_v31, 0.0 }
 0x142   : > { %v1244_v35 = vadd.f32 %v1243_v33, %v1242_v32  ;;  %v1826_v36 = vpop.f32.mrb[24].mxu1 }
 0x143   : > { %v1870_v39 = vpop.f32.mrb[24].mxu0  ;;  %v893_v41 = vpop.f32.mrb[25].mxu1 }
 0x144   : > { %v1246_v42 = vadd.f32 %v1245_v38, %v1244_v35  ;;  %v2409_v44 = vadd.f32 %v1870_v39, %v1826_v36  ;;  %v1106_v45 = vpop.f32.mrb[25].mxu0  ;;  %v1827_v46 = vpop.f32.mrb[26].mxu1 }
 0x145   : > { %v2413_v48 = vadd.f32 %v1106_v45, %v893_v41  ;;  %v1871_v49 = vpop.f32.mrb[26].mxu0  ;;  %v896_v50 = vpop.f32.mrb[27].mxu1 }
 0x146   : > { %1196 = vst.msk [vmem:[%s2237_s22 + $0xd0] sm:$0xff] %vm1169_vm1, %v2409_v44  ;;  %v1248_v51 = vadd.f32 %v1247_v47, %v1246_v42  ;;  %v2418_v54 = vadd.f32 %v1871_v49, %v1827_v46  ;;  %v1109_v56 = vpop.f32.mrb[27].mxu0  ;;  %v1253_v6 = vsel %vm1169_vm1, %v2409_v44, 0.0 }
 0x147   : > { %1194 = vst.msk [vmem:[%s2237_s22 + $0xc0] sm:$0xff] %vm1169_vm1, %v2413_v48  ;;  %v1249_v58 = vsel %vm1169_vm1, %v2413_v48, 0.0  ;;  %v2425_v61 = vadd.f32 %v1109_v56, %v896_v50 }
 0x148   : > { %v1250_v62 = vadd.f32 %v1249_v58, %v1248_v51  ;;  %1197 = vst.msk [vmem:[%s2237_s22 + $0xd8] sm:$0xff] %vm1169_vm1, %v2418_v54  ;;  %v1255_v15 = vsel %vm1169_vm1, %v2418_v54, 0.0 }
 0x149   : > { %1195 = vst.msk [vmem:[%s2237_s22 + $0xc8] sm:$0xff] %vm1169_vm1, %v2425_v61  ;;  %v1251_v63 = vsel %vm1169_vm1, %v2425_v61, 0.0 }
 0x14a   : > { %v1252_v1 = vadd.f32 %v1251_v63, %v1250_v62  ;;  %v1830_v3 = vpop.f32.mrb[28].mxu1 }
 0x14b   : > { %v1874_v7 = vpop.f32.mrb[28].mxu0  ;;  %v909_v9 = vpop.f32.mrb[29].mxu1 }
 0x14c   : > { %v1254_v10 = vadd.f32 %v1253_v6, %v1252_v1  ;;  %v2437_v12 = vadd.f32 %v1874_v7, %v1830_v3  ;;  %v1122_v13 = vpop.f32.mrb[29].mxu0  ;;  %v1831_v14 = vpop.f32.mrb[30].mxu1 }
 0x14d   : > { %v2441_v17 = vadd.f32 %v1122_v13, %v909_v9  ;;  %v1875_v19 = vpop.f32.mrb[30].mxu0  ;;  %v912_v20 = vpop.f32.mrb[31].mxu1 }
 0x14e   : > { %1200 = vst.msk [vmem:[%s2237_s22 + $0xf0] sm:$0xff] %vm1169_vm1, %v2437_v12  ;;  %v1256_v23 = vadd.f32 %v1255_v15, %v1254_v10  ;;  %v2446_v25 = vadd.f32 %v1875_v19, %v1831_v14  ;;  %v1125_v26 = vpop.f32.mrb[31].mxu0  ;;  %v1261_v36 = vsel %vm1169_vm1, %v2437_v12, 0.0 }
 0x14f   : > { %1198 = vst.msk [vmem:[%s2237_s22 + $0xe0] sm:$0xff] %vm1169_vm1, %v2441_v17  ;;  %v1257_v29 = vsel %vm1169_vm1, %v2441_v17, 0.0  ;;  %v2453_v30 = vadd.f32 %v1125_v26, %v912_v20 }
 0x150   : > { %v1258_v32 = vadd.f32 %v1257_v29, %v1256_v23  ;;  %1201 = vst.msk [vmem:[%s2237_s22 + $0xf8] sm:$0xff] %vm1169_vm1, %v2446_v25  ;;  %v1263_v39 = vsel %vm1169_vm1, %v2446_v25, 0.0 }
 0x151   : > { %1199 = vst.msk [vmem:[%s2237_s22 + $0xe8] sm:$0xff] %vm1169_vm1, %v2453_v30  ;;  %v1259_v33 = vsel %vm1169_vm1, %v2453_v30, 0.0 }
 0x152   : > { %v1260_v35 = vadd.f32 %v1259_v33, %v1258_v32 }
 0x154   : > { %v1262_v38 = vadd.f32 %v1261_v36, %v1260_v35 }
 0x156   : > { %v1264_v41 = vadd.f32 %v1263_v39, %v1262_v38 }
 0x158   : > { %v1265_v42 = vrot.slane %v1264_v41, 4 }
 0x15a   : > { %v1266_v45 = vadd.f32 %v1265_v42, %v1264_v41 }
 0x15c   : > { %v1267_v46 = vrot.slane %v1266_v45, 2 }
 0x15e   : > { %v1268_v47 = vadd.f32 %v1267_v46, %v1266_v45 }
 0x160   : > { %v1269_v49 = vrot.slane %v1268_v47, 1 }
 0x162   : > { %v2467_v50 = vadd.f32 %v1269_v49, %v1268_v47 }
 0x164   : > { %v2470_v51 = vmul.f32 0.00390625, %v2467_v50 }
 0x166   : > { %v1272_v56 = vsub.f32 %v2241_v55, %v2470_v51  ;;  %v1273_v58 = vsub.f32 %v2251_v59, %v2470_v51  ;;  %v1274_v62 = vsub.f32 %v2239_v53, %v2470_v51  ;;  %v1275_v63 = vsub.f32 %v2246_v57, %v2470_v51 }
 0x167   : > { %v1276_v6 = vsub.f32 %v2269_v5, %v2470_v51  ;;  %v1277_v9 = vsub.f32 %v2281_v11, %v2470_v51  ;;  %v1278_v53 = vsub.f32 %v2265_v2, %v2470_v51  ;;  %v1279_v5 = vsub.f32 %v2274_v8, %v2470_v51 }
 0x168   : > { %v1304_v1 = vmul.f32 %v1272_v56, %v1272_v56  ;;  %v1305_v3 = vmul.f32 %v1273_v58, %v1273_v58  ;;  %v1306_v7 = vmul.f32 %v1274_v62, %v1274_v62  ;;  %v1307_v10 = vmul.f32 %v1275_v63, %v1275_v63 }
 0x169   : > { %v1308_v14 = vmul.f32 %v1276_v6, %v1276_v6  ;;  %v1309_v19 = vmul.f32 %v1277_v9, %v1277_v9  ;;  %v1280_v23 = vsub.f32 %v2297_v21, %v2470_v51  ;;  %v1310_v26 = vmul.f32 %v1278_v53, %v1278_v53 }
 0x16a   : > { %v1336_v55 = vsel %vm1169_vm1, %v1304_v1, 0.0  ;;  %v1337_v59 = vsel %vm1169_vm1, %v1305_v3, 0.0  ;;  %v1339_v57 = vsel %vm1169_vm1, %v1306_v7, 0.0  ;;  %v1341_v20 = vsel %vm1169_vm1, %v1307_v10, 0.0 }
 0x16b   : > { %v1338_v13 = vadd.f32 %v1337_v59, %v1336_v55  ;;  %v1343_v29 = vsel %vm1169_vm1, %v1308_v14, 0.0  ;;  %v1281_v2 = vsub.f32 %v2309_v27, %v2470_v51  ;;  %v1311_v33 = vmul.f32 %v1279_v5, %v1279_v5 }
 0x16c   : > { %v1345_v35 = vsel %vm1169_vm1, %v1309_v19, 0.0  ;;  %v1282_v8 = vsub.f32 %v2293_v18, %v2470_v51  ;;  %v1312_v38 = vmul.f32 %v1280_v23, %v1280_v23  ;;  %v1347_v39 = vsel %vm1169_vm1, %v1310_v26, 0.0 }
 0x16d   : > { %v1340_v15 = vadd.f32 %v1339_v57, %v1338_v13  ;;  %v1283_v21 = vsub.f32 %v2302_v24, %v2470_v51  ;;  %v1313_v42 = vmul.f32 %v1281_v2, %v1281_v2  ;;  %v1349_v45 = vsel %vm1169_vm1, %v1311_v33, 0.0 }
 0x16e   : > { %v1284_v27 = vsub.f32 %v2327_v37, %v2470_v51  ;;  %v1314_v47 = vmul.f32 %v1282_v8, %v1282_v8  ;;  %v1351_v49 = vsel %vm1169_vm1, %v1312_v38, 0.0  ;;  %v1285_v18 = vsub.f32 %v2341_v43, %v2470_v51 }
 0x16f   : > { %v1342_v11 = vadd.f32 %v1341_v20, %v1340_v15  ;;  %v1315_v58 = vmul.f32 %v1283_v21, %v1283_v21  ;;  %v1353_v62 = vsel %vm1169_vm1, %v1313_v42, 0.0  ;;  %v1286_v24 = vsub.f32 %v2322_v34, %v2470_v51 }
 0x170   : > { %v1316_v1 = vmul.f32 %v1284_v27, %v1284_v27  ;;  %v1355_v3 = vsel %vm1169_vm1, %v1314_v47, 0.0  ;;  %v1287_v37 = vsub.f32 %v2333_v40, %v2470_v51  ;;  %v1317_v7 = vmul.f32 %v1285_v18, %v1285_v18 }
 0x171   : > { %v1344_v32 = vadd.f32 %v1343_v29, %v1342_v11  ;;  %v1357_v9 = vsel %vm1169_vm1, %v1315_v58, 0.0  ;;  %v1288_v43 = vsub.f32 %v2357_v60, %v2470_v51  ;;  %v1318_v55 = vmul.f32 %v1286_v24, %v1286_v24 }
 0x172   : > { %v1359_v59 = vsel %vm1169_vm1, %v1316_v1, 0.0  ;;  %v1289_v34 = vsub.f32 %v2369_v4, %v2470_v51  ;;  %v1319_v53 = vmul.f32 %v1287_v37, %v1287_v37  ;;  %v1361_v14 = vsel %vm1169_vm1, %v1317_v7, 0.0 }
 0x173   : > { %v1346_v36 = vadd.f32 %v1345_v35, %v1344_v32  ;;  %v1290_v40 = vsub.f32 %v2353_v52, %v2470_v51  ;;  %v1320_v15 = vmul.f32 %v1288_v43, %v1288_v43  ;;  %v1363_v5 = vsel %vm1169_vm1, %v1318_v55, 0.0 }
 0x174   : > { %v1291_v60 = vsub.f32 %v2362_v0, %v2470_v51  ;;  %v1321_v20 = vmul.f32 %v1289_v34, %v1289_v34  ;;  %v1365_v11 = vsel %vm1169_vm1, %v1319_v53, 0.0  ;;  %v1292_v4 = vsub.f32 %v2385_v22, %v2470_v51 }
 0x175   : > { %v1348_v41 = vadd.f32 %v1347_v39, %v1346_v36  ;;  %v1322_v26 = vmul.f32 %v1290_v40, %v1290_v40  ;;  %v1367_v29 = vsel %vm1169_vm1, %v1320_v15, 0.0  ;;  %v1293_v52 = vsub.f32 %v2397_v31, %v2470_v51 }
 0x176   : > { %v1323_v2 = vmul.f32 %v1291_v60, %v1291_v60  ;;  %v1369_v33 = vsel %vm1169_vm1, %v1321_v20, 0.0  ;;  %v1294_v0 = vsub.f32 %v2381_v16, %v2470_v51  ;;  %v1324_v36 = vmul.f32 %v1292_v4, %v1292_v4 }
 0x177   : > { %v1350_v46 = vadd.f32 %v1349_v45, %v1348_v41  ;;  %v1371_v8 = vsel %vm1169_vm1, %v1322_v26, 0.0  ;;  %v1295_v22 = vsub.f32 %v2390_v28, %v2470_v51  ;;  %v1325_v39 = vmul.f32 %v1293_v52, %v1293_v52 }
 0x178   : > { %v1373_v41 = vsel %vm1169_vm1, %v1323_v2, 0.0  ;;  %v1296_v31 = vsub.f32 %v2413_v48, %v2470_v51  ;;  %v1326_v42 = vmul.f32 %v1294_v0, %v1294_v0  ;;  %v1375_v45 = vsel %vm1169_vm1, %v1324_v36, 0.0 }
 0x179   : > { %v1352_v56 = vadd.f32 %v1351_v49, %v1350_v46  ;;  %v1297_v16 = vsub.f32 %v2425_v61, %v2470_v51  ;;  %v1327_v27 = vmul.f32 %v1295_v22, %v1295_v22  ;;  %v1377_v47 = vsel %vm1169_vm1, %v1325_v39, 0.0 }
 0x17a   : > { %v1298_v28 = vsub.f32 %v2409_v44, %v2470_v51  ;;  %v1379_v18 = vsel %vm1169_vm1, %v1326_v42, 0.0  ;;  %v1299_v48 = vsub.f32 %v2418_v54, %v2470_v51  ;;  %v1300_v61 = vsub.f32 %v2441_v17, %v2470_v51 }
 0x17b   : > { %v1354_v63 = vadd.f32 %v1353_v62, %v1352_v56  ;;  %v1328_v56 = vmul.f32 %v1296_v31, %v1296_v31  ;;  %v1329_v62 = vmul.f32 %v1297_v16, %v1297_v16  ;;  %v1301_v44 = vsub.f32 %v2453_v30, %v2470_v51 }
 0x17c   : > { %v1330_v1 = vmul.f32 %v1298_v28, %v1298_v28  ;;  %v1331_v37 = vmul.f32 %v1299_v48, %v1299_v48  ;;  %v1302_v54 = vsub.f32 %v2437_v12, %v2470_v51  ;;  %v1303_v17 = vsub.f32 %v2446_v25, %v2470_v51 }
 0x17d   : > { %v1356_v6 = vadd.f32 %v1355_v3, %v1354_v63  ;;  %v1381_v63 = vsel %vm1169_vm1, %v1327_v27, 0.0  ;;  %v1383_v3 = vsel %vm1169_vm1, %v1328_v56, 0.0  ;;  %v1385_v7 = vsel %vm1169_vm1, %v1329_v62, 0.0 }
 0x17e   : > { %v1387_v43 = vsel %vm1169_vm1, %v1330_v1, 0.0  ;;  %v1334_v30 = vmul.f32 %v1302_v54, %v1302_v54 }
 0x17f   : > { %v1358_v10 = vadd.f32 %v1357_v9, %v1356_v6 }
 0x180   : > { %v1395_v15 = vsel %vm1169_vm1, %v1334_v30, 0.0 }
 0x181   : > { %v1360_v13 = vadd.f32 %v1359_v59, %v1358_v10  ;;  %v1332_v10 = vmul.f32 %v1300_v61, %v1300_v61  ;;  %v1333_v59 = vmul.f32 %v1301_v44, %v1301_v44 }
 0x183   : > { %v1362_v57 = vadd.f32 %v1361_v14, %v1360_v13  ;;  %v1389_v13 = vsel %vm1169_vm1, %v1331_v37, 0.0  ;;  %v1391_v53 = vsel %vm1169_vm1, %v1332_v10, 0.0  ;;  %v1393_v40 = vsel %vm1169_vm1, %v1333_v59, 0.0 }
 0x185   : > { %v1364_v19 = vadd.f32 %v1363_v5, %v1362_v57  ;;  %v1335_v57 = vmul.f32 %v1303_v17, %v1303_v17 }
 0x187   : > { %v1366_v23 = vadd.f32 %v1365_v11, %v1364_v19  ;;  %v1397_v19 = vsel %vm1169_vm1, %v1335_v57, 0.0 }
 0x189   : > { %v1368_v32 = vadd.f32 %v1367_v29, %v1366_v23 }
 0x18b   : > { %v1370_v35 = vadd.f32 %v1369_v33, %v1368_v32 }
 0x18d   : > { %v1372_v38 = vadd.f32 %v1371_v8, %v1370_v35 }
 0x18f   : > { %v1374_v21 = vadd.f32 %v1373_v41, %v1372_v38 }
 0x191   : > { %v1376_v46 = vadd.f32 %v1375_v45, %v1374_v21 }
 0x193   : > { %v1378_v49 = vadd.f32 %v1377_v47, %v1376_v46 }
 0x195   : > { %v1380_v58 = vadd.f32 %v1379_v18, %v1378_v49 }
 0x197   : > { %v1382_v24 = vadd.f32 %v1381_v63, %v1380_v58 }
 0x199   : > { %v1384_v6 = vadd.f32 %v1383_v3, %v1382_v24 }
 0x19b   : > { %v1386_v9 = vadd.f32 %v1385_v7, %v1384_v6 }
 0x19d   : > { %v1388_v55 = vadd.f32 %v1387_v43, %v1386_v9 }
 0x19f   : > { %v1390_v34 = vadd.f32 %v1389_v13, %v1388_v55 }
 0x1a1   : > { %v1392_v14 = vadd.f32 %v1391_v53, %v1390_v34 }
 0x1a3   : > { %v1394_v12 = vadd.f32 %v1393_v40, %v1392_v14 }
 0x1a5   : > { %v1396_v5 = vadd.f32 %v1395_v15, %v1394_v12 }
 0x1a7   : > { %v1398_v60 = vadd.f32 %v1397_v19, %v1396_v5 }
 0x1a9   : > { %v1399_v25 = vrot.slane %v1398_v60, 4 }
 0x1ab   : > { %v1400_v51 = vadd.f32 %v1399_v25, %v1398_v60 }
 0x1ad   : > { %v1401_v20 = vrot.slane %v1400_v51, 2 }
 0x1af   : > { %v1402_v11 = vadd.f32 %v1401_v20, %v1400_v51 }
 0x1b1   : > { %v1403_v23 = vrot.slane %v1402_v11, 1 }
 0x1b3   : > { %v1404_v4 = vadd.f32 %v1403_v23, %v1402_v11 }
 0x1b5   : > { %v1406_v26 = vsel %vm1405_vm2, %v2467_v50, %v1404_v4 }
 0x1b6   : > { %1408 = vst.msk [vmem:[%s325_s26] sm:$0x3] %vm1407_vm3, %v1406_v26 }
 0x1b7 PF: > { %s15_s17 = sadd.s32 1, %s2037_s17   ;;  %s2587_s15 = smov %s2033_s16 }
 0x1b8   : > { %p12_p5 = scmp.ge.s32.totalorder %s15_s17, 4   ;;  %s2588_s16 = smov %s2590_s18 }
 0x1ba   :  { %14 = sbr.rel (!%p12_p5) target bundleno = 2 (0x2), region = 79 }

// kernel: resnet_block_forward.5
= control target key start
LH: loop header
LB: loop body
LE: loop exit
PB: predicated region body
PF: predicated region fallthrough
CT: control target
= control target key end

     0   :  { %8 = vsyncpa [#allocation3], 0  ;;  %s1200_s0 = inlined_call_operand.vmem [shape: f32[2,256,32], index: 0, kind: input, shape index: {}]   ;;  %s1201_s1 = inlined_call_operand.vmem [shape: f32[2,256,32], index: 1, kind: input, shape index: {}]   ;;  %s1202_s2 = inlined_call_operand.vmem [shape: f32[4,32], index: 2, kind: input, shape index: {}]   ;;  %s1203_s3 = inlined_call_operand.hbm [shape: f32[2,256,32], index: 3, kind: output, shape index: {}]  }
   0x1   :  { %10 = vsyncpa [#allocation3 + $0x1], 0  ;;  %s801_s12 = smov 0   ;;  %s803_s13 = smov 0  }
   0x2   :  { %s805_s14 = smov 0   ;;  %s807_s15 = smov 0  }
   0x3   :  { %s809_s16 = smov 0   ;;  %s811_s17 = smov 0  }
   0x4 LB: > { %s623_s18 = sadd.s32 4294967295, %s776_s17   ;;  %s624_s19 = sadd.s32 4294967294, %s776_s17   ;;  %s776_s17 = sphi %s811_s17, %s16_s17   ;;  %s772_s16 = sphi %s809_s16, %s1210_s16   ;;  %s768_s15 = sphi %s807_s15, %s1209_s15   ;;  %s764_s14 = sphi %s805_s14, %s1208_s14   ;;  %s760_s13 = sphi %s803_s13, %s1207_s13   ;;  %s756_s12 = sphi %s801_s12, %s1206_s12  }
   0x5   : > { %s28_s20 = sadd.s32 1, %s772_s16  ;;  %s114_s21 = sadd.s32 1, %s764_s14 }
   0x6   : > { %p30_p0 = scmp.ge.s32.totalorder %s28_s20, 2  ;;  %p124_p1 = scmp.ne.s32.totalorder %s764_s14, %s760_s13 }
   0x7   : > { %p125_p2 = scmp.eq.s32.totalorder %s623_s18, 1  ;;  %p130_p3 = scmp.ne.s32.totalorder %s760_s13, %s756_s12 }
   0x8   : > { %s1212_s20 = smov (%p30_p0, %s28_s20), 0  ;;  %p131_p5 = scmp.eq.s32.totalorder %s624_s19, 1 }
   0x9   : > { %p841_p4 = por %p125_p2, %p124_p1  ;;  %s109_s23 = ssub.s32 %s772_s16, %s1212_s20 }
   0xa   : > { %p627_p6 = scmp.ge.s32.totalorder %s776_s17, 1  ;;  %p112_p7 = scmp.eq.s32.totalorder %s109_s23, 0 }
   0xb   : > { %p848_p8 = por %p131_p5, %p130_p3  ;;  %p178_p9 = scmp.lt.s32.totalorder %s776_s17, 3 }
   0xc   : > { %s854_s25 = scalar_select %p112_p7, %s764_s14, %s114_s21  }
   0xd   : > { %p179_p10 = pnand %p627_p6, %p178_p9 }
   0xe   : > { %p216_p11 = scmp.lt.s32.totalorder (!%p179_p10), %s768_s15, 1  ;;  %v269_v0 = vlaneseq (!%p179_p10)  ;;  %v236_v2 = vld [vmem:[%s1202_s2] sm:$0xf] (!%p179_p10)  ;;  %s212_s9 = sand.u32 (!%p179_p10), 1, %s760_s13   ;;  %vm477_vm0 = vcmask (!%p179_p10), 261120  }
   0xf   : > { %182 = sbr.rel (%p179_p10) target bundleno = 88 (0x58), region = 32  ;;  %s897_s10 = sshll.u32 (!%p179_p10), %s212_s9, 8 }
  0x10   : > { %v270_v1 = vshrl.u32 (!%p179_p10), %v269_v0, 7  ;;  %s929_s11 = scalar_lea.vmem (!%p179_p10), [#allocation2], %s897_s10  ;;  %s640_s18 = sshll.u32 (!%p179_p10), %s768_s15, 12 }
  0x11   : > { %s526_s19 = sshll.u32 (!%p179_p10), %s929_s11, 4  ;;  %s778_s28 = smov (!%p179_p10), [#allocation2]   ;;  %s1145_s19 = int_to_ptr.vmem [resolvable:$true] %s526_s19 }
  0x12   : > { %v271_v3 = vsub.s32 (!%p179_p10), 0, %v270_v1  ;;  %v307_v4 = vsub.s32 (!%p179_p10), 1, %v270_v1  ;;  %v375_v5 = vsub.s32 (!%p179_p10), 2, %v270_v1  ;;  %v443_v6 = vsub.s32 (!%p179_p10), 3, %v270_v1  ;;  %s698_s27 = scalar_lea.vmem (!%p179_p10), %s1145_s19, 4096 }
  0x13   : > { %p699_p12 = scmp.ne.s32.totalorder (!%p179_p10), %s1145_s19, %s698_s27 }
  0x14   : > { %v871_v7 = vrot.slane (!%p179_p10), %v236_v2, %v271_v3  ;;  %v873_v8 = vrot.slane (!%p179_p10), %v236_v2, %v307_v4  ;;  %v875_v9 = vrot.slane (!%p179_p10), %v236_v2, %v375_v5  ;;  %v887_v19 = vrot.slane (!%p179_p10), %v236_v2, %v443_v6 }
  0x15   : > { %p700_p13 = pnand (!%p179_p10), %p699_p12, %p841_p4 }
  0x16   : > { %s217_s26 = scalar_select %p216_p11, %s768_s15, 1 }
  0x17   : > { %s1154_s15 = scalar_lea.sflag [#allocation3], %s212_s9  ;;  %p701_p0 = pneg %p700_p13 }
  0x18   : > { %s638_s29 = sshll.u32 %s217_s26, 8  ;;  %s1143_s26 = scalar_lea.hbm %s1203_s3, %s640_s18 }
  0x19   : > { %s864_s5 = scalar_lea.vmem %s1200_s0, %s638_s29  ;;  %s869_s8 = scalar_lea.vmem %s1201_s1, %s638_s29 }
  0x1a   : > { %v237_v10 = vld [vmem:[%s864_s5] sm:$0xff]  ;;  %v238_v12 = vld [vmem:[%s864_s5 + $0x8] sm:$0xff]  ;;  %v239_v17 = vld [vmem:[%s864_s5 + $0x10] sm:$0xff]  ;;  %s702_s29 = sshll.u32 %s778_s28, 4  ;;  %s703_s29 = int_to_ptr.vmem [resolvable:$false] %s702_s29 }
  0x1b   : > { %v341_v11 = vld [vmem:[%s869_s8] sm:$0xff]  ;;  %v273_v13 = vmul.f32 %v871_v7, %v237_v10  ;;  %v274_v15 = vmul.f32 %v871_v7, %v238_v12  ;;  %v342_v16 = vld [vmem:[%s869_s8 + $0x8] sm:$0xff]  ;;  %v343_v18 = vld [vmem:[%s869_s8 + $0x10] sm:$0xff]  ;;  %v275_v21 = vmul.f32 %v871_v7, %v239_v17  ;;  %s704_s30 = scalar_lea.vmem %s703_s29, 8192  ;;  %p705_p1 = scmp.lt.s32.totalorder %s1145_s19, %s703_s29 }
  0x1c   : > { %v377_v14 = vmul.f32 %v875_v9, %v341_v11  ;;  %v378_v20 = vmul.f32 %v875_v9, %v342_v16  ;;  %v379_v22 = vmul.f32 %v875_v9, %v343_v18  ;;  %v240_v23 = vld [vmem:[%s864_s5 + $0x18] sm:$0xff]  ;;  %v241_v25 = vld [vmem:[%s864_s5 + $0x20] sm:$0xff]  ;;  %v242_v31 = vld [vmem:[%s864_s5 + $0x28] sm:$0xff]  ;;  %p706_p2 = scmp.lt.s32.totalorder %s704_s30, %s698_s27 }
  0x1d   : > { %v344_v24 = vld [vmem:[%s869_s8 + $0x18] sm:$0xff]  ;;  %v309_v26 = vadd.f32 %v873_v8, %v273_v13  ;;  %v310_v27 = vadd.f32 %v873_v8, %v274_v15  ;;  %v276_v28 = vmul.f32 %v871_v7, %v240_v23  ;;  %v345_v30 = vld [vmem:[%s869_s8 + $0x20] sm:$0xff]  ;;  %v346_v32 = vld [vmem:[%s869_s8 + $0x28] sm:$0xff]  ;;  %v311_v33 = vadd.f32 %v873_v8, %v275_v21 }
  0x1e   : > { %v380_v29 = vmul.f32 %v875_v9, %v344_v24  ;;  %v277_v34 = vmul.f32 %v871_v7, %v241_v25  ;;  %v381_v35 = vmul.f32 %v875_v9, %v345_v30  ;;  %v278_v36 = vmul.f32 %v871_v7, %v242_v31  ;;  %v243_v37 = vld [vmem:[%s864_s5 + $0x30] sm:$0xff]  ;;  %v244_v47 = vld [vmem:[%s864_s5 + $0x38] sm:$0xff]  ;;  %v245_v49 = vld [vmem:[%s864_s5 + $0x40] sm:$0xff]  ;;  %p707_p3 = por %p706_p2, %p705_p1 }
  0x1f   : > { %v347_v38 = vld [vmem:[%s869_s8 + $0x30] sm:$0xff]  ;;  %v409_v39 = vadd.f32 %v377_v14, %v309_v26  ;;  %v410_v40 = vadd.f32 %v378_v20, %v310_v27  ;;  %v312_v41 = vadd.f32 %v873_v8, %v276_v28  ;;  %v382_v42 = vmul.f32 %v875_v9, %v346_v32  ;;  %v348_v48 = vld [vmem:[%s869_s8 + $0x38] sm:$0xff]  ;;  %v349_v54 = vld [vmem:[%s869_s8 + $0x40] sm:$0xff] }
  0x20   : > { %v411_v43 = vadd.f32 %v379_v22, %v311_v33  ;;  %v313_v44 = vadd.f32 %v873_v8, %v277_v34  ;;  %v314_v45 = vadd.f32 %v873_v8, %v278_v36  ;;  %v279_v46 = vmul.f32 %v871_v7, %v243_v37  ;;  %v246_v59 = vld [vmem:[%s864_s5 + $0x48] sm:$0xff]  ;;  %v247_v1 = vld [vmem:[%s864_s5 + $0x50] sm:$0xff]  ;;  %v248_v3 = vld [vmem:[%s864_s5 + $0x58] sm:$0xff]  ;;  %p708_p5 = pnand %p707_p3, %p701_p0 }
  0x21   : > { %v445_v50 = vadd.f32 %v887_v19, %v409_v39  ;;  %v446_v51 = vadd.f32 %v887_v19, %v410_v40  ;;  %v412_v52 = vadd.f32 %v380_v29, %v312_v41  ;;  %v383_v53 = vmul.f32 %v875_v9, %v347_v38  ;;  %v350_v60 = vld [vmem:[%s869_s8 + $0x48] sm:$0xff]  ;;  %v351_v2 = vld [vmem:[%s869_s8 + $0x50] sm:$0xff]  ;;  %v352_v11 = vld [vmem:[%s869_s8 + $0x58] sm:$0xff] }
  0x22   : > { %v447_v55 = vadd.f32 %v887_v19, %v411_v43  ;;  %v413_v56 = vadd.f32 %v381_v35, %v313_v44  ;;  %v414_v57 = vadd.f32 %v382_v42, %v314_v45  ;;  %v315_v58 = vadd.f32 %v873_v8, %v279_v46  ;;  %v249_v16 = vld [vmem:[%s864_s5 + $0x60] sm:$0xff]  ;;  %v250_v23 = vld [vmem:[%s864_s5 + $0x68] sm:$0xff]  ;;  %v251_v33 = vld [vmem:[%s864_s5 + $0x70] sm:$0xff] }
  0x23   : > { %478 = vst.msk [vmem:[%s929_s11] sm:$0xff] %vm477_vm0, %v445_v50  ;;  %479 = vst.msk [vmem:[%s929_s11 + $0x8] sm:$0xff] %vm477_vm0, %v446_v51  ;;  %v448_v61 = vadd.f32 %v887_v19, %v412_v52  ;;  %v280_v62 = vmul.f32 %v871_v7, %v244_v47  ;;  %v384_v63 = vmul.f32 %v875_v9, %v348_v48  ;;  %v353_v17 = vld [vmem:[%s869_s8 + $0x60] sm:$0xff]  ;;  %v354_v28 = vld [vmem:[%s869_s8 + $0x68] sm:$0xff] }
  0x24   : > { %v281_v0 = vmul.f32 %v871_v7, %v245_v49  ;;  %480 = vst.msk [vmem:[%s929_s11 + $0x10] sm:$0xff] %vm477_vm0, %v447_v55  ;;  %v449_v4 = vadd.f32 %v887_v19, %v413_v56  ;;  %v450_v5 = vadd.f32 %v887_v19, %v414_v57  ;;  %v415_v6 = vadd.f32 %v383_v53, %v315_v58  ;;  %v355_v34 = vld [vmem:[%s869_s8 + $0x70] sm:$0xff]  ;;  %v252_v39 = vld [vmem:[%s864_s5 + $0x78] sm:$0xff]  ;;  %v253_v45 = vld [vmem:[%s864_s5 + $0x80] sm:$0xff] }
  0x25   : > { %v385_v10 = vmul.f32 %v875_v9, %v349_v54  ;;  %481 = vst.msk [vmem:[%s929_s11 + $0x18] sm:$0xff] %vm477_vm0, %v448_v61  ;;  %v316_v12 = vadd.f32 %v873_v8, %v280_v62  ;;  %v282_v14 = vmul.f32 %v871_v7, %v246_v59  ;;  %v386_v15 = vmul.f32 %v875_v9, %v350_v60  ;;  %v356_v44 = vld [vmem:[%s869_s8 + $0x78] sm:$0xff]  ;;  %v357_v50 = vld [vmem:[%s869_s8 + $0x80] sm:$0xff]  ;;  %v254_v51 = vld [vmem:[%s864_s5 + $0x88] sm:$0xff] }
  0x26   : > { %v317_v13 = vadd.f32 %v873_v8, %v281_v0  ;;  %482 = vst.msk [vmem:[%s929_s11 + $0x20] sm:$0xff] %vm477_vm0, %v449_v4  ;;  %483 = vst.msk [vmem:[%s929_s11 + $0x28] sm:$0xff] %vm477_vm0, %v450_v5  ;;  %v451_v18 = vadd.f32 %v887_v19, %v415_v6  ;;  %v283_v20 = vmul.f32 %v871_v7, %v247_v1  ;;  %v358_v56 = vld [vmem:[%s869_s8 + $0x88] sm:$0xff]  ;;  %v255_v61 = vld [vmem:[%s864_s5 + $0x90] sm:$0xff] }
  0x27   : > { %v387_v21 = vmul.f32 %v875_v9, %v351_v2  ;;  %v284_v22 = vmul.f32 %v871_v7, %v248_v3  ;;  %v416_v24 = vadd.f32 %v384_v63, %v316_v12  ;;  %v318_v26 = vadd.f32 %v873_v8, %v282_v14  ;;  %v359_v62 = vld [vmem:[%s869_s8 + $0x90] sm:$0xff]  ;;  %v256_v3 = vld [vmem:[%s864_s5 + $0x98] sm:$0xff]  ;;  %v257_v12 = vld [vmem:[%s864_s5 + $0xa0] sm:$0xff] }
  0x28   : > { %v417_v25 = vadd.f32 %v385_v10, %v317_v13  ;;  %v388_v27 = vmul.f32 %v875_v9, %v352_v11  ;;  %484 = vst.msk [vmem:[%s929_s11 + $0x30] sm:$0xff] %vm477_vm0, %v451_v18  ;;  %v319_v29 = vadd.f32 %v873_v8, %v283_v20  ;;  %v285_v31 = vmul.f32 %v871_v7, %v249_v16  ;;  %v360_v4 = vld [vmem:[%s869_s8 + $0x98] sm:$0xff]  ;;  %v258_v18 = vld [vmem:[%s864_s5 + $0xa8] sm:$0xff] }
  0x29   : > { %v320_v30 = vadd.f32 %v873_v8, %v284_v22  ;;  %v389_v32 = vmul.f32 %v875_v9, %v353_v17  ;;  %v452_v35 = vadd.f32 %v887_v19, %v416_v24  ;;  %v418_v37 = vadd.f32 %v386_v15, %v318_v26  ;;  %v361_v17 = vld [vmem:[%s869_s8 + $0xa0] sm:$0xff]  ;;  %v362_v24 = vld [vmem:[%s869_s8 + $0xa8] sm:$0xff] }
  0x2a   : > { %v453_v36 = vadd.f32 %v887_v19, %v417_v25  ;;  %v286_v38 = vmul.f32 %v871_v7, %v250_v23  ;;  %v419_v40 = vadd.f32 %v387_v21, %v319_v29  ;;  %v321_v42 = vadd.f32 %v873_v8, %v285_v31  ;;  %v259_v29 = vld [vmem:[%s864_s5 + $0xb0] sm:$0xff] }
  0x2b   : > { %v420_v41 = vadd.f32 %v388_v27, %v320_v30  ;;  %v390_v43 = vmul.f32 %v875_v9, %v354_v28  ;;  %485 = vst.msk [vmem:[%s929_s11 + $0x38] sm:$0xff] %vm477_vm0, %v452_v35  ;;  %v454_v46 = vadd.f32 %v887_v19, %v418_v37  ;;  %v287_v48 = vmul.f32 %v871_v7, %v251_v33  ;;  %v363_v30 = vld [vmem:[%s869_s8 + $0xb0] sm:$0xff]  ;;  %v260_v35 = vld [vmem:[%s864_s5 + $0xb8] sm:$0xff] }
  0x2c   : > { %486 = vst.msk [vmem:[%s929_s11 + $0x40] sm:$0xff] %vm477_vm0, %v453_v36  ;;  %v322_v47 = vadd.f32 %v873_v8, %v286_v38  ;;  %v391_v49 = vmul.f32 %v875_v9, %v355_v34  ;;  %v455_v52 = vadd.f32 %v887_v19, %v419_v40  ;;  %v421_v54 = vadd.f32 %v389_v32, %v321_v42  ;;  %v364_v36 = vld [vmem:[%s869_s8 + $0xb8] sm:$0xff] }
  0x2d   : > { %v456_v53 = vadd.f32 %v887_v19, %v420_v41  ;;  %v288_v55 = vmul.f32 %v871_v7, %v252_v39  ;;  %487 = vst.msk [vmem:[%s929_s11 + $0x48] sm:$0xff] %vm477_vm0, %v454_v46  ;;  %v323_v58 = vadd.f32 %v873_v8, %v287_v48  ;;  %v392_v59 = vmul.f32 %v875_v9, %v356_v44  ;;  %v261_v41 = vld [vmem:[%s864_s5 + $0xc0] sm:$0xff] }
  0x2e   : > { %v422_v57 = vadd.f32 %v390_v43, %v322_v47  ;;  %v289_v60 = vmul.f32 %v871_v7, %v253_v45  ;;  %488 = vst.msk [vmem:[%s929_s11 + $0x50] sm:$0xff] %vm477_vm0, %v455_v52  ;;  %v457_v63 = vadd.f32 %v887_v19, %v421_v54  ;;  %v393_v1 = vmul.f32 %v875_v9, %v357_v50  ;;  %v365_v46 = vld [vmem:[%s869_s8 + $0xc0] sm:$0xff]  ;;  %v262_v47 = vld [vmem:[%s864_s5 + $0xc8] sm:$0xff] }
  0x2f   : > { %489 = vst.msk [vmem:[%s929_s11 + $0x58] sm:$0xff] %vm477_vm0, %v456_v53  ;;  %v324_v0 = vadd.f32 %v873_v8, %v288_v55  ;;  %v290_v2 = vmul.f32 %v871_v7, %v254_v51  ;;  %v423_v6 = vadd.f32 %v391_v49, %v323_v58  ;;  %v394_v11 = vmul.f32 %v875_v9, %v358_v56  ;;  %v366_v52 = vld [vmem:[%s869_s8 + $0xc8] sm:$0xff]  ;;  %v367_v58 = vld [vmem:[%s869_s8 + $0xd0] sm:$0xff] }
  0x30   : > { %v458_v5 = vadd.f32 %v887_v19, %v422_v57  ;;  %v325_v10 = vadd.f32 %v873_v8, %v289_v60  ;;  %490 = vst.msk [vmem:[%s929_s11 + $0x60] sm:$0xff] %vm477_vm0, %v457_v63  ;;  %v291_v15 = vmul.f32 %v871_v7, %v255_v61  ;;  %v395_v16 = vmul.f32 %v875_v9, %v359_v62  ;;  %v263_v57 = vld [vmem:[%s864_s5 + $0xd0] sm:$0xff]  ;;  %v264_v63 = vld [vmem:[%s864_s5 + $0xd8] sm:$0xff] }
  0x31   : > { %v424_v13 = vadd.f32 %v392_v59, %v324_v0  ;;  %v326_v14 = vadd.f32 %v873_v8, %v290_v2  ;;  %v459_v20 = vadd.f32 %v887_v19, %v423_v6  ;;  %v292_v22 = vmul.f32 %v871_v7, %v256_v3  ;;  %v368_v0 = vld [vmem:[%s869_s8 + $0xd8] sm:$0xff] }
  0x32   : > { %491 = vst.msk [vmem:[%s929_s11 + $0x68] sm:$0xff] %vm477_vm0, %v458_v5  ;;  %v425_v21 = vadd.f32 %v393_v1, %v325_v10  ;;  %v396_v23 = vmul.f32 %v875_v9, %v360_v4  ;;  %v327_v27 = vadd.f32 %v873_v8, %v291_v15  ;;  %v293_v28 = vmul.f32 %v871_v7, %v257_v12  ;;  %v265_v5 = vld [vmem:[%s864_s5 + $0xe0] sm:$0xff] }
  0x33   : > { %v460_v25 = vadd.f32 %v887_v19, %v424_v13  ;;  %v426_v26 = vadd.f32 %v394_v11, %v326_v14  ;;  %492 = vst.msk [vmem:[%s929_s11 + $0x70] sm:$0xff] %vm477_vm0, %v459_v20  ;;  %v328_v32 = vadd.f32 %v873_v8, %v292_v22  ;;  %v397_v33 = vmul.f32 %v875_v9, %v361_v17  ;;  %v369_v13 = vld [vmem:[%s869_s8 + $0xe0] sm:$0xff]  ;;  %v266_v14 = vld [vmem:[%s864_s5 + $0xe8] sm:$0xff] }
  0x34   : > { %v461_v31 = vadd.f32 %v887_v19, %v425_v21  ;;  %v294_v34 = vmul.f32 %v871_v7, %v258_v18  ;;  %v427_v38 = vadd.f32 %v395_v16, %v327_v27  ;;  %v329_v39 = vadd.f32 %v873_v8, %v293_v28  ;;  %v370_v20 = vld [vmem:[%s869_s8 + $0xe8] sm:$0xff] }
  0x35   : > { %493 = vst.msk [vmem:[%s929_s11 + $0x78] sm:$0xff] %vm477_vm0, %v460_v25  ;;  %v462_v37 = vadd.f32 %v887_v19, %v426_v26  ;;  %v398_v40 = vmul.f32 %v875_v9, %v362_v24  ;;  %v428_v42 = vadd.f32 %v396_v23, %v328_v32  ;;  %v295_v44 = vmul.f32 %v871_v7, %v259_v29  ;;  %v267_v25 = vld [vmem:[%s864_s5 + $0xf0] sm:$0xff]  ;;  %v372_v32 = vld [vmem:[%s869_s8 + $0xf8] sm:$0xff] }
  0x36   : > { %494 = vst.msk [vmem:[%s929_s11 + $0x80] sm:$0xff] %vm477_vm0, %v461_v31  ;;  %v330_v43 = vadd.f32 %v873_v8, %v294_v34  ;;  %v399_v45 = vmul.f32 %v875_v9, %v363_v30  ;;  %v463_v48 = vadd.f32 %v887_v19, %v427_v38  ;;  %v429_v49 = vadd.f32 %v397_v33, %v329_v39  ;;  %v371_v26 = vld [vmem:[%s869_s8 + $0xf0] sm:$0xff]  ;;  %v268_v31 = vld [vmem:[%s864_s5 + $0xf8] sm:$0xff] }
  0x37   : > { %495 = vst.msk [vmem:[%s929_s11 + $0x88] sm:$0xff] %vm477_vm0, %v462_v37  ;;  %v296_v50 = vmul.f32 %v871_v7, %v260_v35  ;;  %v400_v51 = vmul.f32 %v875_v9, %v364_v36  ;;  %v464_v53 = vadd.f32 %v887_v19, %v428_v42  ;;  %v331_v55 = vadd.f32 %v873_v8, %v295_v44 }
  0x38   : > { %v430_v54 = vadd.f32 %v398_v40, %v330_v43  ;;  %v297_v56 = vmul.f32 %v871_v7, %v261_v41  ;;  %496 = vst.msk [vmem:[%s929_s11 + $0x90] sm:$0xff] %vm477_vm0, %v463_v48  ;;  %v465_v59 = vadd.f32 %v887_v19, %v429_v49  ;;  %v401_v61 = vmul.f32 %v875_v9, %v365_v46 }
  0x39   : > { %v332_v60 = vadd.f32 %v873_v8, %v296_v50  ;;  %v298_v62 = vmul.f32 %v871_v7, %v262_v47  ;;  %497 = vst.msk [vmem:[%s929_s11 + $0x98] sm:$0xff] %vm477_vm0, %v464_v53  ;;  %v431_v2 = vadd.f32 %v399_v45, %v331_v55  ;;  %v402_v4 = vmul.f32 %v875_v9, %v366_v52 }
  0x3a   : > { %v466_v1 = vadd.f32 %v887_v19, %v430_v54  ;;  %v333_v3 = vadd.f32 %v873_v8, %v297_v56  ;;  %498 = vst.msk [vmem:[%s929_s11 + $0xa0] sm:$0xff] %vm477_vm0, %v465_v59  ;;  %v299_v11 = vmul.f32 %v871_v7, %v263_v57  ;;  %v403_v12 = vmul.f32 %v875_v9, %v367_v58 }
  0x3b   : > { %v432_v6 = vadd.f32 %v400_v51, %v332_v60  ;;  %v334_v10 = vadd.f32 %v873_v8, %v298_v62  ;;  %v467_v15 = vadd.f32 %v887_v19, %v431_v2  ;;  %v300_v17 = vmul.f32 %v871_v7, %v264_v63 }
  0x3c   : > { %499 = vst.msk [vmem:[%s929_s11 + $0xa8] sm:$0xff] %vm477_vm0, %v466_v1  ;;  %v433_v16 = vadd.f32 %v401_v61, %v333_v3  ;;  %v404_v18 = vmul.f32 %v875_v9, %v368_v0  ;;  %v335_v23 = vadd.f32 %v873_v8, %v299_v11  ;;  %v301_v24 = vmul.f32 %v871_v7, %v265_v5 }
  0x3d   : > { %v468_v21 = vadd.f32 %v887_v19, %v432_v6  ;;  %v434_v22 = vadd.f32 %v402_v4, %v334_v10  ;;  %500 = vst.msk [vmem:[%s929_s11 + $0xb0] sm:$0xff] %vm477_vm0, %v467_v15  ;;  %v336_v28 = vadd.f32 %v873_v8, %v300_v17  ;;  %v405_v29 = vmul.f32 %v875_v9, %v369_v13 }
  0x3e   : > { %v469_v27 = vadd.f32 %v887_v19, %v433_v16  ;;  %v302_v30 = vmul.f32 %v871_v7, %v266_v14  ;;  %v435_v34 = vadd.f32 %v403_v12, %v335_v23  ;;  %v337_v35 = vadd.f32 %v873_v8, %v301_v24 }
  0x3f   : > { %501 = vst.msk [vmem:[%s929_s11 + $0xb8] sm:$0xff] %vm477_vm0, %v468_v21  ;;  %v470_v33 = vadd.f32 %v887_v19, %v434_v22  ;;  %v406_v36 = vmul.f32 %v875_v9, %v370_v20  ;;  %v436_v37 = vadd.f32 %v404_v18, %v336_v28  ;;  %v303_v39 = vmul.f32 %v871_v7, %v267_v25 }
  0x40   : > { %502 = vst.msk [vmem:[%s929_s11 + $0xc0] sm:$0xff] %vm477_vm0, %v469_v27  ;;  %v338_v38 = vadd.f32 %v873_v8, %v302_v30  ;;  %v407_v40 = vmul.f32 %v875_v9, %v371_v26  ;;  %v471_v41 = vadd.f32 %v887_v19, %v435_v34  ;;  %v437_v42 = vadd.f32 %v405_v29, %v337_v35 }
  0x41   : > { %503 = vst.msk [vmem:[%s929_s11 + $0xc8] sm:$0xff] %vm477_vm0, %v470_v33  ;;  %v304_v43 = vmul.f32 %v871_v7, %v268_v31  ;;  %v408_v44 = vmul.f32 %v875_v9, %v372_v32  ;;  %v472_v45 = vadd.f32 %v887_v19, %v436_v37  ;;  %v339_v47 = vadd.f32 %v873_v8, %v303_v39 }
  0x42   : > { %v438_v46 = vadd.f32 %v406_v36, %v338_v38  ;;  %504 = vst.msk [vmem:[%s929_s11 + $0xd0] sm:$0xff] %vm477_vm0, %v471_v41  ;;  %v473_v48 = vadd.f32 %v887_v19, %v437_v42 }
  0x43   : > { %v340_v49 = vadd.f32 %v873_v8, %v304_v43  ;;  %505 = vst.msk [vmem:[%s929_s11 + $0xd8] sm:$0xff] %vm477_vm0, %v472_v45  ;;  %v439_v9 = vadd.f32 %v407_v40, %v339_v47 }
  0x44   : > { %v474_v7 = vadd.f32 %v887_v19, %v438_v46  ;;  %506 = vst.msk [vmem:[%s929_s11 + $0xe0] sm:$0xff] %vm477_vm0, %v473_v48 }
  0x45   : > { %v440_v50 = vadd.f32 %v408_v44, %v340_v49  ;;  %v475_v51 = vadd.f32 %v887_v19, %v439_v9 }
  0x46   : > { %507 = vst.msk [vmem:[%s929_s11 + $0xe8] sm:$0xff] %vm477_vm0, %v474_v7 }
  0x47   : > { %v476_v8 = vadd.f32 %v887_v19, %v440_v50  ;;  %508 = vst.msk [vmem:[%s929_s11 + $0xf0] sm:$0xff] %vm477_vm0, %v475_v51 }
  0x49   : > { %509 = vst.msk [vmem:[%s929_s11 + $0xf8] sm:$0xff] %vm477_vm0, %v476_v8 }
  0x4a   : > { %711 = shalt.err (!%p708_p5)
}
  0x4b   : > { %s712_s4 = scalar_lea.hbm %s1143_s26, 4096  ;;  %s716_s7 = scalar_lea.hbm %s1203_s3, 8192 }
  0x4c   : > { %p713_p6 = scmp.ne.s32.totalorder %s1143_s26, %s712_s4  ;;  %p717_p10 = scmp.lt.u32.totalorder %s1143_s26, %s1203_s3 }
  0x4d   : > { %p718_p11 = scmp.lt.u32.totalorder %s716_s7, %s712_s4  ;;  %p720_p13 = scmp.lt.u32.totalorder %s712_s4, %s1143_s26 }
  0x4e   : > { %p714_p7 = pnand %p713_p6, %p841_p4 }
  0x4f   : > { %p719_p12 = por %p718_p11, %p717_p10 }
  0x50   : > { %p715_p9 = pneg %p714_p7 }
  0x51   : > { %p721_p0 = por %p720_p13, %p719_p12 }
  0x53   : > { %p722_p1 = pnand %p721_p0, %p715_p9 }
  0x55   : > { %725 = shalt.err (!%p722_p1)
}
  0x56   : > { %s779_s10 = smov 128   ;;  %s780_s11 = smov 8  }
  0x57   : > { %641 = dma.vmem_to_hbm [thread:$0]  (%p841_p4), %s1145_s19, 4096, %s1143_s26, %s1154_s15, %s779_s10, %s779_s10, %s780_s11  }
  0x58 PF: > { %p647_p2 = scmp.ge.s32.totalorder %s776_s17, 2  ;;  %s541_s18 = sand.u32 1, %s756_s12  }
  0x59   : > { %s542_s21 = scalar_lea.sflag [#allocation3], %s541_s18 }
  0x5a   : > { %p644_p3 = pnand %p647_p2, %p848_p8 }
  0x5c   : > { %751 = dma.done.wait (!%p644_p3), %s542_s21, 4096  }
  0x5d   : > { %753 = vsyncadd (!%p644_p3), %s542_s21, 4294963200  ;;  %s16_s17 = sadd.s32 1, %s776_s17   ;;  %s1206_s12 = smov %s760_s13 }
  0x5e   : > { %p13_p5 = scmp.ge.s32.totalorder %s16_s17, 4   ;;  %s1207_s13 = smov %s764_s14 }
  0x5f   : > { %s1208_s14 = smov %s854_s25  ;;  %s1209_s15 = smov %s772_s16 }
  0x60   : > { %s1210_s16 = smov %s1212_s20  ;;  %15 = sbr.rel (!%p13_p5) target bundleno = 4 (0x4), region = 70 }
  0x67   :  { %547 = vsyncpa [#allocation3], 1 }
  0x68   :  { %549 = vsyncpa [#allocation3 + $0x1], 1 }

</bundles_post_ra>
